<compile_context>
chip_gen: v7x
topology: tpu7x:2x2x1
jax: 0.10.0
libtpu: 0.0.40
codegen_flags: <defaults>
</compile_context>

<pallas_src>
import functools

import jax
import jax.numpy as jnp
from jax.experimental import pallas as pl
from jax.experimental.pallas import tpu as pltpu

BN_EPS = 1e-5
MAX_POINT_TILE = 4096                    # peak live VMEM ~8 MiB at this tile
VMEM_LIMIT_BYTES = 48 * 1024 * 1024      # above 16/32 MiB scoped defaults, < 64 MiB physical


def _choose_point_tile(n):
    """Largest legal point tile: full axis if small, else a /128 divisor <= 4096."""
    if n <= MAX_POINT_TILE:
        return n
    for t in (4096, 2048, 1024, 512, 256, 128):
        if n % t == 0:
            return t
    # TODO(synk): pad irregular large N instead of running the whole axis per batch.
    return n


def _encode_kernel(*refs, stage):
    """Shared body for the 4 sweeps.

    stage 1..3: compute the conv{stage} pre-activation for this tile (earlier
                layers recomputed with BN already folded into their weights)
                and accumulate per-channel sum / sum-of-squares.
    stage 4:    full forward through conv4, accumulate the per-batch max over
                points (MaxPool1d(N) + Flatten).
    Activations are channel-major (C, T) so the point axis stays on lanes.
    """
    b = pl.program_id(0)
    t = pl.program_id(1)
    nt = pl.num_programs(1)
    is_first = jnp.logical_and(b == 0, t == 0)

    it = iter(refs)
    x_ref = next(it)
    w1 = next(it)[...]                   # (64, 3) f32 (BN-folded when stage > 1)
    b1 = next(it)[...]                   # (64, 1) f32

    # conv1 (contraction dim = 3) on the VPU: 3 broadcast multiply-adds.
    x = x_ref[0].astype(jnp.float32)     # (3, T)
    y = (w1[:, 0:1] * x[0:1, :]
         + w1[:, 1:2] * x[1:2, :]
         + w1[:, 2:3] * x[2:3, :]
         + b1)                           # (64, T) f32

    # Later layers: ReLU then bf16 MXU matmul with f32 accumulation.  Earlier
    # layers use BN-folded weights; the layer whose stats are being gathered
    # (and conv4) uses raw weights.
    for _ in range(stage - 1):
        wt = next(it)[...]               # (Cout, Cin) bf16
        bias = next(it)[...]             # (Cout, 1) f32
        h = jnp.maximum(y, 0.0).astype(jnp.bfloat16)
        y = jnp.dot(wt, h, preferred_element_type=jnp.float32) + bias

    if stage < 4:
        # Accumulate BN statistics (var = E[y^2] - mean^2, single pass).
        sum_ref = next(it)               # (C, 1) f32, resident accumulator
        sq_ref = next(it)                # (C, 1) f32, resident accumulator

        @pl.when(is_first)
        def _():
            sum_ref[...] = jnp.zeros_like(sum_ref)
            sq_ref[...] = jnp.zeros_like(sq_ref)

        sum_ref[...] += jnp.sum(y, axis=-1, keepdims=True)
        sq_ref[...] += jnp.sum(y * y, axis=-1, keepdims=True)
    else:
        # MaxPool1d over the point axis, per batch element.
        out_ref = next(it)               # (128, B) channel-major; wrapper transposes
        acc_ref = next(it)               # (128, 1) VMEM scratch: running max over tiles

        m = jnp.max(y, axis=-1, keepdims=True)           # (128, 1)

        @pl.when(t == 0)
        def _():
            acc_ref[...] = m

        @pl.when(t > 0)
        def _():
            acc_ref[...] = jnp.maximum(acc_ref[...], m)

        @pl.when(is_first)
        def _():
            out_ref[...] = jnp.zeros_like(out_ref)       # hygiene init

        @pl.when(t == nt - 1)
        def _():
            cols = jax.lax.broadcasted_iota(jnp.int32, out_ref.shape, 1)
            out_ref[...] = jnp.where(cols == b, acc_ref[...], out_ref[...])


def _const_spec(arr):
    # Small 2-D constants (weights / biases): full-array block, resident.
    return pl.BlockSpec(arr.shape, lambda b, t: (0, 0))


def _x_spec(point_tile):
    # Raw NCL input, block (1, 3, T): batch element b, all channels, point tile t.
    return pl.BlockSpec((1, 3, point_tile), lambda b, t: (b, 0, t))


def _compiler_params():
    return pltpu.CompilerParams(
        dimension_semantics=("arbitrary", "arbitrary"),
        vmem_limit_bytes=VMEM_LIMIT_BYTES)


def _stats_pass(stage, operands, c_out, grid, point_tile):
    in_specs = [_x_spec(point_tile)] + [_const_spec(a) for a in operands[1:]]
    return pl.pallas_call(
        functools.partial(_encode_kernel, stage=stage),
        grid=grid,
        in_specs=in_specs,
        out_specs=(pl.BlockSpec((c_out, 1), lambda b, t: (0, 0)),
                   pl.BlockSpec((c_out, 1), lambda b, t: (0, 0))),
        out_shape=(jax.ShapeDtypeStruct((c_out, 1), jnp.float32),
                   jax.ShapeDtypeStruct((c_out, 1), jnp.float32)),
        compiler_params=_compiler_params(),
    )(*operands)


def _final_pass(operands, batch, grid, point_tile):
    in_specs = [_x_spec(point_tile)] + [_const_spec(a) for a in operands[1:]]
    return pl.pallas_call(
        functools.partial(_encode_kernel, stage=4),
        grid=grid,
        in_specs=in_specs,
        out_specs=pl.BlockSpec((128, batch), lambda b, t: (0, 0)),
        out_shape=jax.ShapeDtypeStruct((128, batch), jnp.float32),
        scratch_shapes=[pltpu.VMEM((128, 1), jnp.float32)],
        compiler_params=_compiler_params(),
    )(*operands)


def _fold_bn(s, sq, gamma, beta, count):
    """Fold batch stats + affine BN params into one per-channel scale/shift."""
    mean = s / count
    var = jnp.maximum(sq / count - mean * mean, 0.0)
    scale = gamma * jax.lax.rsqrt(var + BN_EPS)
    shift = beta - mean * scale
    return scale, shift


@jax.jit
def global_encode(x_ncl, params):
    """x_ncl: (B, 3, N) float32, same layout as the PyTorch module's input."""
    (w1t, b1, g1, be1,
     w2t, b2, g2, be2,
     w3t, b3, g3, be3,
     w4t, b4) = params

    B, cin, N = x_ncl.shape
    assert cin == 3
    T = _choose_point_tile(N)
    assert N % T == 0
    grid = (B, N // T)
    count = jnp.float32(B * N)

    # bf16 weights for the MXU layers whose *raw* output feeds BN statistics
    # (conv1 stays f32 on the VPU).
    w2b = w2t.astype(jnp.bfloat16)
    w3b = w3t.astype(jnp.bfloat16)
    w4b = w4t.astype(jnp.bfloat16)

    # Sweep 1: stats of conv1 output -> fold bn1 into conv1's weights.
    s1, q1 = _stats_pass(1, (x_ncl, w1t, b1), 64, grid, T)
    sc1, sh1 = _fold_bn(s1, q1, g1, be1, count)
    w1f = w1t * sc1                         # (64, 3) f32, row-scaled
    b1f = b1 * sc1 + sh1

    # Sweep 2: stats of conv2 output -> fold bn2 into conv2's weights.
    s2, q2 = _stats_pass(2, (x_ncl, w1f, b1f, w2b, b2), 64, grid, T)
    sc2, sh2 = _fold_bn(s2, q2, g2, be2, count)
    w2f = (w2t * sc2).astype(jnp.bfloat16)  # fold in f32, then cast for the MXU
    b2f = b2 * sc2 + sh2

    # Sweep 3: stats of conv3 output -> fold bn3 into conv3's weights.
    s3, q3 = _stats_pass(3, (x_ncl, w1f, b1f, w2f, b2f, w3b, b3), 128, grid, T)
    sc3, sh3 = _fold_bn(s3, q3, g3, be3, count)
    w3f = (w3t * sc3).astype(jnp.bfloat16)
    b3f = b3 * sc3 + sh3

    # Sweep 4: full forward + per-batch max pool.
    out_cm = _final_pass(
        (x_ncl, w1f, b1f, w2f, b2f, w3f, b3f, w4b, b4), B, grid, T)
    return out_cm.T                      # (B, 128)


def init_params(key):
    """Parameters matching the PyTorch module, stored in kernel layout:
    Conv1d(Cin, Cout, 1) weight as (Cout, Cin) (i.e. W^T), bias as (Cout, 1),
    BN gamma/beta as (C, 1).  PyTorch default inits are reproduced."""
    ks = jax.random.split(key, 8)

    def conv(kw, kb, cin, cout):
        bound = 1.0 / (cin ** 0.5)
        w = jax.random.uniform(kw, (cout, cin), jnp.float32, -bound, bound)
        b = jax.random.uniform(kb, (cout, 1), jnp.float32, -bound, bound)
        return w, b

    w1, b1 = conv(ks[0], ks[1], 3, 64)
    w2, b2 = conv(ks[2], ks[3], 64, 64)
    w3, b3 = conv(ks[4], ks[5], 64, 128)
    w4, b4 = conv(ks[6], ks[7], 128, 128)

    g1, be1 = jnp.ones((64, 1), jnp.float32), jnp.zeros((64, 1), jnp.float32)
    g2, be2 = jnp.ones((64, 1), jnp.float32), jnp.zeros((64, 1), jnp.float32)
    g3, be3 = jnp.ones((128, 1), jnp.float32), jnp.zeros((128, 1), jnp.float32)

    return (w1, b1, g1, be1, w2, b2, g2, be2, w3, b3, g3, be3, w4, b4)


def global_encode_ref(x_ncl, params):
    """Pure-JAX fp32 reference mirroring the PyTorch forward (training-mode BN)."""
    (w1t, b1, g1, be1, w2t, b2, g2, be2, w3t, b3, g3, be3, w4t, b4) = params
    B, _, N = x_ncl.shape
    x = jnp.transpose(x_ncl, (0, 2, 1)).reshape(B * N, 3)

    def block(h, wt, b, g, be):
        y = h @ wt.T + b[:, 0]
        m = jnp.mean(y, axis=0)
        v = jnp.mean((y - m) ** 2, axis=0)
        return jnp.maximum((y - m) / jnp.sqrt(v + BN_EPS) * g[:, 0] + be[:, 0], 0.0)

    h = block(x, w1t, b1, g1, be1)
    h = block(h, w2t, b2, g2, be2)
    h = block(h, w3t, b3, g3, be3)
    h = h @ w4t.T + b4[:, 0]
    return jnp.max(h.reshape(B, N, 128), axis=1)


if __name__ == "__main__":
    key = jax.random.PRNGKey(0)
    kx, kp = jax.random.split(key)

    B, C, N = 2, 3, 16  # small shapes consistent with Conv1d(3, ...) NCL input
    x = jax.random.normal(kx, (B, C, N), dtype=jnp.float32)
    params = init_params(kp)

    out = jax.block_until_ready(global_encode(x, params))
    ref = global_encode_ref(x, params)

    assert out.shape == (B, 128), out.shape
    err = float(jnp.max(jnp.abs(out - ref)))
    # bf16 MXU matmuls in the kernel => looser match vs. the fp32 reference.
    assert jnp.allclose(out, ref, atol=1e-1, rtol=1e-1), err
    print("KERNEL_OK")
</pallas_src>

<mosaic_0001>
module attributes {stable_mosaic.version = 11 : i64} {
  func.func @_encode_kernel(%arg0: i32, %arg1: i32, %arg2: memref<1x3x16xf32, #tpu.memory_space<vmem>>, %arg3: memref<64x3xf32, #tpu.memory_space<vmem>>, %arg4: memref<64x1xf32, #tpu.memory_space<vmem>>, %arg5: memref<64x1xf32, #tpu.memory_space<vmem>>, %arg6: memref<64x1xf32, #tpu.memory_space<vmem>>) attributes {dimension_semantics = [#tpu.dimension_semantics<arbitrary>, #tpu.dimension_semantics<arbitrary>], iteration_bounds = array<i64: 2, 1>, scalar_prefetch = 0 : i64, scratch_operands = 0 : i64, tpu.core_type = #tpu.core_type<tc>, window_params = [{transform_indices = @transform_0, window_bounds = array<i64: 1, 3, 16>}, {pipeline_mode = #tpu.pipeline_mode<synchronous>, transform_indices = @transform_1, window_bounds = array<i64: 64, 3>}, {pipeline_mode = #tpu.pipeline_mode<synchronous>, transform_indices = @transform_2, window_bounds = array<i64: 64, 1>}, {pipeline_mode = #tpu.pipeline_mode<synchronous>, transform_indices = @transform_3, window_bounds = array<i64: 64, 1>}, {pipeline_mode = #tpu.pipeline_mode<synchronous>, transform_indices = @transform_4, window_bounds = array<i64: 64, 1>}]} {
    %c0_i32 = arith.constant 0 : i32
    %0 = arith.cmpi eq, %arg0, %c0_i32 : i32
    %c0_i32_0 = arith.constant 0 : i32
    %1 = arith.cmpi eq, %arg1, %c0_i32_0 : i32
    %2 = arith.andi %0, %1 : i1
    %c0 = arith.constant 0 : index
    %c0_1 = arith.constant 0 : index
    %3 = vector.load %arg3[%c0, %c0_1] : memref<64x3xf32, #tpu.memory_space<vmem>>, vector<64x3xf32>
    %c0_2 = arith.constant 0 : index
    %c0_3 = arith.constant 0 : index
    %4 = vector.load %arg4[%c0_2, %c0_3] : memref<64x1xf32, #tpu.memory_space<vmem>>, vector<64x1xf32>
    %c0_4 = arith.constant 0 : index
    %c0_5 = arith.constant 0 : index
    %c0_6 = arith.constant 0 : index
    %5 = vector.load %arg2[%c0_4, %c0_5, %c0_6] : memref<1x3x16xf32, #tpu.memory_space<vmem>>, vector<1x3x16xf32>
    %6 = vector.shape_cast %5 : vector<1x3x16xf32> to vector<3x16xf32>
    %7 = vector.extract_strided_slice %3 {offsets = [0, 0], sizes = [64, 1], strides = [1, 1]} : vector<64x3xf32> to vector<64x1xf32>
    %8 = vector.extract_strided_slice %6 {offsets = [0, 0], sizes = [1, 16], strides = [1, 1]} : vector<3x16xf32> to vector<1x16xf32>
    %9 = vector.broadcast %7 : vector<64x1xf32> to vector<64x16xf32>
    %10 = vector.broadcast %8 : vector<1x16xf32> to vector<64x16xf32>
    %11 = arith.mulf %9, %10 : vector<64x16xf32>
    %12 = vector.extract_strided_slice %3 {offsets = [0, 1], sizes = [64, 1], strides = [1, 1]} : vector<64x3xf32> to vector<64x1xf32>
    %13 = vector.extract_strided_slice %6 {offsets = [1, 0], sizes = [1, 16], strides = [1, 1]} : vector<3x16xf32> to vector<1x16xf32>
    %14 = vector.broadcast %12 : vector<64x1xf32> to vector<64x16xf32>
    %15 = vector.broadcast %13 : vector<1x16xf32> to vector<64x16xf32>
    %16 = arith.mulf %14, %15 : vector<64x16xf32>
    %17 = arith.addf %11, %16 : vector<64x16xf32>
    %18 = vector.extract_strided_slice %3 {offsets = [0, 2], sizes = [64, 1], strides = [1, 1]} : vector<64x3xf32> to vector<64x1xf32>
    %19 = vector.extract_strided_slice %6 {offsets = [2, 0], sizes = [1, 16], strides = [1, 1]} : vector<3x16xf32> to vector<1x16xf32>
    %20 = vector.broadcast %18 : vector<64x1xf32> to vector<64x16xf32>
    %21 = vector.broadcast %19 : vector<1x16xf32> to vector<64x16xf32>
    %22 = arith.mulf %20, %21 : vector<64x16xf32>
    %23 = arith.addf %17, %22 : vector<64x16xf32>
    %24 = vector.broadcast %4 : vector<64x1xf32> to vector<64x16xf32>
    %25 = arith.addf %23, %24 : vector<64x16xf32>
    %26 = arith.extui %2 : i1 to i32
    %c0_i32_7 = arith.constant 0 : i32
    %27 = arith.cmpi ne, %26, %c0_i32_7 : i32
    scf.if %27 {
      %cst_17 = arith.constant 0.000000e+00 : f32
      %39 = vector.broadcast %cst_17 : f32 to vector<64x1xf32>
      %c0_18 = arith.constant 0 : index
      %c0_19 = arith.constant 0 : index
      %40 = vector.load %arg5[%c0_18, %c0_19] : memref<64x1xf32, #tpu.memory_space<vmem>>, vector<64x1xf32>
      tpu.vector_store %arg5[%c0_18, %c0_19], %39 {strides = array<i32>} : memref<64x1xf32, #tpu.memory_space<vmem>>, vector<64x1xf32>,
      %cst_20 = arith.constant 0.000000e+00 : f32
      %41 = vector.broadcast %cst_20 : f32 to vector<64x1xf32>
      %c0_21 = arith.constant 0 : index
      %c0_22 = arith.constant 0 : index
      %42 = vector.load %arg6[%c0_21, %c0_22] : memref<64x1xf32, #tpu.memory_space<vmem>>, vector<64x1xf32>
      tpu.vector_store %arg6[%c0_21, %c0_22], %41 {strides = array<i32>} : memref<64x1xf32, #tpu.memory_space<vmem>>, vector<64x1xf32>,
    } else {
    }
    %c0_8 = arith.constant 0 : index
    %c0_9 = arith.constant 0 : index
    %28 = vector.load %arg5[%c0_8, %c0_9] : memref<64x1xf32, #tpu.memory_space<vmem>>, vector<64x1xf32>
    %cst = arith.constant dense<0.000000e+00> : vector<64xf32>
    %29 = vector.multi_reduction <add>, %25, %cst [1] : vector<64x16xf32> to vector<64xf32>
    %30 = vector.shape_cast %29 : vector<64xf32> to vector<64x1xf32>
    %31 = arith.addf %28, %30 : vector<64x1xf32>
    %c0_10 = arith.constant 0 : index
    %c0_11 = arith.constant 0 : index
    %32 = vector.load %arg5[%c0_10, %c0_11] : memref<64x1xf32, #tpu.memory_space<vmem>>, vector<64x1xf32>
    tpu.vector_store %arg5[%c0_10, %c0_11], %31 {strides = array<i32>} : memref<64x1xf32, #tpu.memory_space<vmem>>, vector<64x1xf32>,
    %c0_12 = arith.constant 0 : index
    %c0_13 = arith.constant 0 : index
    %33 = vector.load %arg6[%c0_12, %c0_13] : memref<64x1xf32, #tpu.memory_space<vmem>>, vector<64x1xf32>
    %34 = arith.mulf %25, %25 : vector<64x16xf32>
    %cst_14 = arith.constant dense<0.000000e+00> : vector<64xf32>
    %35 = vector.multi_reduction <add>, %34, %cst_14 [1] : vector<64x16xf32> to vector<64xf32>
    %36 = vector.shape_cast %35 : vector<64xf32> to vector<64x1xf32>
    %37 = arith.addf %33, %36 : vector<64x1xf32>
    %c0_15 = arith.constant 0 : index
    %c0_16 = arith.constant 0 : index
    %38 = vector.load %arg6[%c0_15, %c0_16] : memref<64x1xf32, #tpu.memory_space<vmem>>, vector<64x1xf32>
    tpu.vector_store %arg6[%c0_15, %c0_16], %37 {strides = array<i32>} : memref<64x1xf32, #tpu.memory_space<vmem>>, vector<64x1xf32>,
    return
  }
  func.func @transform_0(%arg0: i32, %arg1: i32) -> (i32, i32, i32) {
    %c0_i32 = arith.constant 0 : i32
    %c0_i32_0 = arith.constant 0 : i32
    return %arg0, %c0_i32, %arg1 : i32, i32, i32
  }
  func.func @transform_1(%arg0: i32, %arg1: i32) -> (i32, i32) {
    %c0_i32 = arith.constant 0 : i32
    %c0_i32_0 = arith.constant 0 : i32
    %c0_i32_1 = arith.constant 0 : i32
    return %c0_i32, %c0_i32_0 : i32, i32
  }
  func.func @transform_2(%arg0: i32, %arg1: i32) -> (i32, i32) {
    %c0_i32 = arith.constant 0 : i32
    %c0_i32_0 = arith.constant 0 : i32
    %c0_i32_1 = arith.constant 0 : i32
    return %c0_i32, %c0_i32_0 : i32, i32
  }
  func.func @transform_3(%arg0: i32, %arg1: i32) -> (i32, i32) {
    %c0_i32 = arith.constant 0 : i32
    %c0_i32_0 = arith.constant 0 : i32
    %c0_i32_1 = arith.constant 0 : i32
    return %c0_i32, %c0_i32_0 : i32, i32
  }
  func.func @transform_4(%arg0: i32, %arg1: i32) -> (i32, i32) {
    %c0_i32 = arith.constant 0 : i32
    %c0_i32_0 = arith.constant 0 : i32
    %c0_i32_1 = arith.constant 0 : i32
    return %c0_i32, %c0_i32_0 : i32, i32
  }
}

module attributes {stable_mosaic.version = 11 : i64} {
  func.func @_encode_kernel(%arg0: i32, %arg1: i32, %arg2: memref<1x3x16xf32, #tpu.memory_space<vmem>>, %arg3: memref<64x3xf32, #tpu.memory_space<vmem>>, %arg4: memref<64x1xf32, #tpu.memory_space<vmem>>, %arg5: memref<64x64xbf16, #tpu.memory_space<vmem>>, %arg6: memref<64x1xf32, #tpu.memory_space<vmem>>, %arg7: memref<64x1xf32, #tpu.memory_space<vmem>>, %arg8: memref<64x1xf32, #tpu.memory_space<vmem>>) attributes {dimension_semantics = [#tpu.dimension_semantics<arbitrary>, #tpu.dimension_semantics<arbitrary>], iteration_bounds = array<i64: 2, 1>, scalar_prefetch = 0 : i64, scratch_operands = 0 : i64, tpu.core_type = #tpu.core_type<tc>, window_params = [{transform_indices = @transform_0, window_bounds = array<i64: 1, 3, 16>}, {pipeline_mode = #tpu.pipeline_mode<synchronous>, transform_indices = @transform_1, window_bounds = array<i64: 64, 3>}, {pipeline_mode = #tpu.pipeline_mode<synchronous>, transform_indices = @transform_2, window_bounds = array<i64: 64, 1>}, {pipeline_mode = #tpu.pipeline_mode<synchronous>, transform_indices = @transform_3, window_bounds = array<i64: 64, 64>}, {pipeline_mode = #tpu.pipeline_mode<synchronous>, transform_indices = @transform_4, window_bounds = array<i64: 64, 1>}, {pipeline_mode = #tpu.pipeline_mode<synchronous>, transform_indices = @transform_5, window_bounds = array<i64: 64, 1>}, {pipeline_mode = #tpu.pipeline_mode<synchronous>, transform_indices = @transform_6, window_bounds = array<i64: 64, 1>}]} {
    %c0_i32 = arith.constant 0 : i32
    %0 = arith.cmpi eq, %arg0, %c0_i32 : i32
    %c0_i32_0 = arith.constant 0 : i32
    %1 = arith.cmpi eq, %arg1, %c0_i32_0 : i32
    %2 = arith.andi %0, %1 : i1
    %c0 = arith.constant 0 : index
    %c0_1 = arith.constant 0 : index
    %3 = vector.load %arg3[%c0, %c0_1] : memref<64x3xf32, #tpu.memory_space<vmem>>, vector<64x3xf32>
    %c0_2 = arith.constant 0 : index
    %c0_3 = arith.constant 0 : index
    %4 = vector.load %arg4[%c0_2, %c0_3] : memref<64x1xf32, #tpu.memory_space<vmem>>, vector<64x1xf32>
    %c0_4 = arith.constant 0 : index
    %c0_5 = arith.constant 0 : index
    %c0_6 = arith.constant 0 : index
    %5 = vector.load %arg2[%c0_4, %c0_5, %c0_6] : memref<1x3x16xf32, #tpu.memory_space<vmem>>, vector<1x3x16xf32>
    %6 = vector.shape_cast %5 : vector<1x3x16xf32> to vector<3x16xf32>
    %7 = vector.extract_strided_slice %3 {offsets = [0, 0], sizes = [64, 1], strides = [1, 1]} : vector<64x3xf32> to vector<64x1xf32>
    %8 = vector.extract_strided_slice %6 {offsets = [0, 0], sizes = [1, 16], strides = [1, 1]} : vector<3x16xf32> to vector<1x16xf32>
    %9 = vector.broadcast %7 : vector<64x1xf32> to vector<64x16xf32>
    %10 = vector.broadcast %8 : vector<1x16xf32> to vector<64x16xf32>
    %11 = arith.mulf %9, %10 : vector<64x16xf32>
    %12 = vector.extract_strided_slice %3 {offsets = [0, 1], sizes = [64, 1], strides = [1, 1]} : vector<64x3xf32> to vector<64x1xf32>
    %13 = vector.extract_strided_slice %6 {offsets = [1, 0], sizes = [1, 16], strides = [1, 1]} : vector<3x16xf32> to vector<1x16xf32>
    %14 = vector.broadcast %12 : vector<64x1xf32> to vector<64x16xf32>
    %15 = vector.broadcast %13 : vector<1x16xf32> to vector<64x16xf32>
    %16 = arith.mulf %14, %15 : vector<64x16xf32>
    %17 = arith.addf %11, %16 : vector<64x16xf32>
    %18 = vector.extract_strided_slice %3 {offsets = [0, 2], sizes = [64, 1], strides = [1, 1]} : vector<64x3xf32> to vector<64x1xf32>
    %19 = vector.extract_strided_slice %6 {offsets = [2, 0], sizes = [1, 16], strides = [1, 1]} : vector<3x16xf32> to vector<1x16xf32>
    %20 = vector.broadcast %18 : vector<64x1xf32> to vector<64x16xf32>
    %21 = vector.broadcast %19 : vector<1x16xf32> to vector<64x16xf32>
    %22 = arith.mulf %20, %21 : vector<64x16xf32>
    %23 = arith.addf %17, %22 : vector<64x16xf32>
    %24 = vector.broadcast %4 : vector<64x1xf32> to vector<64x16xf32>
    %25 = arith.addf %23, %24 : vector<64x16xf32>
    %c0_7 = arith.constant 0 : index
    %c0_8 = arith.constant 0 : index
    %26 = vector.load %arg5[%c0_7, %c0_8] : memref<64x64xbf16, #tpu.memory_space<vmem>>, vector<64x64xbf16>
    %c0_9 = arith.constant 0 : index
    %c0_10 = arith.constant 0 : index
    %27 = vector.load %arg6[%c0_9, %c0_10] : memref<64x1xf32, #tpu.memory_space<vmem>>, vector<64x1xf32>
    %cst = arith.constant 0.000000e+00 : f32
    %28 = vector.broadcast %cst : f32 to vector<64x16xf32>
    %29 = arith.maximumf %25, %28 : vector<64x16xf32>
    %30 = arith.truncf %29 : vector<64x16xf32> to vector<64x16xbf16>
    %cst_11 = arith.constant dense<0.000000e+00> : vector<64x16xf32>
    %31 = tpu.matmul %26, %30, %cst_11 {dimension_numbers = #tpu.dot_dimension_numbers<[1], [0], [0], [1], [0, 0, 1, 1], [], []>} : vector<64x64xbf16>, vector<64x16xbf16>, vector<64x16xf32> -> vector<64x16xf32>
    %32 = vector.broadcast %27 : vector<64x1xf32> to vector<64x16xf32>
    %33 = arith.addf %31, %32 : vector<64x16xf32>
    %34 = arith.extui %2 : i1 to i32
    %c0_i32_12 = arith.constant 0 : i32
    %35 = arith.cmpi ne, %34, %c0_i32_12 : i32
    scf.if %35 {
      %cst_23 = arith.constant 0.000000e+00 : f32
      %47 = vector.broadcast %cst_23 : f32 to vector<64x1xf32>
      %c0_24 = arith.constant 0 : index
      %c0_25 = arith.constant 0 : index
      %48 = vector.load %arg7[%c0_24, %c0_25] : memref<64x1xf32, #tpu.memory_space<vmem>>, vector<64x1xf32>
      tpu.vector_store %arg7[%c0_24, %c0_25], %47 {strides = array<i32>} : memref<64x1xf32, #tpu.memory_space<vmem>>, vector<64x1xf32>,
      %cst_26 = arith.constant 0.000000e+00 : f32
      %49 = vector.broadcast %cst_26 : f32 to vector<64x1xf32>
      %c0_27 = arith.constant 0 : index
      %c0_28 = arith.constant 0 : index
      %50 = vector.load %arg8[%c0_27, %c0_28] : memref<64x1xf32, #tpu.memory_space<vmem>>, vector<64x1xf32>
      tpu.vector_store %arg8[%c0_27, %c0_28], %49 {strides = array<i32>} : memref<64x1xf32, #tpu.memory_space<vmem>>, vector<64x1xf32>,
    } else {
    }
    %c0_13 = arith.constant 0 : index
    %c0_14 = arith.constant 0 : index
    %36 = vector.load %arg7[%c0_13, %c0_14] : memref<64x1xf32, #tpu.memory_space<vmem>>, vector<64x1xf32>
    %cst_15 = arith.constant dense<0.000000e+00> : vector<64xf32>
    %37 = vector.multi_reduction <add>, %33, %cst_15 [1] : vector<64x16xf32> to vector<64xf32>
    %38 = vector.shape_cast %37 : vector<64xf32> to vector<64x1xf32>
    %39 = arith.addf %36, %38 : vector<64x1xf32>
    %c0_16 = arith.constant 0 : index
    %c0_17 = arith.constant 0 : index
    %40 = vector.load %arg7[%c0_16, %c0_17] : memref<64x1xf32, #tpu.memory_space<vmem>>, vector<64x1xf32>
    tpu.vector_store %arg7[%c0_16, %c0_17], %39 {strides = array<i32>} : memref<64x1xf32, #tpu.memory_space<vmem>>, vector<64x1xf32>,
    %c0_18 = arith.constant 0 : index
    %c0_19 = arith.constant 0 : index
    %41 = vector.load %arg8[%c0_18, %c0_19] : memref<64x1xf32, #tpu.memory_space<vmem>>, vector<64x1xf32>
    %42 = arith.mulf %33, %33 : vector<64x16xf32>
    %cst_20 = arith.constant dense<0.000000e+00> : vector<64xf32>
    %43 = vector.multi_reduction <add>, %42, %cst_20 [1] : vector<64x16xf32> to vector<64xf32>
    %44 = vector.shape_cast %43 : vector<64xf32> to vector<64x1xf32>
    %45 = arith.addf %41, %44 : vector<64x1xf32>
    %c0_21 = arith.constant 0 : index
    %c0_22 = arith.constant 0 : index
    %46 = vector.load %arg8[%c0_21, %c0_22] : memref<64x1xf32, #tpu.memory_space<vmem>>, vector<64x1xf32>
    tpu.vector_store %arg8[%c0_21, %c0_22], %45 {strides = array<i32>} : memref<64x1xf32, #tpu.memory_space<vmem>>, vector<64x1xf32>,
    return
  }
  func.func @transform_0(%arg0: i32, %arg1: i32) -> (i32, i32, i32) {
    %c0_i32 = arith.constant 0 : i32
    %c0_i32_0 = arith.constant 0 : i32
    return %arg0, %c0_i32, %arg1 : i32, i32, i32
  }
  func.func @transform_1(%arg0: i32, %arg1: i32) -> (i32, i32) {
    %c0_i32 = arith.constant 0 : i32
    %c0_i32_0 = arith.constant 0 : i32
    %c0_i32_1 = arith.constant 0 : i32
    return %c0_i32, %c0_i32_0 : i32, i32
  }
  func.func @transform_2(%arg0: i32, %arg1: i32) -> (i32, i32) {
    %c0_i32 = arith.constant 0 : i32
    %c0_i32_0 = arith.constant 0 : i32
    %c0_i32_1 = arith.constant 0 : i32
    return %c0_i32, %c0_i32_0 : i32, i32
  }
  func.func @transform_3(%arg0: i32, %arg1: i32) -> (i32, i32) {
    %c0_i32 = arith.constant 0 : i32
    %c0_i32_0 = arith.constant 0 : i32
    %c0_i32_1 = arith.constant 0 : i32
    return %c0_i32, %c0_i32_0 : i32, i32
  }
  func.func @transform_4(%arg0: i32, %arg1: i32) -> (i32, i32) {
    %c0_i32 = arith.constant 0 : i32
    %c0_i32_0 = arith.constant 0 : i32
    %c0_i32_1 = arith.constant 0 : i32
    return %c0_i32, %c0_i32_0 : i32, i32
  }
  func.func @transform_5(%arg0: i32, %arg1: i32) -> (i32, i32) {
    %c0_i32 = arith.constant 0 : i32
    %c0_i32_0 = arith.constant 0 : i32
    %c0_i32_1 = arith.constant 0 : i32
    return %c0_i32, %c0_i32_0 : i32, i32
  }
  func.func @transform_6(%arg0: i32, %arg1: i32) -> (i32, i32) {
    %c0_i32 = arith.constant 0 : i32
    %c0_i32_0 = arith.constant 0 : i32
    %c0_i32_1 = arith.constant 0 : i32
    return %c0_i32, %c0_i32_0 : i32, i32
  }
}

module attributes {stable_mosaic.version = 11 : i64} {
  func.func @_encode_kernel(%arg0: i32, %arg1: i32, %arg2: memref<1x3x16xf32, #tpu.memory_space<vmem>>, %arg3: memref<64x3xf32, #tpu.memory_space<vmem>>, %arg4: memref<64x1xf32, #tpu.memory_space<vmem>>, %arg5: memref<64x64xbf16, #tpu.memory_space<vmem>>, %arg6: memref<64x1xf32, #tpu.memory_space<vmem>>, %arg7: memref<128x64xbf16, #tpu.memory_space<vmem>>, %arg8: memref<128x1xf32, #tpu.memory_space<vmem>>, %arg9: memref<128x1xf32, #tpu.memory_space<vmem>>, %arg10: memref<128x1xf32, #tpu.memory_space<vmem>>) attributes {dimension_semantics = [#tpu.dimension_semantics<arbitrary>, #tpu.dimension_semantics<arbitrary>], iteration_bounds = array<i64: 2, 1>, scalar_prefetch = 0 : i64, scratch_operands = 0 : i64, tpu.core_type = #tpu.core_type<tc>, window_params = [{transform_indices = @transform_0, window_bounds = array<i64: 1, 3, 16>}, {pipeline_mode = #tpu.pipeline_mode<synchronous>, transform_indices = @transform_1, window_bounds = array<i64: 64, 3>}, {pipeline_mode = #tpu.pipeline_mode<synchronous>, transform_indices = @transform_2, window_bounds = array<i64: 64, 1>}, {pipeline_mode = #tpu.pipeline_mode<synchronous>, transform_indices = @transform_3, window_bounds = array<i64: 64, 64>}, {pipeline_mode = #tpu.pipeline_mode<synchronous>, transform_indices = @transform_4, window_bounds = array<i64: 64, 1>}, {pipeline_mode = #tpu.pipeline_mode<synchronous>, transform_indices = @transform_5, window_bounds = array<i64: 128, 64>}, {pipeline_mode = #tpu.pipeline_mode<synchronous>, transform_indices = @transform_6, window_bounds = array<i64: 128, 1>}, {pipeline_mode = #tpu.pipeline_mode<synchronous>, transform_indices = @transform_7, window_bounds = array<i64: 128, 1>}, {pipeline_mode = #tpu.pipeline_mode<synchronous>, transform_indices = @transform_8, window_bounds = array<i64: 128, 1>}]} {
    %c0_i32 = arith.constant 0 : i32
    %0 = arith.cmpi eq, %arg0, %c0_i32 : i32
    %c0_i32_0 = arith.constant 0 : i32
    %1 = arith.cmpi eq, %arg1, %c0_i32_0 : i32
    %2 = arith.andi %0, %1 : i1
    %c0 = arith.constant 0 : index
    %c0_1 = arith.constant 0 : index
    %3 = vector.load %arg3[%c0, %c0_1] : memref<64x3xf32, #tpu.memory_space<vmem>>, vector<64x3xf32>
    %c0_2 = arith.constant 0 : index
    %c0_3 = arith.constant 0 : index
    %4 = vector.load %arg4[%c0_2, %c0_3] : memref<64x1xf32, #tpu.memory_space<vmem>>, vector<64x1xf32>
    %c0_4 = arith.constant 0 : index
    %c0_5 = arith.constant 0 : index
    %c0_6 = arith.constant 0 : index
    %5 = vector.load %arg2[%c0_4, %c0_5, %c0_6] : memref<1x3x16xf32, #tpu.memory_space<vmem>>, vector<1x3x16xf32>
    %6 = vector.shape_cast %5 : vector<1x3x16xf32> to vector<3x16xf32>
    %7 = vector.extract_strided_slice %3 {offsets = [0, 0], sizes = [64, 1], strides = [1, 1]} : vector<64x3xf32> to vector<64x1xf32>
    %8 = vector.extract_strided_slice %6 {offsets = [0, 0], sizes = [1, 16], strides = [1, 1]} : vector<3x16xf32> to vector<1x16xf32>
    %9 = vector.broadcast %7 : vector<64x1xf32> to vector<64x16xf32>
    %10 = vector.broadcast %8 : vector<1x16xf32> to vector<64x16xf32>
    %11 = arith.mulf %9, %10 : vector<64x16xf32>
    %12 = vector.extract_strided_slice %3 {offsets = [0, 1], sizes = [64, 1], strides = [1, 1]} : vector<64x3xf32> to vector<64x1xf32>
    %13 = vector.extract_strided_slice %6 {offsets = [1, 0], sizes = [1, 16], strides = [1, 1]} : vector<3x16xf32> to vector<1x16xf32>
    %14 = vector.broadcast %12 : vector<64x1xf32> to vector<64x16xf32>
    %15 = vector.broadcast %13 : vector<1x16xf32> to vector<64x16xf32>
    %16 = arith.mulf %14, %15 : vector<64x16xf32>
    %17 = arith.addf %11, %16 : vector<64x16xf32>
    %18 = vector.extract_strided_slice %3 {offsets = [0, 2], sizes = [64, 1], strides = [1, 1]} : vector<64x3xf32> to vector<64x1xf32>
    %19 = vector.extract_strided_slice %6 {offsets = [2, 0], sizes = [1, 16], strides = [1, 1]} : vector<3x16xf32> to vector<1x16xf32>
    %20 = vector.broadcast %18 : vector<64x1xf32> to vector<64x16xf32>
    %21 = vector.broadcast %19 : vector<1x16xf32> to vector<64x16xf32>
    %22 = arith.mulf %20, %21 : vector<64x16xf32>
    %23 = arith.addf %17, %22 : vector<64x16xf32>
    %24 = vector.broadcast %4 : vector<64x1xf32> to vector<64x16xf32>
    %25 = arith.addf %23, %24 : vector<64x16xf32>
    %c0_7 = arith.constant 0 : index
    %c0_8 = arith.constant 0 : index
    %26 = vector.load %arg5[%c0_7, %c0_8] : memref<64x64xbf16, #tpu.memory_space<vmem>>, vector<64x64xbf16>
    %c0_9 = arith.constant 0 : index
    %c0_10 = arith.constant 0 : index
    %27 = vector.load %arg6[%c0_9, %c0_10] : memref<64x1xf32, #tpu.memory_space<vmem>>, vector<64x1xf32>
    %cst = arith.constant 0.000000e+00 : f32
    %28 = vector.broadcast %cst : f32 to vector<64x16xf32>
    %29 = arith.maximumf %25, %28 : vector<64x16xf32>
    %30 = arith.truncf %29 : vector<64x16xf32> to vector<64x16xbf16>
    %cst_11 = arith.constant dense<0.000000e+00> : vector<64x16xf32>
    %31 = tpu.matmul %26, %30, %cst_11 {dimension_numbers = #tpu.dot_dimension_numbers<[1], [0], [0], [1], [0, 0, 1, 1], [], []>} : vector<64x64xbf16>, vector<64x16xbf16>, vector<64x16xf32> -> vector<64x16xf32>
    %32 = vector.broadcast %27 : vector<64x1xf32> to vector<64x16xf32>
    %33 = arith.addf %31, %32 : vector<64x16xf32>
    %c0_12 = arith.constant 0 : index
    %c0_13 = arith.constant 0 : index
    %34 = vector.load %arg7[%c0_12, %c0_13] : memref<128x64xbf16, #tpu.memory_space<vmem>>, vector<128x64xbf16>
    %c0_14 = arith.constant 0 : index
    %c0_15 = arith.constant 0 : index
    %35 = vector.load %arg8[%c0_14, %c0_15] : memref<128x1xf32, #tpu.memory_space<vmem>>, vector<128x1xf32>
    %cst_16 = arith.constant 0.000000e+00 : f32
    %36 = vector.broadcast %cst_16 : f32 to vector<64x16xf32>
    %37 = arith.maximumf %33, %36 : vector<64x16xf32>
    %38 = arith.truncf %37 : vector<64x16xf32> to vector<64x16xbf16>
    %cst_17 = arith.constant dense<0.000000e+00> : vector<128x16xf32>
    %39 = tpu.matmul %34, %38, %cst_17 {dimension_numbers = #tpu.dot_dimension_numbers<[1], [0], [0], [1], [0, 0, 1, 1], [], []>} : vector<128x64xbf16>, vector<64x16xbf16>, vector<128x16xf32> -> vector<128x16xf32>
    %40 = vector.broadcast %35 : vector<128x1xf32> to vector<128x16xf32>
    %41 = arith.addf %39, %40 : vector<128x16xf32>
    %42 = arith.extui %2 : i1 to i32
    %c0_i32_18 = arith.constant 0 : i32
    %43 = arith.cmpi ne, %42, %c0_i32_18 : i32
    scf.if %43 {
      %cst_29 = arith.constant 0.000000e+00 : f32
      %55 = vector.broadcast %cst_29 : f32 to vector<128x1xf32>
      %c0_30 = arith.constant 0 : index
      %c0_31 = arith.constant 0 : index
      %56 = vector.load %arg9[%c0_30, %c0_31] : memref<128x1xf32, #tpu.memory_space<vmem>>, vector<128x1xf32>
      tpu.vector_store %arg9[%c0_30, %c0_31], %55 {strides = array<i32>} : memref<128x1xf32, #tpu.memory_space<vmem>>, vector<128x1xf32>,
      %cst_32 = arith.constant 0.000000e+00 : f32
      %57 = vector.broadcast %cst_32 : f32 to vector<128x1xf32>
      %c0_33 = arith.constant 0 : index
      %c0_34 = arith.constant 0 : index
      %58 = vector.load %arg10[%c0_33, %c0_34] : memref<128x1xf32, #tpu.memory_space<vmem>>, vector<128x1xf32>
      tpu.vector_store %arg10[%c0_33, %c0_34], %57 {strides = array<i32>} : memref<128x1xf32, #tpu.memory_space<vmem>>, vector<128x1xf32>,
    } else {
    }
    %c0_19 = arith.constant 0 : index
    %c0_20 = arith.constant 0 : index
    %44 = vector.load %arg9[%c0_19, %c0_20] : memref<128x1xf32, #tpu.memory_space<vmem>>, vector<128x1xf32>
    %cst_21 = arith.constant dense<0.000000e+00> : vector<128xf32>
    %45 = vector.multi_reduction <add>, %41, %cst_21 [1] : vector<128x16xf32> to vector<128xf32>
    %46 = vector.shape_cast %45 : vector<128xf32> to vector<128x1xf32>
    %47 = arith.addf %44, %46 : vector<128x1xf32>
    %c0_22 = arith.constant 0 : index
    %c0_23 = arith.constant 0 : index
    %48 = vector.load %arg9[%c0_22, %c0_23] : memref<128x1xf32, #tpu.memory_space<vmem>>, vector<128x1xf32>
    tpu.vector_store %arg9[%c0_22, %c0_23], %47 {strides = array<i32>} : memref<128x1xf32, #tpu.memory_space<vmem>>, vector<128x1xf32>,
    %c0_24 = arith.constant 0 : index
    %c0_25 = arith.constant 0 : index
    %49 = vector.load %arg10[%c0_24, %c0_25] : memref<128x1xf32, #tpu.memory_space<vmem>>, vector<128x1xf32>
    %50 = arith.mulf %41, %41 : vector<128x16xf32>
    %cst_26 = arith.constant dense<0.000000e+00> : vector<128xf32>
    %51 = vector.multi_reduction <add>, %50, %cst_26 [1] : vector<128x16xf32> to vector<128xf32>
    %52 = vector.shape_cast %51 : vector<128xf32> to vector<128x1xf32>
    %53 = arith.addf %49, %52 : vector<128x1xf32>
    %c0_27 = arith.constant 0 : index
    %c0_28 = arith.constant 0 : index
    %54 = vector.load %arg10[%c0_27, %c0_28] : memref<128x1xf32, #tpu.memory_space<vmem>>, vector<128x1xf32>
    tpu.vector_store %arg10[%c0_27, %c0_28], %53 {strides = array<i32>} : memref<128x1xf32, #tpu.memory_space<vmem>>, vector<128x1xf32>,
    return
  }
  func.func @transform_0(%arg0: i32, %arg1: i32) -> (i32, i32, i32) {
    %c0_i32 = arith.constant 0 : i32
    %c0_i32_0 = arith.constant 0 : i32
    return %arg0, %c0_i32, %arg1 : i32, i32, i32
  }
  func.func @transform_1(%arg0: i32, %arg1: i32) -> (i32, i32) {
    %c0_i32 = arith.constant 0 : i32
    %c0_i32_0 = arith.constant 0 : i32
    %c0_i32_1 = arith.constant 0 : i32
    return %c0_i32, %c0_i32_0 : i32, i32
  }
  func.func @transform_2(%arg0: i32, %arg1: i32) -> (i32, i32) {
    %c0_i32 = arith.constant 0 : i32
    %c0_i32_0 = arith.constant 0 : i32
    %c0_i32_1 = arith.constant 0 : i32
    return %c0_i32, %c0_i32_0 : i32, i32
  }
  func.func @transform_3(%arg0: i32, %arg1: i32) -> (i32, i32) {
    %c0_i32 = arith.constant 0 : i32
    %c0_i32_0 = arith.constant 0 : i32
    %c0_i32_1 = arith.constant 0 : i32
    return %c0_i32, %c0_i32_0 : i32, i32
  }
  func.func @transform_4(%arg0: i32, %arg1: i32) -> (i32, i32) {
    %c0_i32 = arith.constant 0 : i32
    %c0_i32_0 = arith.constant 0 : i32
    %c0_i32_1 = arith.constant 0 : i32
    return %c0_i32, %c0_i32_0 : i32, i32
  }
  func.func @transform_5(%arg0: i32, %arg1: i32) -> (i32, i32) {
    %c0_i32 = arith.constant 0 : i32
    %c0_i32_0 = arith.constant 0 : i32
    %c0_i32_1 = arith.constant 0 : i32
    return %c0_i32, %c0_i32_0 : i32, i32
  }
  func.func @transform_6(%arg0: i32, %arg1: i32) -> (i32, i32) {
    %c0_i32 = arith.constant 0 : i32
    %c0_i32_0 = arith.constant 0 : i32
    %c0_i32_1 = arith.constant 0 : i32
    return %c0_i32, %c0_i32_0 : i32, i32
  }
  func.func @transform_7(%arg0: i32, %arg1: i32) -> (i32, i32) {
    %c0_i32 = arith.constant 0 : i32
    %c0_i32_0 = arith.constant 0 : i32
    %c0_i32_1 = arith.constant 0 : i32
    return %c0_i32, %c0_i32_0 : i32, i32
  }
  func.func @transform_8(%arg0: i32, %arg1: i32) -> (i32, i32) {
    %c0_i32 = arith.constant 0 : i32
    %c0_i32_0 = arith.constant 0 : i32
    %c0_i32_1 = arith.constant 0 : i32
    return %c0_i32, %c0_i32_0 : i32, i32
  }
}

module attributes {stable_mosaic.version = 11 : i64} {
  func.func @_encode_kernel(%arg0: i32, %arg1: i32, %arg2: memref<1x3x16xf32, #tpu.memory_space<vmem>>, %arg3: memref<64x3xf32, #tpu.memory_space<vmem>>, %arg4: memref<64x1xf32, #tpu.memory_space<vmem>>, %arg5: memref<64x64xbf16, #tpu.memory_space<vmem>>, %arg6: memref<64x1xf32, #tpu.memory_space<vmem>>, %arg7: memref<128x64xbf16, #tpu.memory_space<vmem>>, %arg8: memref<128x1xf32, #tpu.memory_space<vmem>>, %arg9: memref<128x128xbf16, #tpu.memory_space<vmem>>, %arg10: memref<128x1xf32, #tpu.memory_space<vmem>>, %arg11: memref<128x2xf32, #tpu.memory_space<vmem>>, %arg12: memref<128x1xf32, #tpu.memory_space<vmem>>) attributes {dimension_semantics = [#tpu.dimension_semantics<arbitrary>, #tpu.dimension_semantics<arbitrary>], iteration_bounds = array<i64: 2, 1>, scalar_prefetch = 0 : i64, scratch_operands = 1 : i64, tpu.core_type = #tpu.core_type<tc>, window_params = [{transform_indices = @transform_0, window_bounds = array<i64: 1, 3, 16>}, {pipeline_mode = #tpu.pipeline_mode<synchronous>, transform_indices = @transform_1, window_bounds = array<i64: 64, 3>}, {pipeline_mode = #tpu.pipeline_mode<synchronous>, transform_indices = @transform_2, window_bounds = array<i64: 64, 1>}, {pipeline_mode = #tpu.pipeline_mode<synchronous>, transform_indices = @transform_3, window_bounds = array<i64: 64, 64>}, {pipeline_mode = #tpu.pipeline_mode<synchronous>, transform_indices = @transform_4, window_bounds = array<i64: 64, 1>}, {pipeline_mode = #tpu.pipeline_mode<synchronous>, transform_indices = @transform_5, window_bounds = array<i64: 128, 64>}, {pipeline_mode = #tpu.pipeline_mode<synchronous>, transform_indices = @transform_6, window_bounds = array<i64: 128, 1>}, {pipeline_mode = #tpu.pipeline_mode<synchronous>, transform_indices = @transform_7, window_bounds = array<i64: 128, 128>}, {pipeline_mode = #tpu.pipeline_mode<synchronous>, transform_indices = @transform_8, window_bounds = array<i64: 128, 1>}, {pipeline_mode = #tpu.pipeline_mode<synchronous>, transform_indices = @transform_9, window_bounds = array<i64: 128, 2>}]} {
    %c0_i32 = arith.constant 0 : i32
    %0 = arith.cmpi eq, %arg0, %c0_i32 : i32
    %c0_i32_0 = arith.constant 0 : i32
    %1 = arith.cmpi eq, %arg1, %c0_i32_0 : i32
    %2 = arith.andi %0, %1 : i1
    %c0 = arith.constant 0 : index
    %c0_1 = arith.constant 0 : index
    %3 = vector.load %arg3[%c0, %c0_1] : memref<64x3xf32, #tpu.memory_space<vmem>>, vector<64x3xf32>
    %c0_2 = arith.constant 0 : index
    %c0_3 = arith.constant 0 : index
    %4 = vector.load %arg4[%c0_2, %c0_3] : memref<64x1xf32, #tpu.memory_space<vmem>>, vector<64x1xf32>
    %c0_4 = arith.constant 0 : index
    %c0_5 = arith.constant 0 : index
    %c0_6 = arith.constant 0 : index
    %5 = vector.load %arg2[%c0_4, %c0_5, %c0_6] : memref<1x3x16xf32, #tpu.memory_space<vmem>>, vector<1x3x16xf32>
    %6 = vector.shape_cast %5 : vector<1x3x16xf32> to vector<3x16xf32>
    %7 = vector.extract_strided_slice %3 {offsets = [0, 0], sizes = [64, 1], strides = [1, 1]} : vector<64x3xf32> to vector<64x1xf32>
    %8 = vector.extract_strided_slice %6 {offsets = [0, 0], sizes = [1, 16], strides = [1, 1]} : vector<3x16xf32> to vector<1x16xf32>
    %9 = vector.broadcast %7 : vector<64x1xf32> to vector<64x16xf32>
    %10 = vector.broadcast %8 : vector<1x16xf32> to vector<64x16xf32>
    %11 = arith.mulf %9, %10 : vector<64x16xf32>
    %12 = vector.extract_strided_slice %3 {offsets = [0, 1], sizes = [64, 1], strides = [1, 1]} : vector<64x3xf32> to vector<64x1xf32>
    %13 = vector.extract_strided_slice %6 {offsets = [1, 0], sizes = [1, 16], strides = [1, 1]} : vector<3x16xf32> to vector<1x16xf32>
    %14 = vector.broadcast %12 : vector<64x1xf32> to vector<64x16xf32>
    %15 = vector.broadcast %13 : vector<1x16xf32> to vector<64x16xf32>
    %16 = arith.mulf %14, %15 : vector<64x16xf32>
    %17 = arith.addf %11, %16 : vector<64x16xf32>
    %18 = vector.extract_strided_slice %3 {offsets = [0, 2], sizes = [64, 1], strides = [1, 1]} : vector<64x3xf32> to vector<64x1xf32>
    %19 = vector.extract_strided_slice %6 {offsets = [2, 0], sizes = [1, 16], strides = [1, 1]} : vector<3x16xf32> to vector<1x16xf32>
    %20 = vector.broadcast %18 : vector<64x1xf32> to vector<64x16xf32>
    %21 = vector.broadcast %19 : vector<1x16xf32> to vector<64x16xf32>
    %22 = arith.mulf %20, %21 : vector<64x16xf32>
    %23 = arith.addf %17, %22 : vector<64x16xf32>
    %24 = vector.broadcast %4 : vector<64x1xf32> to vector<64x16xf32>
    %25 = arith.addf %23, %24 : vector<64x16xf32>
    %c0_7 = arith.constant 0 : index
    %c0_8 = arith.constant 0 : index
    %26 = vector.load %arg5[%c0_7, %c0_8] : memref<64x64xbf16, #tpu.memory_space<vmem>>, vector<64x64xbf16>
    %c0_9 = arith.constant 0 : index
    %c0_10 = arith.constant 0 : index
    %27 = vector.load %arg6[%c0_9, %c0_10] : memref<64x1xf32, #tpu.memory_space<vmem>>, vector<64x1xf32>
    %cst = arith.constant 0.000000e+00 : f32
    %28 = vector.broadcast %cst : f32 to vector<64x16xf32>
    %29 = arith.maximumf %25, %28 : vector<64x16xf32>
    %30 = arith.truncf %29 : vector<64x16xf32> to vector<64x16xbf16>
    %cst_11 = arith.constant dense<0.000000e+00> : vector<64x16xf32>
    %31 = tpu.matmul %26, %30, %cst_11 {dimension_numbers = #tpu.dot_dimension_numbers<[1], [0], [0], [1], [0, 0, 1, 1], [], []>} : vector<64x64xbf16>, vector<64x16xbf16>, vector<64x16xf32> -> vector<64x16xf32>
    %32 = vector.broadcast %27 : vector<64x1xf32> to vector<64x16xf32>
    %33 = arith.addf %31, %32 : vector<64x16xf32>
    %c0_12 = arith.constant 0 : index
    %c0_13 = arith.constant 0 : index
    %34 = vector.load %arg7[%c0_12, %c0_13] : memref<128x64xbf16, #tpu.memory_space<vmem>>, vector<128x64xbf16>
    %c0_14 = arith.constant 0 : index
    %c0_15 = arith.constant 0 : index
    %35 = vector.load %arg8[%c0_14, %c0_15] : memref<128x1xf32, #tpu.memory_space<vmem>>, vector<128x1xf32>
    %cst_16 = arith.constant 0.000000e+00 : f32
    %36 = vector.broadcast %cst_16 : f32 to vector<64x16xf32>
    %37 = arith.maximumf %33, %36 : vector<64x16xf32>
    %38 = arith.truncf %37 : vector<64x16xf32> to vector<64x16xbf16>
    %cst_17 = arith.constant dense<0.000000e+00> : vector<128x16xf32>
    %39 = tpu.matmul %34, %38, %cst_17 {dimension_numbers = #tpu.dot_dimension_numbers<[1], [0], [0], [1], [0, 0, 1, 1], [], []>} : vector<128x64xbf16>, vector<64x16xbf16>, vector<128x16xf32> -> vector<128x16xf32>
    %40 = vector.broadcast %35 : vector<128x1xf32> to vector<128x16xf32>
    %41 = arith.addf %39, %40 : vector<128x16xf32>
    %c0_18 = arith.constant 0 : index
    %c0_19 = arith.constant 0 : index
    %42 = vector.load %arg9[%c0_18, %c0_19] : memref<128x128xbf16, #tpu.memory_space<vmem>>, vector<128x128xbf16>
    %c0_20 = arith.constant 0 : index
    %c0_21 = arith.constant 0 : index
    %43 = vector.load %arg10[%c0_20, %c0_21] : memref<128x1xf32, #tpu.memory_space<vmem>>, vector<128x1xf32>
    %cst_22 = arith.constant 0.000000e+00 : f32
    %44 = vector.broadcast %cst_22 : f32 to vector<128x16xf32>
    %45 = arith.maximumf %41, %44 : vector<128x16xf32>
    %46 = arith.truncf %45 : vector<128x16xf32> to vector<128x16xbf16>
    %cst_23 = arith.constant dense<0.000000e+00> : vector<128x16xf32>
    %47 = tpu.matmul %42, %46, %cst_23 {dimension_numbers = #tpu.dot_dimension_numbers<[1], [0], [0], [1], [0, 0, 1, 1], [], []>} : vector<128x128xbf16>, vector<128x16xbf16>, vector<128x16xf32> -> vector<128x16xf32>
    %48 = vector.broadcast %43 : vector<128x1xf32> to vector<128x16xf32>
    %49 = arith.addf %47, %48 : vector<128x16xf32>
    %cst_24 = arith.constant dense<0xFF800000> : vector<128xf32>
    %50 = vector.multi_reduction <maximumf>, %49, %cst_24 [1] : vector<128x16xf32> to vector<128xf32>
    %51 = vector.shape_cast %50 : vector<128xf32> to vector<128x1xf32>
    %c0_i32_25 = arith.constant 0 : i32
    %52 = arith.cmpi eq, %arg1, %c0_i32_25 : i32
    %53 = arith.extui %52 : i1 to i32
    %c0_i32_26 = arith.constant 0 : i32
    %54 = arith.cmpi ne, %53, %c0_i32_26 : i32
    scf.if %54 {
      %c0_32 = arith.constant 0 : index
      %c0_33 = arith.constant 0 : index
      %63 = vector.load %arg12[%c0_32, %c0_33] : memref<128x1xf32, #tpu.memory_space<vmem>>, vector<128x1xf32>
      tpu.vector_store %arg12[%c0_32, %c0_33], %51 {strides = array<i32>} : memref<128x1xf32, #tpu.memory_space<vmem>>, vector<128x1xf32>,
    } else {
    }
    %c0_i32_27 = arith.constant 0 : i32
    %55 = arith.cmpi sgt, %arg1, %c0_i32_27 : i32
    %56 = arith.extui %55 : i1 to i32
    %c0_i32_28 = arith.constant 0 : i32
    %57 = arith.cmpi ne, %56, %c0_i32_28 : i32
    scf.if %57 {
      %c0_32 = arith.constant 0 : index
      %c0_33 = arith.constant 0 : index
      %63 = vector.load %arg12[%c0_32, %c0_33] : memref<128x1xf32, #tpu.memory_space<vmem>>, vector<128x1xf32>
      %64 = arith.maximumf %63, %51 : vector<128x1xf32>
      %c0_34 = arith.constant 0 : index
      %c0_35 = arith.constant 0 : index
      %65 = vector.load %arg12[%c0_34, %c0_35] : memref<128x1xf32, #tpu.memory_space<vmem>>, vector<128x1xf32>
      tpu.vector_store %arg12[%c0_34, %c0_35], %64 {strides = array<i32>} : memref<128x1xf32, #tpu.memory_space<vmem>>, vector<128x1xf32>,
    } else {
    }
    %58 = arith.extui %2 : i1 to i32
    %c0_i32_29 = arith.constant 0 : i32
    %59 = arith.cmpi ne, %58, %c0_i32_29 : i32
    scf.if %59 {
      %cst_32 = arith.constant 0.000000e+00 : f32
      %63 = vector.broadcast %cst_32 : f32 to vector<128x2xf32>
      %c0_33 = arith.constant 0 : index
      %c0_34 = arith.constant 0 : index
      %64 = vector.load %arg11[%c0_33, %c0_34] : memref<128x2xf32, #tpu.memory_space<vmem>>, vector<128x2xf32>
      tpu.vector_store %arg11[%c0_33, %c0_34], %63 {strides = array<i32>} : memref<128x2xf32, #tpu.memory_space<vmem>>, vector<128x2xf32>,
    } else {
    }
    %c0_i32_30 = arith.constant 0 : i32
    %60 = arith.cmpi eq, %arg1, %c0_i32_30 : i32
    %61 = arith.extui %60 : i1 to i32
    %c0_i32_31 = arith.constant 0 : i32
    %62 = arith.cmpi ne, %61, %c0_i32_31 : i32
    scf.if %62 {
      %63 = tpu.iota {dimensions = array<i32: 1>} : vector<128x2xi32>
      %64 = vector.broadcast %arg0 : i32 to vector<128x2xi32>
      %65 = arith.cmpi eq, %63, %64 : vector<128x2xi32>
      %c0_32 = arith.constant 0 : index
      %c0_33 = arith.constant 0 : index
      %66 = vector.load %arg12[%c0_32, %c0_33] : memref<128x1xf32, #tpu.memory_space<vmem>>, vector<128x1xf32>
      %c0_34 = arith.constant 0 : index
      %c0_35 = arith.constant 0 : index
      %67 = vector.load %arg11[%c0_34, %c0_35] : memref<128x2xf32, #tpu.memory_space<vmem>>, vector<128x2xf32>
      %68 = vector.shape_cast %66 : vector<128x1xf32> to vector<128x1xf32>
      %69 = vector.broadcast %68 : vector<128x1xf32> to vector<128x2xf32>
      %70 = arith.select %65, %69, %67 : vector<128x2xi1>, vector<128x2xf32>
      %c0_36 = arith.constant 0 : index
      %c0_37 = arith.constant 0 : index
      %71 = vector.load %arg11[%c0_36, %c0_37] : memref<128x2xf32, #tpu.memory_space<vmem>>, vector<128x2xf32>
      tpu.vector_store %arg11[%c0_36, %c0_37], %70 {strides = array<i32>} : memref<128x2xf32, #tpu.memory_space<vmem>>, vector<128x2xf32>,
    } else {
    }
    return
  }
  func.func @transform_0(%arg0: i32, %arg1: i32) -> (i32, i32, i32) {
    %c0_i32 = arith.constant 0 : i32
    %c0_i32_0 = arith.constant 0 : i32
    return %arg0, %c0_i32, %arg1 : i32, i32, i32
  }
  func.func @transform_1(%arg0: i32, %arg1: i32) -> (i32, i32) {
    %c0_i32 = arith.constant 0 : i32
    %c0_i32_0 = arith.constant 0 : i32
    %c0_i32_1 = arith.constant 0 : i32
    return %c0_i32, %c0_i32_0 : i32, i32
  }
  func.func @transform_2(%arg0: i32, %arg1: i32) -> (i32, i32) {
    %c0_i32 = arith.constant 0 : i32
    %c0_i32_0 = arith.constant 0 : i32
    %c0_i32_1 = arith.constant 0 : i32
    return %c0_i32, %c0_i32_0 : i32, i32
  }
  func.func @transform_3(%arg0: i32, %arg1: i32) -> (i32, i32) {
    %c0_i32 = arith.constant 0 : i32
    %c0_i32_0 = arith.constant 0 : i32
    %c0_i32_1 = arith.constant 0 : i32
    return %c0_i32, %c0_i32_0 : i32, i32
  }
  func.func @transform_4(%arg0: i32, %arg1: i32) -> (i32, i32) {
    %c0_i32 = arith.constant 0 : i32
    %c0_i32_0 = arith.constant 0 : i32
    %c0_i32_1 = arith.constant 0 : i32
    return %c0_i32, %c0_i32_0 : i32, i32
  }
  func.func @transform_5(%arg0: i32, %arg1: i32) -> (i32, i32) {
    %c0_i32 = arith.constant 0 : i32
    %c0_i32_0 = arith.constant 0 : i32
    %c0_i32_1 = arith.constant 0 : i32
    return %c0_i32, %c0_i32_0 : i32, i32
  }
  func.func @transform_6(%arg0: i32, %arg1: i32) -> (i32, i32) {
    %c0_i32 = arith.constant 0 : i32
    %c0_i32_0 = arith.constant 0 : i32
    %c0_i32_1 = arith.constant 0 : i32
    return %c0_i32, %c0_i32_0 : i32, i32
  }
  func.func @transform_7(%arg0: i32, %arg1: i32) -> (i32, i32) {
    %c0_i32 = arith.constant 0 : i32
    %c0_i32_0 = arith.constant 0 : i32
    %c0_i32_1 = arith.constant 0 : i32
    return %c0_i32, %c0_i32_0 : i32, i32
  }
  func.func @transform_8(%arg0: i32, %arg1: i32) -> (i32, i32) {
    %c0_i32 = arith.constant 0 : i32
    %c0_i32_0 = arith.constant 0 : i32
    %c0_i32_1 = arith.constant 0 : i32
    return %c0_i32, %c0_i32_0 : i32, i32
  }
  func.func @transform_9(%arg0: i32, %arg1: i32) -> (i32, i32) {
    %c0_i32 = arith.constant 0 : i32
    %c0_i32_0 = arith.constant 0 : i32
    %c0_i32_1 = arith.constant 0 : i32
    return %c0_i32, %c0_i32_0 : i32, i32
  }
}

</mosaic_0001>

<bundles_post_ra>
// kernel: sub.7
= control target key start
LH: loop header
LB: loop body
LE: loop exit
PB: predicated region body
PF: predicated region fallthrough
CT: control target
= control target key end

     0   :  { %s34_s0 = inlined_call_operand.vmem [shape: f32[64,1], index: 0, kind: input, shape index: {}]   ;;  %s35_s1 = inlined_call_operand.vmem [shape: f32[64,1], index: 1, kind: input, shape index: {}]   ;;  %s36_s2 = inlined_call_operand.vmem [shape: f32[64,1], index: 2, kind: output, shape index: {}]  }
   0x1   :  { %v3_v0 = vld [vmem:[%s34_s0] sm:$0x1] }
   0x2   :  { %v4_v1 = vld [vmem:[%s35_s1] sm:$0x1] }
   0x3   :  { %v7_v2 = vsub.f32 %v3_v0, %v4_v1 }
   0x5   :  { %9 = vst [vmem:[%s36_s2] sm:$0x1] %v7_v2 }

// kernel: sub.11
= control target key start
LH: loop header
LB: loop body
LE: loop exit
PB: predicated region body
PF: predicated region fallthrough
CT: control target
= control target key end

     0   :  { %s34_s0 = inlined_call_operand.vmem [shape: f32[128,1], index: 0, kind: input, shape index: {}]   ;;  %s35_s1 = inlined_call_operand.vmem [shape: f32[128,1], index: 1, kind: input, shape index: {}]   ;;  %s36_s2 = inlined_call_operand.vmem [shape: f32[128,1], index: 2, kind: output, shape index: {}]  }
   0x1   :  { %v3_v0 = vld [vmem:[%s34_s0] sm:$0x1] }
   0x2   :  { %v4_v1 = vld [vmem:[%s35_s1] sm:$0x1] }
   0x3   :  { %v7_v2 = vsub.f32 %v3_v0, %v4_v1 }
   0x5   :  { %9 = vst [vmem:[%s36_s2] sm:$0x1] %v7_v2 }

// kernel: global_encode.4
= control target key start
LH: loop header
LB: loop body
LE: loop exit
PB: predicated region body
PF: predicated region fallthrough
CT: control target
= control target key end

     0   :  { %s693_s15 = smov 0   ;;  %s695_s16 = smov 0   ;;  %s1002_s0 = inlined_call_operand.vmem [shape: f32[2,3,16], index: 0, kind: input, shape index: {}]   ;;  %s1003_s1 = inlined_call_operand.vmem [shape: f32[64,3], index: 1, kind: input, shape index: {}]   ;;  %s1004_s2 = inlined_call_operand.vmem [shape: f32[64,1], index: 2, kind: input, shape index: {}]   ;;  %s1005_s3 = inlined_call_operand.vmem [shape: f32[64,1], index: 3, kind: output, shape index: {0}]   ;;  %s1006_s4 = inlined_call_operand.vmem [shape: f32[64,1], index: 4, kind: output, shape index: {1}]  }
   0x1   :  { %s697_s17 = smov 0  }
   0x2 LB: > { %s27_s18 = sadd.s32 1, %s658_s16  ;;  %p599_p0 = scmp.ge.s32.totalorder %s662_s17, 1  ;;  %s662_s17 = sphi %s697_s17, %s15_s17   ;;  %s658_s16 = sphi %s695_s16, %s1008_s16   ;;  %s654_s15 = sphi %s693_s15, %s1007_s15  }
   0x3   : > { %p29_p1 = scmp.ge.s32.totalorder %s27_s18, 2  ;;  %p171_p2 = scmp.lt.s32.totalorder %s662_s17, 3 }
   0x5   : > { %s1010_s18 = smov (%p29_p1, %s27_s18), 0  ;;  %p172_p3 = pnand %p599_p0, %p171_p2 }
   0x6   : > { %v207_v0 = vld [vmem:[%s1003_s1 + $0x10] sm:$0xff] (!%p172_p3)  ;;  %v205_v1 = vld [vmem:[%s1003_s1] sm:$0xff] (!%p172_p3)  ;;  %v664_v2 = vmov (!%p172_p3), 1   ;;  %v665_v3 = vmov (!%p172_p3), 0   ;;  %v208_v4 = vld [vmem:[%s1003_s1 + $0x18] sm:$0xff] (!%p172_p3)  ;;  %v666_v8 = vmov (!%p172_p3), 2   ;;  %v262_v31 = vlaneseq (!%p172_p3) }
   0x7   : > { %175 = sbr.rel (%p172_p3) target bundleno = 379 (0x17b), region = 32  ;;  %634 = vset.pattern.permute.xlu0 (!%p172_p3), %v664_v2  ;;  %633 = vset.pattern.permute.xlu1 (!%p172_p3), %v665_v3  ;;  %v210_v5 = vld [vmem:[%s1003_s1 + $0x28] sm:$0xff] (!%p172_p3)  ;;  %v212_v6 = vld [vmem:[%s1003_s1 + $0x38] sm:$0xff] (!%p172_p3)  ;;  %v209_v9 = vld [vmem:[%s1003_s1 + $0x20] sm:$0xff] (!%p172_p3)  ;;  %p201_p4 = scmp.eq.s32.totalorder (!%p172_p3), %s654_s15, 0 }
   0x8   : > { %234 = vperm.xlu1 (!%p172_p3), %633, %v207_v0   ;;  %275 = vperm.xlu0 (!%p172_p3), %634, %v205_v1   ;;  %v206_v7 = vld [vmem:[%s1003_s1 + $0x8] sm:$0xff] (!%p172_p3)  ;;  %v211_v10 = vld [vmem:[%s1003_s1 + $0x30] sm:$0xff] (!%p172_p3)  ;;  %v213_v11 = vld [vmem:[%s1004_s2] sm:$0xff] (!%p172_p3)  ;;  %p194_p5 = scmp.lt.s32.totalorder (!%p172_p3), %s654_s15, 1  ;;  %v263_v34 = vshrl.u32 (!%p172_p3), %v262_v31, 7 }
   0x9   : > { %v216_v12 = vld [vmem:[%s1004_s2 + $0x18] sm:$0xff] (!%p172_p3)  ;;  %v218_v13 = vld [vmem:[%s1004_s2 + $0x28] sm:$0xff] (!%p172_p3)  ;;  %v215_v16 = vld [vmem:[%s1004_s2 + $0x10] sm:$0xff] (!%p172_p3) }
   0xa   : > { %v214_v14 = vld [vmem:[%s1004_s2 + $0x8] sm:$0xff] (!%p172_p3)  ;;  %v220_v15 = vld [vmem:[%s1004_s2 + $0x38] sm:$0xff] (!%p172_p3)  ;;  %v217_v17 = vld [vmem:[%s1004_s2 + $0x20] sm:$0xff] (!%p172_p3)  ;;  %v264_v37 = vsub.s32 (!%p172_p3), 0, %v263_v34  ;;  %v308_v41 = vsub.s32 (!%p172_p3), 1, %v263_v34  ;;  %v360_v42 = vsub.s32 (!%p172_p3), 2, %v263_v34 }
   0xb   : > { %v219_v18 = vld [vmem:[%s1004_s2 + $0x30] sm:$0xff] (!%p172_p3) }
   0xc   : > { %239 = vperm.xlu1 (!%p172_p3), %633, %v208_v4   ;;  %287 = vperm.xlu0 (!%p172_p3), %634, %v208_v4  }
   0xe   : > { %s195_s29 = scalar_select %p194_p5, %s654_s15, 1 }
   0xf   : > { %vm428_vm0 = vcmask (%p201_p4), 7168  }
  0x10   : > { %249 = vperm.xlu1 %633, %v210_v5   ;;  %295 = vperm.xlu0 %634, %v210_v5   ;;  %s600_s30 = sshll.u32 %s195_s29, 2 }
  0x11   : > { %s200_s7 = scalar_lea.vmem %s1002_s0, %s600_s30 }
  0x12   : > { %v221_v38 = vld [vmem:[%s200_s7] sm:$0x7] }
  0x13   : > { %v265_v43 = vrot.slane %v221_v38, %v264_v37  ;;  %v309_v46 = vrot.slane %v221_v38, %v308_v41  ;;  %v361_v47 = vrot.slane %v221_v38, %v360_v42 }
  0x14   : > { %259 = vperm.xlu1 %633, %v212_v6   ;;  %303 = vperm.xlu0 %634, %v212_v6  }
  0x18   : > { %635 = vset.pattern.permute.xlu1 %v664_v2  ;;  %637 = vset.pattern.permute.xlu0 %v666_v8 }
  0x19   : > { %279 = vperm.xlu1 %635, %v206_v7   ;;  %331 = vperm.xlu0 %637, %v206_v7  }
  0x1d   : > { %283 = vperm.xlu1 %635, %v207_v0   ;;  %343 = vperm.xlu0 %637, %v209_v9  }
  0x21   : > { %291 = vperm.xlu1 %635, %v209_v9   ;;  %351 = vperm.xlu0 %637, %v211_v10  }
  0x25   : > { %299 = vperm.xlu1 %635, %v211_v10   ;;  %638 = vset.pattern.permute.xlu0 %v665_v3 }
  0x26   : > { %224 = vperm.xlu0 %638, %v205_v1  }
  0x29   : > { %636 = vset.pattern.permute.xlu1 %v666_v8 }
  0x2a   : > { %327 = vperm.xlu1 %636, %v205_v1   ;;  %229 = vperm.xlu0 %638, %v206_v7  }
  0x2e   : > { %335 = vperm.xlu1 %636, %v207_v0   ;;  %244 = vperm.xlu0 %638, %v209_v9  }
  0x32   : > { %339 = vperm.xlu1 %636, %v208_v4   ;;  %254 = vperm.xlu0 %638, %v211_v10  }
  0x36   : > { %347 = vperm.xlu1 %636, %v210_v5   ;;  %380 = vperm.xlu0 %638, %v213_v11  }
  0x3a   : > { %355 = vperm.xlu1 %636, %v212_v6   ;;  %395 = vperm.xlu0 %638, %v216_v12  }
  0x3e   : > { %639 = vset.pattern.permute.xlu1 %v665_v3  ;;  %405 = vperm.xlu0 %638, %v218_v13  }
  0x3f   : > { %385 = vperm.xlu1 %639, %v214_v14  }
  0x42   : > { %415 = vperm.xlu0 %638, %v220_v15  }
  0x43   : > { %390 = vperm.xlu1 %639, %v215_v16  }
  0x47   : > { %400 = vperm.xlu1 %639, %v217_v17  }
  0x4b   : > { %410 = vperm.xlu1 %639, %v219_v18  }
  0x87   : > { %v762_v19 = vpop.permute.xlu1 %234  ;;  %v276_v20 = vpop.permute.xlu0 %275 }
  0x88   : > { %v310_v49 = vmul.f32 %v309_v46, %v276_v20  ;;  %v268_v15 = vmul.f32 %v265_v43, %v762_v19 }
  0x8b   : > { %v240_v21 = vpop.permute.xlu1 %239  ;;  %v288_v22 = vpop.permute.xlu0 %287 }
  0x8c   : > { %v269_v53 = vmul.f32 %v265_v43, %v240_v21  ;;  %v313_v54 = vmul.f32 %v309_v46, %v288_v22 }
  0x8e   : > { %v321_v61 = vadd.f32 %v313_v54, %v269_v53 }
  0x8f   : > { %v250_v23 = vpop.permute.xlu1 %249  ;;  %v296_v24 = vpop.permute.xlu0 %295 }
  0x90   : > { %v271_v62 = vmul.f32 %v265_v43, %v250_v23  ;;  %v315_v63 = vmul.f32 %v309_v46, %v296_v24 }
  0x92   : > { %v323_v7 = vadd.f32 %v315_v63, %v271_v62 }
  0x93   : > { %v260_v25 = vpop.permute.xlu1 %259  ;;  %v304_v26 = vpop.permute.xlu0 %303 }
  0x94   : > { %v273_v8 = vmul.f32 %v265_v43, %v260_v25  ;;  %v317_v9 = vmul.f32 %v309_v46, %v304_v26 }
  0x96   : > { %v325_v21 = vadd.f32 %v317_v9, %v273_v8 }
  0x98   : > { %v280_v27 = vpop.permute.xlu1 %279  ;;  %v332_v28 = vpop.permute.xlu0 %331 }
  0x99   : > { %v311_v1 = vmul.f32 %v309_v46, %v280_v27  ;;  %v363_v11 = vmul.f32 %v361_v47, %v332_v28 }
  0x9c   : > { %v284_v29 = vpop.permute.xlu1 %283  ;;  %v765_v30 = vpop.permute.xlu0 %343 }
  0x9d   : > { %v312_v12 = vmul.f32 %v309_v46, %v284_v29  ;;  %v366_v19 = vmul.f32 %v361_v47, %v765_v30 }
  0x9f   : > { %v320_v24 = vadd.f32 %v312_v12, %v268_v15 }
  0xa0   : > { %v292_v32 = vpop.permute.xlu1 %291  ;;  %v768_v33 = vpop.permute.xlu0 %351 }
  0xa1   : > { %v314_v27 = vmul.f32 %v309_v46, %v292_v32 }
  0xa4   : > { %v770_v35 = vpop.permute.xlu1 %299 }
  0xa5   : > { %v225_v36 = vpop.permute.xlu0 %224  ;;  %v316_v38 = vmul.f32 %v309_v46, %v770_v35 }
  0xa6   : > { %v266_v48 = vmul.f32 %v265_v43, %v225_v36 }
  0xa8   : > { %v318_v55 = vadd.f32 %v310_v49, %v266_v48 }
  0xa9   : > { %v328_v39 = vpop.permute.xlu1 %327  ;;  %v230_v40 = vpop.permute.xlu0 %229 }
  0xaa   : > { %v362_v50 = vmul.f32 %v361_v47, %v328_v39  ;;  %v267_v58 = vmul.f32 %v265_v43, %v230_v40 }
  0xac   : > { %v370_v57 = vadd.f32 %v362_v50, %v318_v55  ;;  %v319_v4 = vadd.f32 %v311_v1, %v267_v58 }
  0xad   : > { %v336_v44 = vpop.permute.xlu1 %335  ;;  %v245_v45 = vpop.permute.xlu0 %244 }
  0xae   : > { %v364_v16 = vmul.f32 %v361_v47, %v336_v44  ;;  %v270_v17 = vmul.f32 %v265_v43, %v245_v45  ;;  %v371_v20 = vadd.f32 %v363_v11, %v319_v4  ;;  %v368_v44 = vmul.f32 %v361_v47, %v768_v33 }
  0xb0   : > { %v322_v31 = vadd.f32 %v314_v27, %v270_v17  ;;  %v372_v29 = vadd.f32 %v364_v16, %v320_v24 }
  0xb1   : > { %v340_v51 = vpop.permute.xlu1 %339  ;;  %v255_v52 = vpop.permute.xlu0 %254 }
  0xb2   : > { %v365_v56 = vmul.f32 %v361_v47, %v340_v51  ;;  %v272_v34 = vmul.f32 %v265_v43, %v255_v52  ;;  %v374_v41 = vadd.f32 %v366_v19, %v322_v31  ;;  %v667_v43 = vmov (%p201_p4), 0.0  }
  0xb3   : > { %429 = vst.msk [vmem:[%s1005_s3] sm:$0xff] (%p201_p4), %vm428_vm0, %v667_v43  ;;  %430 = vst.msk [vmem:[%s1005_s3 + $0x8] sm:$0xff] (%p201_p4), %vm428_vm0, %v667_v43 }
  0xb4   : > { %v373_v3 = vadd.f32 %v365_v56, %v321_v61  ;;  %v324_v40 = vadd.f32 %v316_v38, %v272_v34  ;;  %431 = vst.msk [vmem:[%s1005_s3 + $0x10] sm:$0xff] (%p201_p4), %vm428_vm0, %v667_v43  ;;  %432 = vst.msk [vmem:[%s1005_s3 + $0x18] sm:$0xff] (%p201_p4), %vm428_vm0, %v667_v43 }
  0xb5   : > { %v348_v59 = vpop.permute.xlu1 %347  ;;  %v381_v60 = vpop.permute.xlu0 %380  ;;  %433 = vst.msk [vmem:[%s1005_s3 + $0x20] sm:$0xff] (%p201_p4), %vm428_vm0, %v667_v43  ;;  %434 = vst.msk [vmem:[%s1005_s3 + $0x28] sm:$0xff] (%p201_p4), %vm428_vm0, %v667_v43 }
  0xb6   : > { %v775_v0 = vadd.f32 %v381_v60, %v370_v57  ;;  %v367_v2 = vmul.f32 %v361_v47, %v348_v59  ;;  %v376_v45 = vadd.f32 %v368_v44, %v324_v40  ;;  %435 = vst.msk [vmem:[%s1005_s3 + $0x30] sm:$0xff] (%p201_p4), %vm428_vm0, %v667_v43  ;;  %436 = vst.msk [vmem:[%s1005_s3 + $0x38] sm:$0xff] (%p201_p4), %vm428_vm0, %v667_v43 }
  0xb7   : > { %437 = vst.msk [vmem:[%s1006_s4] sm:$0xff] (%p201_p4), %vm428_vm0, %v667_v43  ;;  %438 = vst.msk [vmem:[%s1006_s4 + $0x8] sm:$0xff] (%p201_p4), %vm428_vm0, %v667_v43 }
  0xb8   : > { %v375_v14 = vadd.f32 %v367_v2, %v323_v7  ;;  %439 = vst.msk [vmem:[%s1006_s4 + $0x10] sm:$0xff] (%p201_p4), %vm428_vm0, %v667_v43  ;;  %440 = vst.msk [vmem:[%s1006_s4 + $0x18] sm:$0xff] (%p201_p4), %vm428_vm0, %v667_v43 }
  0xb9   : > { %v356_v5 = vpop.permute.xlu1 %355  ;;  %v396_v6 = vpop.permute.xlu0 %395  ;;  %441 = vst.msk [vmem:[%s1006_s4 + $0x20] sm:$0xff] (%p201_p4), %vm428_vm0, %v667_v43  ;;  %442 = vst.msk [vmem:[%s1006_s4 + $0x28] sm:$0xff] (%p201_p4), %vm428_vm0, %v667_v43 }
  0xba   : > { %v777_v10 = vadd.f32 %v396_v6, %v373_v3  ;;  %v369_v13 = vmul.f32 %v361_v47, %v356_v5  ;;  %443 = vst.msk [vmem:[%s1006_s4 + $0x30] sm:$0xff] (%p201_p4), %vm428_vm0, %v667_v43  ;;  %444 = vst.msk [vmem:[%s1006_s4 + $0x38] sm:$0xff] (%p201_p4), %vm428_vm0, %v667_v43 }
  0xbc   : > { %v377_v26 = vadd.f32 %v369_v13, %v325_v21 }
  0xbd   : > { %v406_v18 = vpop.permute.xlu0 %405 }
  0xbe   : > { %v780_v22 = vadd.f32 %v406_v18, %v375_v14  ;;  %v386_v23 = vpop.permute.xlu1 %385 }
  0xbf   : > { %v419_v25 = vadd.f32 %v386_v23, %v371_v20 }
  0xc1   : > { %v416_v28 = vpop.permute.xlu0 %415 }
  0xc2   : > { %v782_v36 = vadd.f32 %v416_v28, %v377_v26  ;;  %v391_v37 = vpop.permute.xlu1 %390 }
  0xc3   : > { %v420_v39 = vadd.f32 %v391_v37, %v372_v29 }
  0xc5   : > { %427 = sbr.rel (!%p201_p4) target bundleno = 204 (0xcc), region = 36 }
  0xc6   : > { %v401_v42 = vpop.permute.xlu1 %400 }
  0xc7   : > { %v422_v32 = vadd.f32 %v401_v42, %v374_v41 }
  0xca   : > { %v411_v48 = vpop.permute.xlu1 %410 }
  0xcb   : > { %v424_v49 = vadd.f32 %v411_v48, %v376_v45 }
  0xcc PF: > { %vm453_vm1 = vcmask 130048   ;;  %v504_v53 = vmul.f32 %v419_v25, %v419_v25  ;;  %v503_v54 = vmul.f32 %v775_v0, %v775_v0  ;;  %v506_v57 = vmul.f32 %v777_v10, %v777_v10  ;;  %v447_v5 = vld [vmem:[%s1005_s3 + $0x10] sm:$0xff]  ;;  %v445_v6 = vld [vmem:[%s1005_s3] sm:$0xff]  ;;  %v448_v11 = vld [vmem:[%s1005_s3 + $0x18] sm:$0xff] }
  0xcd   : > { %v460_v30 = vsel %vm453_vm1, %v420_v39, 0.0  ;;  %v454_v33 = vsel %vm453_vm1, %v775_v0, 0.0  ;;  %v463_v35 = vsel %vm453_vm1, %v777_v10, 0.0  ;;  %v457_v46 = vsel %vm453_vm1, %v419_v25, 0.0  ;;  %v446_v12 = vld [vmem:[%s1005_s3 + $0x8] sm:$0xff]  ;;  %v449_v18 = vld [vmem:[%s1005_s3 + $0x20] sm:$0xff] }
  0xce   : > { %461 = vadd.xlane.f32.xlu1 %v460_v30  ;;  %455 = vadd.xlane.f32.xlu0 %v454_v33  ;;  %v469_v47 = vsel %vm453_vm1, %v780_v22, 0.0  ;;  %v466_v50 = vsel %vm453_vm1, %v422_v32, 0.0  ;;  %v475_v51 = vsel %vm453_vm1, %v782_v36, 0.0  ;;  %v472_v52 = vsel %vm453_vm1, %v424_v49, 0.0  ;;  %v450_v17 = vld [vmem:[%s1005_s3 + $0x28] sm:$0xff]  ;;  %v452_v24 = vld [vmem:[%s1005_s3 + $0x38] sm:$0xff] }
  0xcf   : > { %v514_v55 = vsel %vm453_vm1, %v504_v53, 0.0  ;;  %v511_v56 = vsel %vm453_vm1, %v503_v54, 0.0  ;;  %v505_v58 = vmul.f32 %v420_v39, %v420_v39  ;;  %v520_v59 = vsel %vm453_vm1, %v506_v57, 0.0  ;;  %v451_v27 = vld [vmem:[%s1005_s3 + $0x30] sm:$0xff]  ;;  %v496_v28 = vld [vmem:[%s1006_s4 + $0x8] sm:$0xff]  ;;  %v495_v29 = vld [vmem:[%s1006_s4] sm:$0xff] }
  0xd0   : > { %v508_v61 = vmul.f32 %v780_v22, %v780_v22  ;;  %v507_v62 = vmul.f32 %v422_v32, %v422_v32  ;;  %v510_v1 = vmul.f32 %v782_v36, %v782_v36  ;;  %v509_v2 = vmul.f32 %v424_v49, %v424_v49  ;;  %v498_v39 = vld [vmem:[%s1006_s4 + $0x18] sm:$0xff]  ;;  %v497_v40 = vld [vmem:[%s1006_s4 + $0x10] sm:$0xff]  ;;  %v500_v45 = vld [vmem:[%s1006_s4 + $0x28] sm:$0xff] }
  0xd1   : > { %v517_v60 = vsel %vm453_vm1, %v505_v58, 0.0  ;;  %vm486_vm2 = vcmask 7168   ;;  %v499_v48 = vld [vmem:[%s1006_s4 + $0x20] sm:$0xff] }
  0xd2   : > { %464 = vadd.xlane.f32.xlu1 %v463_v35  ;;  %458 = vadd.xlane.f32.xlu0 %v457_v46  ;;  %v526_v63 = vsel %vm453_vm1, %v508_v61, 0.0  ;;  %v523_v0 = vsel %vm453_vm1, %v507_v62, 0.0  ;;  %v532_v3 = vsel %vm453_vm1, %v510_v1, 0.0  ;;  %v529_v4 = vsel %vm453_vm1, %v509_v2, 0.0  ;;  %v502_v35 = vld [vmem:[%s1006_s4 + $0x38] sm:$0xff]  ;;  %v501_v46 = vld [vmem:[%s1006_s4 + $0x30] sm:$0xff] }
  0xd6   : > { %470 = vadd.xlane.f32.xlu1 %v469_v47  ;;  %467 = vadd.xlane.f32.xlu0 %v466_v50 }
  0xda   : > { %476 = vadd.xlane.f32.xlu1 %v475_v51  ;;  %473 = vadd.xlane.f32.xlu0 %v472_v52 }
  0xde   : > { %515 = vadd.xlane.f32.xlu1 %v514_v55  ;;  %512 = vadd.xlane.f32.xlu0 %v511_v56 }
  0xe2   : > { %521 = vadd.xlane.f32.xlu1 %v520_v59  ;;  %518 = vadd.xlane.f32.xlu0 %v517_v60 }
  0xe6   : > { %527 = vadd.xlane.f32.xlu1 %v526_v63  ;;  %524 = vadd.xlane.f32.xlu0 %v523_v0 }
  0xea   : > { %533 = vadd.xlane.f32.xlu1 %v532_v3  ;;  %530 = vadd.xlane.f32.xlu0 %v529_v4 }
 0x15b   : > { %v462_v7 = vpop.xlane.xlu1 %461  ;;  %v456_v8 = vpop.xlane.xlu0 %455 }
 0x15c   : > { %v480_v9 = vadd.f32 %v462_v7, %v447_v5  ;;  %v478_v10 = vadd.f32 %v456_v8, %v445_v6 }
 0x15e   : > { %489 = vst.msk [vmem:[%s1005_s3 + $0x10] sm:$0xff] %vm486_vm2, %v480_v9  ;;  %487 = vst.msk [vmem:[%s1005_s3] sm:$0xff] %vm486_vm2, %v478_v10 }
 0x15f   : > { %v465_v13 = vpop.xlane.xlu1 %464  ;;  %v459_v14 = vpop.xlane.xlu0 %458 }
 0x160   : > { %v481_v15 = vadd.f32 %v465_v13, %v448_v11  ;;  %v479_v16 = vadd.f32 %v459_v14, %v446_v12 }
 0x162   : > { %490 = vst.msk [vmem:[%s1005_s3 + $0x18] sm:$0xff] %vm486_vm2, %v481_v15  ;;  %488 = vst.msk [vmem:[%s1005_s3 + $0x8] sm:$0xff] %vm486_vm2, %v479_v16 }
 0x163   : > { %v471_v20 = vpop.xlane.xlu1 %470  ;;  %v468_v21 = vpop.xlane.xlu0 %467 }
 0x164   : > { %v483_v22 = vadd.f32 %v471_v20, %v450_v17  ;;  %v482_v23 = vadd.f32 %v468_v21, %v449_v18 }
 0x166   : > { %492 = vst.msk [vmem:[%s1005_s3 + $0x28] sm:$0xff] %vm486_vm2, %v483_v22  ;;  %491 = vst.msk [vmem:[%s1005_s3 + $0x20] sm:$0xff] %vm486_vm2, %v482_v23 }
 0x167   : > { %v477_v25 = vpop.xlane.xlu1 %476  ;;  %v474_v26 = vpop.xlane.xlu0 %473 }
 0x168   : > { %v485_v31 = vadd.f32 %v477_v25, %v452_v24  ;;  %v484_v34 = vadd.f32 %v474_v26, %v451_v27 }
 0x16a   : > { %494 = vst.msk [vmem:[%s1005_s3 + $0x38] sm:$0xff] %vm486_vm2, %v485_v31  ;;  %493 = vst.msk [vmem:[%s1005_s3 + $0x30] sm:$0xff] %vm486_vm2, %v484_v34 }
 0x16b   : > { %v516_v36 = vpop.xlane.xlu1 %515  ;;  %v513_v37 = vpop.xlane.xlu0 %512 }
 0x16c   : > { %v536_v19 = vadd.f32 %v516_v36, %v496_v28  ;;  %v535_v38 = vadd.f32 %v513_v37, %v495_v29 }
 0x16e   : > { %544 = vst.msk [vmem:[%s1006_s4 + $0x8] sm:$0xff] %vm486_vm2, %v536_v19  ;;  %543 = vst.msk [vmem:[%s1006_s4] sm:$0xff] %vm486_vm2, %v535_v38 }
 0x16f   : > { %v522_v41 = vpop.xlane.xlu1 %521  ;;  %v519_v42 = vpop.xlane.xlu0 %518 }
 0x170   : > { %v538_v44 = vadd.f32 %v522_v41, %v498_v39  ;;  %v537_v32 = vadd.f32 %v519_v42, %v497_v40 }
 0x172   : > { %546 = vst.msk [vmem:[%s1006_s4 + $0x18] sm:$0xff] %vm486_vm2, %v538_v44  ;;  %545 = vst.msk [vmem:[%s1006_s4 + $0x10] sm:$0xff] %vm486_vm2, %v537_v32 }
 0x173   : > { %v528_v49 = vpop.xlane.xlu1 %527  ;;  %v525_v43 = vpop.xlane.xlu0 %524 }
 0x174   : > { %v540_v30 = vadd.f32 %v528_v49, %v500_v45  ;;  %v539_v33 = vadd.f32 %v525_v43, %v499_v48 }
 0x176   : > { %548 = vst.msk [vmem:[%s1006_s4 + $0x28] sm:$0xff] %vm486_vm2, %v540_v30  ;;  %547 = vst.msk [vmem:[%s1006_s4 + $0x20] sm:$0xff] %vm486_vm2, %v539_v33 }
 0x177   : > { %v534_v47 = vpop.xlane.xlu1 %533  ;;  %v531_v50 = vpop.xlane.xlu0 %530 }
 0x178   : > { %v542_v51 = vadd.f32 %v534_v47, %v502_v35  ;;  %v541_v52 = vadd.f32 %v531_v50, %v501_v46 }
 0x17a   : > { %550 = vst.msk [vmem:[%s1006_s4 + $0x38] sm:$0xff] %vm486_vm2, %v542_v51  ;;  %549 = vst.msk [vmem:[%s1006_s4 + $0x30] sm:$0xff] %vm486_vm2, %v541_v52 }
 0x17b PF: > { %s15_s17 = sadd.s32 1, %s662_s17   ;;  %s1007_s15 = smov %s658_s16 }
 0x17c   : > { %p12_p6 = scmp.ge.s32.totalorder %s15_s17, 4   ;;  %s1008_s16 = smov %s1010_s18 }
 0x17e   :  { %14 = sbr.rel (!%p12_p6) target bundleno = 2 (0x2), region = 70 }

// kernel: global_encode.5
= control target key start
LH: loop header
LB: loop body
LE: loop exit
PB: predicated region body
PF: predicated region fallthrough
CT: control target
= control target key end

     0   :  { %s976_s21 = smov 0   ;;  %s978_s22 = smov 0   ;;  %s1342_s0 = inlined_call_operand.vmem [shape: f32[2,3,16], index: 0, kind: input, shape index: {}]   ;;  %s1343_s1 = inlined_call_operand.vmem [shape: f32[64,3], index: 1, kind: input, shape index: {}]   ;;  %s1344_s2 = inlined_call_operand.vmem [shape: f32[64,1], index: 2, kind: input, shape index: {}]   ;;  %s1345_s3 = inlined_call_operand.vmem [shape: bf16[64,64], index: 3, kind: input, shape index: {}]   ;;  %s1346_s4 = inlined_call_operand.vmem [shape: f32[64,1], index: 4, kind: input, shape index: {}]   ;;  %s1347_s5 = inlined_call_operand.vmem [shape: f32[64,1], index: 5, kind: output, shape index: {0}]   ;;  %s1348_s6 = inlined_call_operand.vmem [shape: f32[64,1], index: 6, kind: output, shape index: {1}]  }
   0x1   :  { %s980_s23 = smov 0  }
   0x2 LB: > { %s29_s24 = sadd.s32 1, %s931_s22  ;;  %p820_p0 = scmp.ge.s32.totalorder %s935_s23, 1  ;;  %s935_s23 = sphi %s980_s23, %s17_s23   ;;  %s931_s22 = sphi %s978_s22, %s1350_s22   ;;  %s927_s21 = sphi %s976_s21, %s1349_s21  }
   0x3   : > { %p31_p1 = scmp.ge.s32.totalorder %s29_s24, 2  ;;  %p221_p2 = scmp.lt.s32.totalorder %s935_s23, 3 }
   0x5   : > { %s1352_s24 = smov (%p31_p1, %s29_s24), 0  ;;  %p222_p3 = pnand %p820_p0, %p221_p2 }
   0x6   : > { %v260_v0 = vld [vmem:[%s1343_s1] sm:$0xff] (!%p222_p3)  ;;  %v937_v1 = vmov (!%p222_p3), 2   ;;  %v938_v2 = vmov (!%p222_p3), 1   ;;  %v262_v3 = vld [vmem:[%s1343_s1 + $0x10] sm:$0xff] (!%p222_p3)  ;;  %v261_v4 = vld [vmem:[%s1343_s1 + $0x8] sm:$0xff] (!%p222_p3)  ;;  %v939_v7 = vmov (!%p222_p3), 0   ;;  %v317_v35 = vlaneseq (!%p222_p3) }
   0x7   : > { %225 = sbr.rel (%p222_p3) target bundleno = 624 (0x270), region = 40  ;;  %895 = vset.pattern.permute.xlu0 (!%p222_p3), %v937_v1  ;;  %894 = vset.pattern.permute.xlu1 (!%p222_p3), %v938_v2  ;;  %v265_v5 = vld [vmem:[%s1343_s1 + $0x28] sm:$0xff] (!%p222_p3)  ;;  %v264_v6 = vld [vmem:[%s1343_s1 + $0x20] sm:$0xff] (!%p222_p3)  ;;  %v267_v8 = vld [vmem:[%s1343_s1 + $0x38] sm:$0xff] (!%p222_p3)  ;;  %p256_p4 = scmp.eq.s32.totalorder (!%p222_p3), %s927_s21, 0  ;;  %vm569_vm0 = vcmask (!%p222_p3), 523264  }
   0x8   : > { %382 = vperm.xlu0 (!%p222_p3), %895, %v260_v0   ;;  %330 = vperm.xlu1 (!%p222_p3), %894, %v260_v0   ;;  %v263_v9 = vld [vmem:[%s1343_s1 + $0x18] sm:$0xff] (!%p222_p3)  ;;  %v268_v10 = vld [vmem:[%s1344_s2] sm:$0xff] (!%p222_p3)  ;;  %v269_v11 = vld [vmem:[%s1344_s2 + $0x8] sm:$0xff] (!%p222_p3)  ;;  %p248_p5 = scmp.lt.s32.totalorder (!%p222_p3), %s927_s21, 1  ;;  %v318_v37 = vshrl.u32 (!%p222_p3), %v317_v35, 7 }
   0x9   : > { %v266_v12 = vld [vmem:[%s1343_s1 + $0x30] sm:$0xff] (!%p222_p3)  ;;  %v272_v13 = vld [vmem:[%s1344_s2 + $0x20] sm:$0xff] (!%p222_p3)  ;;  %v275_v14 = vld [vmem:[%s1344_s2 + $0x38] sm:$0xff] (!%p222_p3) }
   0xa   : > { %v490_v15 = vld [vmem:[%s1346_s4 + $0x8] sm:$0xff] (!%p222_p3)  ;;  %v492_v16 = vld [vmem:[%s1346_s4 + $0x18] sm:$0xff] (!%p222_p3)  ;;  %v270_v17 = vld [vmem:[%s1344_s2 + $0x10] sm:$0xff] (!%p222_p3)  ;;  %v363_v40 = vsub.s32 (!%p222_p3), 1, %v318_v37  ;;  %v319_v41 = vsub.s32 (!%p222_p3), 0, %v318_v37  ;;  %v415_v45 = vsub.s32 (!%p222_p3), 2, %v318_v37 }
   0xb   : > { %v494_v18 = vld [vmem:[%s1346_s4 + $0x28] sm:$0xff] (!%p222_p3)  ;;  %v271_v19 = vld [vmem:[%s1344_s2 + $0x18] sm:$0xff] (!%p222_p3)  ;;  %v274_v22 = vld [vmem:[%s1344_s2 + $0x30] sm:$0xff] (!%p222_p3) }
   0xc   : > { %390 = vperm.xlu0 (!%p222_p3), %895, %v262_v3   ;;  %334 = vperm.xlu1 (!%p222_p3), %894, %v261_v4   ;;  %v496_v20 = vld [vmem:[%s1346_s4 + $0x38] sm:$0xff] (!%p222_p3)  ;;  %v273_v21 = vld [vmem:[%s1344_s2 + $0x28] sm:$0xff] (!%p222_p3)  ;;  %v489_v23 = vld [vmem:[%s1346_s4] sm:$0xff] (!%p222_p3) }
   0xd   : > { %v491_v24 = vld [vmem:[%s1346_s4 + $0x10] sm:$0xff] (!%p222_p3)  ;;  %v909_v25 = vld [vmem:[%s1345_s3] sm:$0xff] (!%p222_p3)  }
   0xe   : > { %v910_v26 = vld [vmem:[%s1345_s3 + $0x10] sm:$0xff]   ;;  %v493_v27 = vld [vmem:[%s1346_s4 + $0x20] sm:$0xff]  ;;  %850 = vmatprep.mubr.msk.bf16.mxu0 %vm569_vm0, %v909_v25  ;;  %s249_s13 = scalar_select %p248_p5, %s927_s21, 1 }
   0xf   : > { %854 = vmatprep.mubr.msk.bf16.mxu1 %vm569_vm0, %v910_v26  ;;  %v495_v28 = vld [vmem:[%s1346_s4 + $0x30] sm:$0xff]  ;;  %vm649_vm1 = vcmask (%p256_p4), 7168  }
  0x10   : > { %402 = vperm.xlu0 %895, %v265_v5   ;;  %896 = vset.pattern.permute.xlu1 %v937_v1  ;;  %s821_s14 = sshll.u32 %s249_s13, 2 }
  0x11   : > { %386 = vperm.xlu1 %896, %v261_v4   ;;  %s254_s17 = scalar_lea.vmem %s1342_s0, %s821_s14 }
  0x12   : > { %v276_v42 = vld [vmem:[%s254_s17] sm:$0x7] }
  0x13   : > { %v1093_v44 = vrot.slane %v276_v42, %v363_v40  ;;  %v1095_v46 = vrot.slane %v276_v42, %v319_v41  ;;  %v1099_v51 = vrot.slane %v276_v42, %v415_v45 }
  0x14   : > { %903 = vset.pattern.permute.xlu0 %v938_v2 }
  0x15   : > { %346 = vperm.xlu0 %903, %v264_v6   ;;  %897 = vset.pattern.permute.xlu1 %v939_v7 }
  0x16   : > { %289 = vperm.xlu1 %897, %v262_v3  }
  0x19   : > { %358 = vperm.xlu0 %903, %v267_v8  }
  0x1a   : > { %898 = vset.pattern.permute.xlu1 %v938_v2 }
  0x1b   : > { %338 = vperm.xlu1 %898, %v262_v3  }
  0x1d   : > { %906 = vset.pattern.permute.xlu0 %v939_v7 }
  0x1e   : > { %279 = vperm.xlu0 %906, %v260_v0  }
  0x1f   : > { %342 = vperm.xlu1 %898, %v263_v9  }
  0x22   : > { %284 = vperm.xlu0 %906, %v261_v4  }
  0x23   : > { %899 = vset.pattern.permute.xlu1 %v937_v1 }
  0x24   : > { %394 = vperm.xlu1 %899, %v263_v9  }
  0x26   : > { %294 = vperm.xlu0 %906, %v263_v9  }
  0x28   : > { %900 = vset.pattern.permute.xlu1 %v939_v7 }
  0x29   : > { %435 = vperm.xlu1 %900, %v268_v10  }
  0x2a   : > { %440 = vperm.xlu0 %906, %v269_v11  }
  0x2d   : > { %299 = vperm.xlu1 %900, %v264_v6  }
  0x2e   : > { %309 = vperm.xlu0 %906, %v266_v12  }
  0x31   : > { %304 = vperm.xlu1 %900, %v265_v5  }
  0x32   : > { %455 = vperm.xlu0 %906, %v272_v13  }
  0x35   : > { %901 = vset.pattern.permute.xlu1 %v938_v2 }
  0x36   : > { %350 = vperm.xlu1 %901, %v265_v5   ;;  %470 = vperm.xlu0 %906, %v275_v14  }
  0x3a   : > { %902 = vset.pattern.permute.xlu1 %v937_v1  ;;  %516 = vperm.xlu0 %906, %v490_v15  }
  0x3b   : > { %398 = vperm.xlu1 %902, %v264_v6  }
  0x3e   : > { %526 = vperm.xlu0 %906, %v492_v16  }
  0x3f   : > { %904 = vset.pattern.permute.xlu1 %v939_v7 }
  0x40   : > { %445 = vperm.xlu1 %904, %v270_v17  }
  0x42   : > { %536 = vperm.xlu0 %906, %v494_v18  }
  0x44   : > { %450 = vperm.xlu1 %904, %v271_v19  }
  0x46   : > { %546 = vperm.xlu0 %906, %v496_v20  }
  0x48   : > { %314 = vperm.xlu1 %904, %v267_v8  }
  0x4c   : > { %905 = vset.pattern.permute.xlu1 %v938_v2 }
  0x4d   : > { %354 = vperm.xlu1 %905, %v266_v12  }
  0x51   : > { %907 = vset.pattern.permute.xlu1 %v937_v1 }
  0x52   : > { %406 = vperm.xlu1 %907, %v266_v12  }
  0x56   : > { %410 = vperm.xlu1 %907, %v267_v8  }
  0x5a   : > { %908 = vset.pattern.permute.xlu1 %v939_v7 }
  0x5b   : > { %460 = vperm.xlu1 %908, %v273_v21  }
  0x5f   : > { %465 = vperm.xlu1 %908, %v274_v22  }
  0x63   : > { %511 = vperm.xlu1 %908, %v489_v23  }
  0x67   : > { %521 = vperm.xlu1 %908, %v491_v24  }
  0x6b   : > { %531 = vperm.xlu1 %908, %v493_v27  }
  0x6f   : > { %541 = vperm.xlu1 %908, %v495_v28  }
  0x87   : > { %v331_v29 = vpop.permute.xlu1 %330  ;;  %v383_v30 = vpop.permute.xlu0 %382 }
  0x88   : > { %v365_v50 = vmul.f32 %v1093_v44, %v331_v29  ;;  %v417_v55 = vmul.f32 %v1099_v51, %v383_v30 }
  0x8b   : > { %v335_v31 = vpop.permute.xlu1 %334  ;;  %v391_v32 = vpop.permute.xlu0 %390 }
  0x8c   : > { %v366_v53 = vmul.f32 %v1093_v44, %v335_v31  ;;  %v419_v13 = vmul.f32 %v1099_v51, %v391_v32 }
  0x8f   : > { %v1083_v33 = vpop.permute.xlu0 %402 }
  0x90   : > { %v387_v34 = vpop.permute.xlu1 %386 }
  0x91   : > { %v418_v60 = vmul.f32 %v1099_v51, %v387_v34 }
  0x94   : > { %v1086_v36 = vpop.permute.xlu0 %346 }
  0x95   : > { %v290_v38 = vpop.permute.xlu1 %289  ;;  %v369_v29 = vmul.f32 %v1093_v44, %v1086_v36 }
  0x96   : > { %v323_v10 = vmul.f32 %v1095_v46, %v290_v38 }
  0x98   : > { %v1091_v39 = vpop.permute.xlu0 %358 }
  0x99   : > { %v372_v41 = vmul.f32 %v1093_v44, %v1091_v39 }
  0x9a   : > { %v339_v43 = vpop.permute.xlu1 %338 }
  0x9b   : > { %v367_v9 = vmul.f32 %v1093_v44, %v339_v43 }
  0x9d   : > { %v280_v47 = vpop.permute.xlu0 %279  ;;  %v375_v14 = vadd.f32 %v367_v9, %v323_v10 }
  0x9e   : > { %v343_v48 = vpop.permute.xlu1 %342  ;;  %v321_v49 = vmul.f32 %v1095_v46, %v280_v47 }
  0x9f   : > { %v368_v15 = vmul.f32 %v1093_v44, %v343_v48  ;;  %v427_v19 = vadd.f32 %v419_v13, %v375_v14  ;;  %v422_v48 = vmul.f32 %v1099_v51, %v1083_v33 }
  0xa0   : > { %v373_v56 = vadd.f32 %v365_v50, %v321_v49 }
  0xa1   : > { %v285_v52 = vpop.permute.xlu0 %284 }
  0xa2   : > { %v322_v54 = vmul.f32 %v1095_v46, %v285_v52  ;;  %v425_v61 = vadd.f32 %v417_v55, %v373_v56 }
  0xa3   : > { %v395_v57 = vpop.permute.xlu1 %394 }
  0xa4   : > { %v374_v58 = vadd.f32 %v366_v53, %v322_v54  ;;  %v420_v18 = vmul.f32 %v1099_v51, %v395_v57 }
  0xa5   : > { %v295_v59 = vpop.permute.xlu0 %294 }
  0xa6   : > { %v426_v63 = vadd.f32 %v418_v60, %v374_v58  ;;  %v324_v11 = vmul.f32 %v1095_v46, %v295_v59 }
  0xa8   : > { %v436_v62 = vpop.permute.xlu1 %435  ;;  %v376_v16 = vadd.f32 %v368_v15, %v324_v11 }
  0xa9   : > { %v473_v0 = vadd.f32 %v436_v62, %v425_v61  ;;  %v441_v1 = vpop.permute.xlu0 %440 }
  0xaa   : > { %v474_v2 = vadd.f32 %v441_v1, %v426_v63  ;;  %v428_v21 = vadd.f32 %v420_v18, %v376_v16 }
  0xab   : > { %v497_v3 = vmax.f32 %v473_v0, 0.0 }
  0xac   : > { %v498_v4 = vmax.f32 %v474_v2, 0.0  ;;  %v300_v5 = vpop.permute.xlu1 %299 }
  0xad   : > { %v325_v30 = vmul.f32 %v1095_v46, %v300_v5  ;;  %v310_v31 = vpop.permute.xlu0 %309 }
  0xae   : > { %v505_v6 = vpack.c.bf16 %v498_v4, %v497_v3  ;;  %v327_v52 = vmul.f32 %v1095_v46, %v310_v31  ;;  %v912_v3 = vld [vmem:[%s1345_s3 + $0x18] sm:$0xff]  }
  0xaf   : > { %v377_v37 = vadd.f32 %v369_v29, %v325_v30 }
  0xb0   : > { %v305_v7 = vpop.permute.xlu1 %304  ;;  %842 = vmatprep.subr.bf16.mxu0 %v505_v6  ;;  %858 = vmatprep.subr.bf16.mxu1 %v505_v6 }
  0xb1   : > { %843 = vmatpush3.bf16.msra.mxu0 %v505_v6  ;;  %862 = vmatpush3.bf16.msra.mxu1 %v505_v6  ;;  %v326_v38 = vmul.f32 %v1095_v46, %v305_v7  ;;  %v456_v36 = vpop.permute.xlu0 %455 }
  0xb5   : > { %v351_v8 = vpop.permute.xlu1 %350  ;;  %v471_v59 = vpop.permute.xlu0 %470 }
  0xb6   : > { %v370_v32 = vmul.f32 %v1093_v44, %v351_v8 }
  0xb8   : > { %v378_v42 = vadd.f32 %v370_v32, %v326_v38 }
  0xb9   : > { %v517_v4 = vpop.permute.xlu0 %516 }
  0xba   : > { %v399_v12 = vpop.permute.xlu1 %398  ;;  %v430_v56 = vadd.f32 %v422_v48, %v378_v42 }
  0xbb   : > { %v421_v34 = vmul.f32 %v1099_v51, %v399_v12 }
  0xbd   : > { %v429_v43 = vadd.f32 %v421_v34, %v377_v37  ;;  %v527_v6 = vpop.permute.xlu0 %526 }
  0xbf   : > { %v446_v17 = vpop.permute.xlu1 %445  ;;  %v477_v53 = vadd.f32 %v456_v36, %v429_v43 }
  0xc0   : > { %v475_v20 = vadd.f32 %v446_v17, %v427_v19 }
  0xc1   : > { %v501_v61 = vmax.f32 %v477_v53, 0.0  ;;  %v537_v8 = vpop.permute.xlu0 %536 }
  0xc2   : > { %v499_v24 = vmax.f32 %v475_v20, 0.0 }
  0xc3   : > { %v451_v22 = vpop.permute.xlu1 %450 }
  0xc4   : > { %v476_v23 = vadd.f32 %v451_v22, %v428_v21 }
  0xc5   : > { %v547_v10 = vpop.permute.xlu0 %546 }
  0xc6   : > { %v500_v25 = vmax.f32 %v476_v23, 0.0 }
  0xc7   : > { %v315_v26 = vpop.permute.xlu1 %314 }
  0xc8   : > { %v506_v27 = vpack.c.bf16 %v500_v25, %v499_v24  ;;  %v328_v40 = vmul.f32 %v1095_v46, %v315_v26 }
  0xca   : > { %844 = vmatprep.subr.bf16.mxu0 %v506_v27  ;;  %859 = vmatprep.subr.bf16.mxu1 %v506_v27  ;;  %v380_v49 = vadd.f32 %v372_v41, %v328_v40 }
  0xcb   : > { %845 = vmatpush3.bf16.msra.mxu0 %v506_v27  ;;  %863 = vmatpush3.bf16.msra.mxu1 %v506_v27 }
  0xcc   : > { %v355_v28 = vpop.permute.xlu1 %354 }
  0xcd   : > { %v371_v50 = vmul.f32 %v1093_v44, %v355_v28  ;;  %v940_v28 = vmov (%p256_p4), 0.0  }
  0xce   : > { %650 = vst.msk [vmem:[%s1347_s5] sm:$0xff] (%p256_p4), %vm649_vm1, %v940_v28  ;;  %651 = vst.msk [vmem:[%s1347_s5 + $0x8] sm:$0xff] (%p256_p4), %vm649_vm1, %v940_v28 }
  0xcf   : > { %v379_v57 = vadd.f32 %v371_v50, %v327_v52  ;;  %652 = vst.msk [vmem:[%s1347_s5 + $0x10] sm:$0xff] (%p256_p4), %vm649_vm1, %v940_v28  ;;  %653 = vst.msk [vmem:[%s1347_s5 + $0x18] sm:$0xff] (%p256_p4), %vm649_vm1, %v940_v28 }
  0xd0   : > { %654 = vst.msk [vmem:[%s1347_s5 + $0x20] sm:$0xff] (%p256_p4), %vm649_vm1, %v940_v28  ;;  %655 = vst.msk [vmem:[%s1347_s5 + $0x28] sm:$0xff] (%p256_p4), %vm649_vm1, %v940_v28 }
  0xd1   : > { %v407_v35 = vpop.permute.xlu1 %406  ;;  %656 = vst.msk [vmem:[%s1347_s5 + $0x30] sm:$0xff] (%p256_p4), %vm649_vm1, %v940_v28  ;;  %657 = vst.msk [vmem:[%s1347_s5 + $0x38] sm:$0xff] (%p256_p4), %vm649_vm1, %v940_v28 }
  0xd2   : > { %v423_v54 = vmul.f32 %v1099_v51, %v407_v35  ;;  %658 = vst.msk [vmem:[%s1348_s6] sm:$0xff] (%p256_p4), %vm649_vm1, %v940_v28  ;;  %659 = vst.msk [vmem:[%s1348_s6 + $0x8] sm:$0xff] (%p256_p4), %vm649_vm1, %v940_v28 }
  0xd3   : > { %660 = vst.msk [vmem:[%s1348_s6 + $0x10] sm:$0xff] (%p256_p4), %vm649_vm1, %v940_v28  ;;  %661 = vst.msk [vmem:[%s1348_s6 + $0x18] sm:$0xff] (%p256_p4), %vm649_vm1, %v940_v28 }
  0xd4   : > { %v431_v63 = vadd.f32 %v423_v54, %v379_v57  ;;  %662 = vst.msk [vmem:[%s1348_s6 + $0x20] sm:$0xff] (%p256_p4), %vm649_vm1, %v940_v28  ;;  %663 = vst.msk [vmem:[%s1348_s6 + $0x28] sm:$0xff] (%p256_p4), %vm649_vm1, %v940_v28 }
  0xd5   : > { %v411_v45 = vpop.permute.xlu1 %410  ;;  %664 = vst.msk [vmem:[%s1348_s6 + $0x30] sm:$0xff] (%p256_p4), %vm649_vm1, %v940_v28  ;;  %665 = vst.msk [vmem:[%s1348_s6 + $0x38] sm:$0xff] (%p256_p4), %vm649_vm1, %v940_v28 }
  0xd6   : > { %v424_v47 = vmul.f32 %v1099_v51, %v411_v45  ;;  %v911_v51 = vld [vmem:[%s1345_s3 + $0x8] sm:$0xff]  }
  0xd8   : > { %v432_v55 = vadd.f32 %v424_v47, %v380_v49 }
  0xda   : > { %v461_v39 = vpop.permute.xlu1 %460  ;;  %v480_v60 = vadd.f32 %v471_v59, %v432_v55 }
  0xdb   : > { %v478_v58 = vadd.f32 %v461_v39, %v430_v56 }
  0xdc   : > { %v504_v44 = vmax.f32 %v480_v60, 0.0 }
  0xdd   : > { %v502_v62 = vmax.f32 %v478_v58, 0.0 }
  0xde   : > { %v466_v0 = vpop.permute.xlu1 %465 }
  0xdf   : > { %v507_v33 = vpack.c.bf16 %v502_v62, %v501_v61  ;;  %v479_v1 = vadd.f32 %v466_v0, %v431_v63 }
  0xe1   : > { %v503_v2 = vmax.f32 %v479_v1, 0.0  ;;  %846 = vmatprep.subr.bf16.mxu0 %v507_v33  ;;  %860 = vmatprep.subr.bf16.mxu1 %v507_v33 }
  0xe2   : > { %847 = vmatpush3.bf16.msra.mxu0 %v507_v33  ;;  %864 = vmatpush3.bf16.msra.mxu1 %v507_v33  ;;  %v512_v5 = vpop.permute.xlu1 %511 }
  0xe3   : > { %v508_v46 = vpack.c.bf16 %v504_v44, %v503_v2 }
  0xe5   : > { %848 = vmatprep.subr.bf16.mxu0 %v508_v46  ;;  %861 = vmatprep.subr.bf16.mxu1 %v508_v46 }
  0xe6   : > { %849 = vmatpush3.bf16.msra.mxu0 %v508_v46  ;;  %865 = vmatpush3.bf16.msra.mxu1 %v508_v46  ;;  %v522_v7 = vpop.permute.xlu1 %521 }
  0xe9   : > { %851 = vmatmul.mubr.msk.bf16.vlgmr.msra.gmra.mrb[0].mxu0 %vm569_vm0, %v911_v51  ;;  %855 = vmatmul.mubr.msk.bf16.vlgmr.msra.gmra.mrb[0].mxu1 %vm569_vm0, %v912_v3 }
  0xea   : > { %v532_v9 = vpop.permute.xlu1 %531 }
  0xee   : > { %v542_v11 = vpop.permute.xlu1 %541 }
 0x1ba   : > { %648 = sbr.rel (!%p256_p4) target bundleno = 449 (0x1c1), region = 44 }
 0x1bc   : > { %v852_v12 = vpop.f32.mrb[0].mxu0  ;;  %v856_v13 = vpop.f32.mrb[0].mxu1 }
 0x1bd   : > { %v625_v14 = vadd.f32 %v852_v12, %v522_v7  ;;  %v1134_v15 = vadd.f32 %v856_v13, %v542_v11  ;;  %v616_v16 = vpop.f32.mrb[1].mxu0  ;;  %v632_v17 = vpop.f32.mrb[1].mxu1 }
 0x1be   : > { %v617_v18 = vadd.f32 %v616_v16, %v512_v5  ;;  %v633_v19 = vadd.f32 %v632_v17, %v532_v9  ;;  %v853_v20 = vpop.f32.mrb[2].mxu0  ;;  %v857_v21 = vpop.f32.mrb[2].mxu1 }
 0x1bf   : > { %v628_v22 = vadd.f32 %v853_v20, %v527_v6  ;;  %v644_v23 = vadd.f32 %v857_v21, %v547_v10  ;;  %v619_v24 = vpop.f32.mrb[3].mxu0  ;;  %v635_v25 = vpop.f32.mrb[3].mxu1 }
 0x1c0   : > { %v620_v26 = vadd.f32 %v619_v24, %v517_v4  ;;  %v636_v27 = vadd.f32 %v635_v25, %v537_v8 }
 0x1c1 PF: > { %vm674_vm2 = vcmask 130048   ;;  %v724_v41 = vmul.f32 %v617_v18, %v617_v18  ;;  %v727_v45 = vmul.f32 %v628_v22, %v628_v22  ;;  %v726_v36 = vmul.f32 %v625_v14, %v625_v14  ;;  %v668_v57 = vld [vmem:[%s1347_s5 + $0x10] sm:$0xff]  ;;  %v666_v58 = vld [vmem:[%s1347_s5] sm:$0xff]  ;;  %v669_v63 = vld [vmem:[%s1347_s5 + $0x18] sm:$0xff] }
 0x1c2   : > { %v681_v29 = vsel %vm674_vm2, %v625_v14, 0.0  ;;  %v675_v30 = vsel %vm674_vm2, %v617_v18, 0.0  ;;  %v684_v31 = vsel %vm674_vm2, %v628_v22, 0.0  ;;  %v678_v32 = vsel %vm674_vm2, %v620_v26, 0.0  ;;  %v667_v0 = vld [vmem:[%s1347_s5 + $0x8] sm:$0xff]  ;;  %v670_v51 = vld [vmem:[%s1347_s5 + $0x20] sm:$0xff] }
 0x1c3   : > { %682 = vadd.xlane.f32.xlu1 %v681_v29  ;;  %676 = vadd.xlane.f32.xlu0 %v675_v30  ;;  %v690_v34 = vsel %vm674_vm2, %v636_v27, 0.0  ;;  %v687_v35 = vsel %vm674_vm2, %v633_v19, 0.0  ;;  %v696_v37 = vsel %vm674_vm2, %v644_v23, 0.0  ;;  %v693_v38 = vsel %vm674_vm2, %v1134_v15, 0.0  ;;  %v671_v46 = vld [vmem:[%s1347_s5 + $0x28] sm:$0xff]  ;;  %v673_v7 = vld [vmem:[%s1347_s5 + $0x38] sm:$0xff] }
 0x1c4   : > { %v725_v40 = vmul.f32 %v620_v26, %v620_v26  ;;  %v732_v43 = vsel %vm674_vm2, %v724_v41, 0.0  ;;  %v741_v47 = vsel %vm674_vm2, %v727_v45, 0.0  ;;  %v738_v48 = vsel %vm674_vm2, %v726_v36, 0.0  ;;  %v672_v8 = vld [vmem:[%s1347_s5 + $0x30] sm:$0xff]  ;;  %v717_v13 = vld [vmem:[%s1348_s6 + $0x8] sm:$0xff]  ;;  %v716_v14 = vld [vmem:[%s1348_s6] sm:$0xff] }
 0x1c5   : > { %v729_v49 = vmul.f32 %v636_v27, %v636_v27  ;;  %v728_v50 = vmul.f32 %v633_v19, %v633_v19  ;;  %v731_v54 = vmul.f32 %v644_v23, %v644_v23  ;;  %v730_v55 = vmul.f32 %v1134_v15, %v1134_v15  ;;  %v719_v19 = vld [vmem:[%s1348_s6 + $0x18] sm:$0xff]  ;;  %v718_v20 = vld [vmem:[%s1348_s6 + $0x10] sm:$0xff]  ;;  %v721_v25 = vld [vmem:[%s1348_s6 + $0x28] sm:$0xff] }
 0x1c6   : > { %v735_v42 = vsel %vm674_vm2, %v725_v40, 0.0  ;;  %vm707_vm3 = vcmask 7168   ;;  %v720_v26 = vld [vmem:[%s1348_s6 + $0x20] sm:$0xff] }
 0x1c7   : > { %685 = vadd.xlane.f32.xlu1 %v684_v31  ;;  %679 = vadd.xlane.f32.xlu0 %v678_v32  ;;  %v747_v52 = vsel %vm674_vm2, %v729_v49, 0.0  ;;  %v744_v53 = vsel %vm674_vm2, %v728_v50, 0.0  ;;  %v753_v56 = vsel %vm674_vm2, %v731_v54, 0.0  ;;  %v750_v39 = vsel %vm674_vm2, %v730_v55, 0.0  ;;  %v723_v31 = vld [vmem:[%s1348_s6 + $0x38] sm:$0xff]  ;;  %v722_v32 = vld [vmem:[%s1348_s6 + $0x30] sm:$0xff] }
 0x1cb   : > { %691 = vadd.xlane.f32.xlu1 %v690_v34  ;;  %688 = vadd.xlane.f32.xlu0 %v687_v35 }
 0x1cf   : > { %697 = vadd.xlane.f32.xlu1 %v696_v37  ;;  %694 = vadd.xlane.f32.xlu0 %v693_v38 }
 0x1d3   : > { %736 = vadd.xlane.f32.xlu1 %v735_v42  ;;  %733 = vadd.xlane.f32.xlu0 %v732_v43 }
 0x1d7   : > { %742 = vadd.xlane.f32.xlu1 %v741_v47  ;;  %739 = vadd.xlane.f32.xlu0 %v738_v48 }
 0x1db   : > { %748 = vadd.xlane.f32.xlu1 %v747_v52  ;;  %745 = vadd.xlane.f32.xlu0 %v744_v53 }
 0x1df   : > { %754 = vadd.xlane.f32.xlu1 %v753_v56  ;;  %751 = vadd.xlane.f32.xlu0 %v750_v39 }
 0x250   : > { %v683_v59 = vpop.xlane.xlu1 %682  ;;  %v677_v60 = vpop.xlane.xlu0 %676 }
 0x251   : > { %v701_v61 = vadd.f32 %v683_v59, %v668_v57  ;;  %v699_v62 = vadd.f32 %v677_v60, %v666_v58 }
 0x253   : > { %710 = vst.msk [vmem:[%s1347_s5 + $0x10] sm:$0xff] %vm707_vm3, %v701_v61  ;;  %708 = vst.msk [vmem:[%s1347_s5] sm:$0xff] %vm707_vm3, %v699_v62 }
 0x254   : > { %v686_v33 = vpop.xlane.xlu1 %685  ;;  %v680_v1 = vpop.xlane.xlu0 %679 }
 0x255   : > { %v702_v2 = vadd.f32 %v686_v33, %v669_v63  ;;  %v700_v44 = vadd.f32 %v680_v1, %v667_v0 }
 0x257   : > { %711 = vst.msk [vmem:[%s1347_s5 + $0x18] sm:$0xff] %vm707_vm3, %v702_v2  ;;  %709 = vst.msk [vmem:[%s1347_s5 + $0x8] sm:$0xff] %vm707_vm3, %v700_v44 }
 0x258   : > { %v692_v3 = vpop.xlane.xlu1 %691  ;;  %v689_v4 = vpop.xlane.xlu0 %688 }
 0x259   : > { %v704_v5 = vadd.f32 %v692_v3, %v671_v46  ;;  %v703_v6 = vadd.f32 %v689_v4, %v670_v51 }
 0x25b   : > { %713 = vst.msk [vmem:[%s1347_s5 + $0x28] sm:$0xff] %vm707_vm3, %v704_v5  ;;  %712 = vst.msk [vmem:[%s1347_s5 + $0x20] sm:$0xff] %vm707_vm3, %v703_v6 }
 0x25c   : > { %v698_v9 = vpop.xlane.xlu1 %697  ;;  %v695_v10 = vpop.xlane.xlu0 %694 }
 0x25d   : > { %v706_v11 = vadd.f32 %v698_v9, %v673_v7  ;;  %v705_v12 = vadd.f32 %v695_v10, %v672_v8 }
 0x25f   : > { %715 = vst.msk [vmem:[%s1347_s5 + $0x38] sm:$0xff] %vm707_vm3, %v706_v11  ;;  %714 = vst.msk [vmem:[%s1347_s5 + $0x30] sm:$0xff] %vm707_vm3, %v705_v12 }
 0x260   : > { %v737_v15 = vpop.xlane.xlu1 %736  ;;  %v734_v16 = vpop.xlane.xlu0 %733 }
 0x261   : > { %v757_v17 = vadd.f32 %v737_v15, %v717_v13  ;;  %v756_v18 = vadd.f32 %v734_v16, %v716_v14 }
 0x263   : > { %765 = vst.msk [vmem:[%s1348_s6 + $0x8] sm:$0xff] %vm707_vm3, %v757_v17  ;;  %764 = vst.msk [vmem:[%s1348_s6] sm:$0xff] %vm707_vm3, %v756_v18 }
 0x264   : > { %v743_v21 = vpop.xlane.xlu1 %742  ;;  %v740_v22 = vpop.xlane.xlu0 %739 }
 0x265   : > { %v759_v23 = vadd.f32 %v743_v21, %v719_v19  ;;  %v758_v24 = vadd.f32 %v740_v22, %v718_v20 }
 0x267   : > { %767 = vst.msk [vmem:[%s1348_s6 + $0x18] sm:$0xff] %vm707_vm3, %v759_v23  ;;  %766 = vst.msk [vmem:[%s1348_s6 + $0x10] sm:$0xff] %vm707_vm3, %v758_v24 }
 0x268   : > { %v749_v27 = vpop.xlane.xlu1 %748  ;;  %v746_v28 = vpop.xlane.xlu0 %745 }
 0x269   : > { %v761_v29 = vadd.f32 %v749_v27, %v721_v25  ;;  %v760_v30 = vadd.f32 %v746_v28, %v720_v26 }
 0x26b   : > { %769 = vst.msk [vmem:[%s1348_s6 + $0x28] sm:$0xff] %vm707_vm3, %v761_v29  ;;  %768 = vst.msk [vmem:[%s1348_s6 + $0x20] sm:$0xff] %vm707_vm3, %v760_v30 }
 0x26c   : > { %v755_v34 = vpop.xlane.xlu1 %754  ;;  %v752_v35 = vpop.xlane.xlu0 %751 }
 0x26d   : > { %v763_v37 = vadd.f32 %v755_v34, %v723_v31  ;;  %v762_v38 = vadd.f32 %v752_v35, %v722_v32 }
 0x26f   : > { %771 = vst.msk [vmem:[%s1348_s6 + $0x38] sm:$0xff] %vm707_vm3, %v763_v37  ;;  %770 = vst.msk [vmem:[%s1348_s6 + $0x30] sm:$0xff] %vm707_vm3, %v762_v38 }
 0x270 PF: > { %s17_s23 = sadd.s32 1, %s935_s23   ;;  %s1349_s21 = smov %s931_s22 }
 0x271   : > { %p14_p6 = scmp.ge.s32.totalorder %s17_s23, 4   ;;  %s1350_s22 = smov %s1352_s24 }
 0x273   :  { %16 = sbr.rel (!%p14_p6) target bundleno = 2 (0x2), region = 78 }

// kernel: global_encode.6
= control target key start
LH: loop header
LB: loop body
LE: loop exit
PB: predicated region body
PF: predicated region fallthrough
CT: control target
= control target key end

     0   :  { %s1505_s27 = smov 0   ;;  %s1507_s28 = smov 0   ;;  %s2220_s0 = inlined_call_operand.vmem [shape: f32[2,3,16], index: 0, kind: input, shape index: {}]   ;;  %s2221_s1 = inlined_call_operand.vmem [shape: f32[64,3], index: 1, kind: input, shape index: {}]   ;;  %s2222_s2 = inlined_call_operand.vmem [shape: f32[64,1], index: 2, kind: input, shape index: {}]   ;;  %s2223_s3 = inlined_call_operand.vmem [shape: bf16[64,64], index: 3, kind: input, shape index: {}]   ;;  %s2224_s4 = inlined_call_operand.vmem [shape: f32[64,1], index: 4, kind: input, shape index: {}]   ;;  %s2225_s5 = inlined_call_operand.vmem [shape: bf16[128,64], index: 5, kind: input, shape index: {}]   ;;  %s2226_s6 = inlined_call_operand.vmem [shape: f32[128,1], index: 6, kind: input, shape index: {}]   ;;  %s2227_s7 = inlined_call_operand.vmem [shape: f32[128,1], index: 7, kind: output, shape index: {0}]   ;;  %s2228_s8 = inlined_call_operand.vmem [shape: f32[128,1], index: 8, kind: output, shape index: {1}]  }
   0x1   :  { %s1509_s29 = smov 0  }
   0x2 LB: > { %s31_s30 = sadd.s32 1, %s1450_s28  ;;  %p1279_p0 = scmp.ge.s32.totalorder %s1454_s29, 1  ;;  %s1454_s29 = sphi %s1509_s29, %s19_s29   ;;  %s1450_s28 = sphi %s1507_s28, %s2230_s28   ;;  %s1446_s27 = sphi %s1505_s27, %s2229_s27  }
   0x3   : > { %p33_p1 = scmp.ge.s32.totalorder %s31_s30, 2  ;;  %p271_p2 = scmp.lt.s32.totalorder %s1454_s29, 3 }
   0x5   : > { %s2232_s30 = smov (%p33_p1, %s31_s30), 0  ;;  %p272_p3 = pnand %p1279_p0, %p271_p2 }
   0x6   : > { %v314_v0 = vld [vmem:[%s2221_s1] sm:$0xff] (!%p272_p3)  ;;  %v1456_v1 = vmov (!%p272_p3), 2   ;;  %v1457_v2 = vmov (!%p272_p3), 1   ;;  %v316_v3 = vld [vmem:[%s2221_s1 + $0x10] sm:$0xff] (!%p272_p3)  ;;  %v315_v4 = vld [vmem:[%s2221_s1 + $0x8] sm:$0xff] (!%p272_p3)  ;;  %v1458_v8 = vmov (!%p272_p3), 0   ;;  %v371_v50 = vlaneseq (!%p272_p3) }
   0x7   : > { %275 = sbr.rel (%p272_p3) target bundleno = 909 (0x38d), region = 48  ;;  %1406 = vset.pattern.permute.xlu0 (!%p272_p3), %v1456_v1  ;;  %1405 = vset.pattern.permute.xlu1 (!%p272_p3), %v1457_v2  ;;  %v319_v5 = vld [vmem:[%s2221_s1 + $0x28] sm:$0xff] (!%p272_p3)  ;;  %v318_v6 = vld [vmem:[%s2221_s1 + $0x20] sm:$0xff] (!%p272_p3)  ;;  %v321_v7 = vld [vmem:[%s2221_s1 + $0x38] sm:$0xff] (!%p272_p3)  ;;  %p310_p4 = scmp.eq.s32.totalorder (!%p272_p3), %s1446_s27, 0  ;;  %vm623_vm0 = vcmask (!%p272_p3), 523264  }
   0x8   : > { %436 = vperm.xlu0 (!%p272_p3), %1406, %v314_v0   ;;  %384 = vperm.xlu1 (!%p272_p3), %1405, %v314_v0   ;;  %v317_v9 = vld [vmem:[%s2221_s1 + $0x18] sm:$0xff] (!%p272_p3)  ;;  %v322_v10 = vld [vmem:[%s2222_s2] sm:$0xff] (!%p272_p3)  ;;  %v323_v11 = vld [vmem:[%s2222_s2 + $0x8] sm:$0xff] (!%p272_p3)  ;;  %p302_p5 = scmp.lt.s32.totalorder (!%p272_p3), %s1446_s27, 1  ;;  %v372_v52 = vshrl.u32 (!%p272_p3), %v371_v50, 7 }
   0x9   : > { %v320_v12 = vld [vmem:[%s2221_s1 + $0x30] sm:$0xff] (!%p272_p3)  ;;  %v326_v13 = vld [vmem:[%s2222_s2 + $0x20] sm:$0xff] (!%p272_p3)  ;;  %v329_v14 = vld [vmem:[%s2222_s2 + $0x38] sm:$0xff] (!%p272_p3) }
   0xa   : > { %v544_v15 = vld [vmem:[%s2224_s4 + $0x8] sm:$0xff] (!%p272_p3)  ;;  %v546_v16 = vld [vmem:[%s2224_s4 + $0x18] sm:$0xff] (!%p272_p3)  ;;  %v324_v17 = vld [vmem:[%s2222_s2 + $0x10] sm:$0xff] (!%p272_p3)  ;;  %v417_v55 = vsub.s32 (!%p272_p3), 1, %v372_v52  ;;  %v373_v56 = vsub.s32 (!%p272_p3), 0, %v372_v52  ;;  %v469_v60 = vsub.s32 (!%p272_p3), 2, %v372_v52 }
   0xb   : > { %v548_v18 = vld [vmem:[%s2224_s4 + $0x28] sm:$0xff] (!%p272_p3)  ;;  %v325_v19 = vld [vmem:[%s2222_s2 + $0x18] sm:$0xff] (!%p272_p3)  ;;  %v328_v28 = vld [vmem:[%s2222_s2 + $0x30] sm:$0xff] (!%p272_p3) }
   0xc   : > { %444 = vperm.xlu0 (!%p272_p3), %1406, %v316_v3   ;;  %388 = vperm.xlu1 (!%p272_p3), %1405, %v315_v4   ;;  %v550_v20 = vld [vmem:[%s2224_s4 + $0x38] sm:$0xff] (!%p272_p3)  ;;  %v718_v21 = vld [vmem:[%s2226_s6 + $0x8] sm:$0xff] (!%p272_p3)  ;;  %v543_v30 = vld [vmem:[%s2224_s4] sm:$0xff] (!%p272_p3) }
   0xd   : > { %v720_v22 = vld [vmem:[%s2226_s6 + $0x18] sm:$0xff] (!%p272_p3)  ;;  %v722_v23 = vld [vmem:[%s2226_s6 + $0x28] sm:$0xff] (!%p272_p3)  ;;  %v545_v32 = vld [vmem:[%s2224_s4 + $0x10] sm:$0xff] (!%p272_p3) }
   0xe   : > { %v724_v24 = vld [vmem:[%s2226_s6 + $0x38] sm:$0xff]  ;;  %v726_v25 = vld [vmem:[%s2226_s6 + $0x48] sm:$0xff]  ;;  %v1420_v33 = vld [vmem:[%s2223_s3] sm:$0xff]   ;;  %s303_s19 = scalar_select %p302_p5, %s1446_s27, 1 }
   0xf   : > { %v327_v26 = vld [vmem:[%s2222_s2 + $0x28] sm:$0xff]  ;;  %v728_v27 = vld [vmem:[%s2226_s6 + $0x58] sm:$0xff]  ;;  %v547_v34 = vld [vmem:[%s2224_s4 + $0x20] sm:$0xff]  ;;  %1337 = vmatprep.mubr.msk.bf16.mxu0 %vm623_vm0, %v1420_v33  ;;  %vm988_vm1 = vcmask (%p310_p4), 7168  }
  0x10   : > { %456 = vperm.xlu0 %1406, %v319_v5   ;;  %1407 = vset.pattern.permute.xlu1 %v1456_v1  ;;  %v730_v29 = vld [vmem:[%s2226_s6 + $0x68] sm:$0xff]  ;;  %v732_v31 = vld [vmem:[%s2226_s6 + $0x78] sm:$0xff]  ;;  %v549_v35 = vld [vmem:[%s2224_s4 + $0x30] sm:$0xff]  ;;  %s1280_s20 = sshll.u32 %s303_s19, 2 }
  0x11   : > { %440 = vperm.xlu1 %1407, %v315_v4   ;;  %v717_v36 = vld [vmem:[%s2226_s6] sm:$0xff]  ;;  %v719_v37 = vld [vmem:[%s2226_s6 + $0x10] sm:$0xff]  ;;  %s308_s23 = scalar_lea.vmem %s2220_s0, %s1280_s20 }
  0x12   : > { %v721_v38 = vld [vmem:[%s2226_s6 + $0x20] sm:$0xff]  ;;  %v723_v39 = vld [vmem:[%s2226_s6 + $0x30] sm:$0xff] }
  0x13   : > { %v725_v40 = vld [vmem:[%s2226_s6 + $0x40] sm:$0xff]  ;;  %v727_v41 = vld [vmem:[%s2226_s6 + $0x50] sm:$0xff] }
  0x14   : > { %1414 = vset.pattern.permute.xlu0 %v1457_v2  ;;  %v729_v44 = vld [vmem:[%s2226_s6 + $0x60] sm:$0xff]  ;;  %v731_v47 = vld [vmem:[%s2226_s6 + $0x70] sm:$0xff] }
  0x15   : > { %400 = vperm.xlu0 %1414, %v318_v6   ;;  %1408 = vset.pattern.permute.xlu1 %v1458_v8  ;;  %v330_v57 = vld [vmem:[%s308_s23] sm:$0x7] }
  0x16   : > { %343 = vperm.xlu1 %1408, %v316_v3   ;;  %v1669_v59 = vrot.slane %v330_v57, %v417_v55  ;;  %v1671_v61 = vrot.slane %v330_v57, %v373_v56 }
  0x19   : > { %412 = vperm.xlu0 %1414, %v321_v7  }
  0x1a   : > { %1409 = vset.pattern.permute.xlu1 %v1457_v2 }
  0x1b   : > { %392 = vperm.xlu1 %1409, %v316_v3  }
  0x1d   : > { %1417 = vset.pattern.permute.xlu0 %v1458_v8 }
  0x1e   : > { %333 = vperm.xlu0 %1417, %v314_v0  }
  0x1f   : > { %396 = vperm.xlu1 %1409, %v317_v9  }
  0x22   : > { %338 = vperm.xlu0 %1417, %v315_v4  }
  0x23   : > { %1410 = vset.pattern.permute.xlu1 %v1456_v1 }
  0x24   : > { %448 = vperm.xlu1 %1410, %v317_v9  }
  0x26   : > { %348 = vperm.xlu0 %1417, %v317_v9  }
  0x28   : > { %1411 = vset.pattern.permute.xlu1 %v1458_v8 }
  0x29   : > { %489 = vperm.xlu1 %1411, %v322_v10  }
  0x2a   : > { %494 = vperm.xlu0 %1417, %v323_v11  }
  0x2d   : > { %353 = vperm.xlu1 %1411, %v318_v6  }
  0x2e   : > { %363 = vperm.xlu0 %1417, %v320_v12  }
  0x31   : > { %358 = vperm.xlu1 %1411, %v319_v5  }
  0x32   : > { %509 = vperm.xlu0 %1417, %v326_v13  }
  0x35   : > { %1412 = vset.pattern.permute.xlu1 %v1457_v2 }
  0x36   : > { %524 = vperm.xlu0 %1417, %v329_v14   ;;  %404 = vperm.xlu1 %1412, %v319_v5  }
  0x3a   : > { %570 = vperm.xlu0 %1417, %v544_v15   ;;  %1413 = vset.pattern.permute.xlu1 %v1456_v1 }
  0x3b   : > { %452 = vperm.xlu1 %1413, %v318_v6  }
  0x3e   : > { %580 = vperm.xlu0 %1417, %v546_v16  }
  0x3f   : > { %1415 = vset.pattern.permute.xlu1 %v1458_v8 }
  0x40   : > { %499 = vperm.xlu1 %1415, %v324_v17  }
  0x42   : > { %590 = vperm.xlu0 %1417, %v548_v18  }
  0x44   : > { %504 = vperm.xlu1 %1415, %v325_v19  }
  0x46   : > { %600 = vperm.xlu0 %1417, %v550_v20  }
  0x48   : > { %368 = vperm.xlu1 %1415, %v321_v7  }
  0x4a   : > { %752 = vperm.xlu0 %1417, %v718_v21  }
  0x4c   : > { %1416 = vset.pattern.permute.xlu1 %v1457_v2  ;;  %v1675_v2 = vrot.slane %v330_v57, %v469_v60 }
  0x4d   : > { %408 = vperm.xlu1 %1416, %v320_v12  }
  0x4e   : > { %762 = vperm.xlu0 %1417, %v720_v22  }
  0x51   : > { %1418 = vset.pattern.permute.xlu1 %v1456_v1 }
  0x52   : > { %772 = vperm.xlu0 %1417, %v722_v23   ;;  %460 = vperm.xlu1 %1418, %v320_v12  }
  0x56   : > { %782 = vperm.xlu0 %1417, %v724_v24   ;;  %464 = vperm.xlu1 %1418, %v321_v7  }
  0x5a   : > { %792 = vperm.xlu0 %1417, %v726_v25   ;;  %1419 = vset.pattern.permute.xlu1 %v1458_v8 }
  0x5b   : > { %514 = vperm.xlu1 %1419, %v327_v26  }
  0x5e   : > { %802 = vperm.xlu0 %1417, %v728_v27  }
  0x5f   : > { %519 = vperm.xlu1 %1419, %v328_v28  }
  0x62   : > { %812 = vperm.xlu0 %1417, %v730_v29  }
  0x63   : > { %565 = vperm.xlu1 %1419, %v543_v30  }
  0x66   : > { %822 = vperm.xlu0 %1417, %v732_v31  }
  0x67   : > { %575 = vperm.xlu1 %1419, %v545_v32  }
  0x6b   : > { %585 = vperm.xlu1 %1419, %v547_v34  }
  0x6f   : > { %595 = vperm.xlu1 %1419, %v549_v35  }
  0x73   : > { %747 = vperm.xlu1 %1419, %v717_v36  }
  0x77   : > { %757 = vperm.xlu1 %1419, %v719_v37  }
  0x7b   : > { %767 = vperm.xlu1 %1419, %v721_v38  }
  0x7f   : > { %777 = vperm.xlu1 %1419, %v723_v39  }
  0x83   : > { %787 = vperm.xlu1 %1419, %v725_v40  }
  0x87   : > { %797 = vperm.xlu1 %1419, %v727_v41   ;;  %v385_v42 = vpop.permute.xlu1 %384  ;;  %v437_v43 = vpop.permute.xlu0 %436 }
  0x88   : > { %v419_v1 = vmul.f32 %v1669_v59, %v385_v42  ;;  %v471_v6 = vmul.f32 %v1675_v2, %v437_v43 }
  0x8b   : > { %807 = vperm.xlu1 %1419, %v729_v44   ;;  %v389_v45 = vpop.permute.xlu1 %388  ;;  %v445_v46 = vpop.permute.xlu0 %444 }
  0x8c   : > { %v420_v4 = vmul.f32 %v1669_v59, %v389_v45  ;;  %v473_v28 = vmul.f32 %v1675_v2, %v445_v46 }
  0x8f   : > { %817 = vperm.xlu1 %1419, %v731_v47   ;;  %v1661_v48 = vpop.permute.xlu0 %456 }
  0x90   : > { %v441_v49 = vpop.permute.xlu1 %440 }
  0x91   : > { %v472_v11 = vmul.f32 %v1675_v2, %v441_v49 }
  0x94   : > { %v401_v51 = vpop.permute.xlu0 %400 }
  0x95   : > { %v344_v53 = vpop.permute.xlu1 %343  ;;  %v423_v44 = vmul.f32 %v1669_v59, %v401_v51 }
  0x96   : > { %v377_v25 = vmul.f32 %v1671_v61, %v344_v53 }
  0x98   : > { %v1667_v54 = vpop.permute.xlu0 %412 }
  0x99   : > { %v426_v56 = vmul.f32 %v1669_v59, %v1667_v54 }
  0x9a   : > { %v393_v58 = vpop.permute.xlu1 %392 }
  0x9b   : > { %v421_v24 = vmul.f32 %v1669_v59, %v393_v58 }
  0x9d   : > { %v334_v62 = vpop.permute.xlu0 %333  ;;  %v429_v29 = vadd.f32 %v421_v24, %v377_v25 }
  0x9e   : > { %v397_v63 = vpop.permute.xlu1 %396  ;;  %v375_v0 = vmul.f32 %v1671_v61, %v334_v62 }
  0x9f   : > { %v422_v30 = vmul.f32 %v1669_v59, %v397_v63  ;;  %v481_v34 = vadd.f32 %v473_v28, %v429_v29  ;;  %v476_v63 = vmul.f32 %v1675_v2, %v1661_v48 }
  0xa0   : > { %v427_v7 = vadd.f32 %v419_v1, %v375_v0 }
  0xa1   : > { %v339_v3 = vpop.permute.xlu0 %338 }
  0xa2   : > { %v376_v5 = vmul.f32 %v1671_v61, %v339_v3  ;;  %v479_v12 = vadd.f32 %v471_v6, %v427_v7 }
  0xa3   : > { %v449_v8 = vpop.permute.xlu1 %448 }
  0xa4   : > { %v428_v9 = vadd.f32 %v420_v4, %v376_v5  ;;  %v474_v33 = vmul.f32 %v1675_v2, %v449_v8 }
  0xa5   : > { %v349_v10 = vpop.permute.xlu0 %348 }
  0xa6   : > { %v480_v14 = vadd.f32 %v472_v11, %v428_v9  ;;  %v378_v26 = vmul.f32 %v1671_v61, %v349_v10 }
  0xa8   : > { %v490_v13 = vpop.permute.xlu1 %489  ;;  %v430_v31 = vadd.f32 %v422_v30, %v378_v26 }
  0xa9   : > { %v527_v15 = vadd.f32 %v490_v13, %v479_v12  ;;  %v495_v16 = vpop.permute.xlu0 %494 }
  0xaa   : > { %v528_v17 = vadd.f32 %v495_v16, %v480_v14  ;;  %v482_v36 = vadd.f32 %v474_v33, %v430_v31 }
  0xab   : > { %v551_v18 = vmax.f32 %v527_v15, 0.0 }
  0xac   : > { %v552_v19 = vmax.f32 %v528_v17, 0.0  ;;  %v354_v20 = vpop.permute.xlu1 %353 }
  0xad   : > { %v379_v45 = vmul.f32 %v1671_v61, %v354_v20  ;;  %v364_v46 = vpop.permute.xlu0 %363  ;;  %v1424_v20 = vld [vmem:[%s2225_s5] sm:$0xff]  }
  0xae   : > { %v559_v21 = vpack.c.bf16 %v552_v19, %v551_v18  ;;  %v381_v3 = vmul.f32 %v1671_v61, %v364_v46  ;;  %v1422_v18 = vld [vmem:[%s2223_s3 + $0x10] sm:$0xff]   ;;  %v1423_v19 = vld [vmem:[%s2223_s3 + $0x18] sm:$0xff]  }
  0xaf   : > { %v431_v52 = vadd.f32 %v423_v44, %v379_v45 }
  0xb0   : > { %v359_v22 = vpop.permute.xlu1 %358  ;;  %1329 = vmatprep.subr.bf16.mxu0 %v559_v21 }
  0xb1   : > { %1330 = vmatpush3.bf16.msra.mxu0 %v559_v21  ;;  %v380_v53 = vmul.f32 %v1671_v61, %v359_v22  ;;  %v510_v51 = vpop.permute.xlu0 %509  ;;  %v1425_v21 = vld [vmem:[%s2225_s5 + $0x10] sm:$0xff]  }
  0xb2   : > { %1357 = vmatprep.mubr.msk.bf16.mxu1 %vm623_vm0, %v1425_v21 }
  0xb5   : > { %v405_v23 = vpop.permute.xlu1 %404  ;;  %v525_v10 = vpop.permute.xlu0 %524 }
  0xb6   : > { %v424_v47 = vmul.f32 %v1669_v59, %v405_v23 }
  0xb8   : > { %v432_v57 = vadd.f32 %v424_v47, %v380_v53 }
  0xb9   : > { %v571_v23 = vpop.permute.xlu0 %570 }
  0xba   : > { %v453_v27 = vpop.permute.xlu1 %452  ;;  %v484_v7 = vadd.f32 %v476_v63, %v432_v57  ;;  %v1427_v63 = vld [vmem:[%s2225_s5 + $0x18] sm:$0xff]  }
  0xbb   : > { %v475_v49 = vmul.f32 %v1675_v2, %v453_v27 }
  0xbd   : > { %v483_v58 = vadd.f32 %v475_v49, %v431_v52  ;;  %v581_v25 = vpop.permute.xlu0 %580 }
  0xbf   : > { %v500_v32 = vpop.permute.xlu1 %499  ;;  %v531_v4 = vadd.f32 %v510_v51, %v483_v58 }
  0xc0   : > { %v529_v35 = vadd.f32 %v500_v32, %v481_v34 }
  0xc1   : > { %v555_v12 = vmax.f32 %v531_v4, 0.0  ;;  %v591_v34 = vpop.permute.xlu0 %590  ;;  %v1431_v4 = vld [vmem:[%s2225_s5 + $0x38] sm:$0xff]  }
  0xc2   : > { %v553_v39 = vmax.f32 %v529_v35, 0.0 }
  0xc3   : > { %v505_v37 = vpop.permute.xlu1 %504 }
  0xc4   : > { %v530_v38 = vadd.f32 %v505_v37, %v482_v36 }
  0xc5   : > { %v601_v46 = vpop.permute.xlu0 %600 }
  0xc6   : > { %v554_v40 = vmax.f32 %v530_v38, 0.0 }
  0xc7   : > { %v369_v41 = vpop.permute.xlu1 %368 }
  0xc8   : > { %v560_v42 = vpack.c.bf16 %v554_v40, %v553_v39  ;;  %v382_v55 = vmul.f32 %v1671_v61, %v369_v41 }
  0xca   : > { %1331 = vmatprep.subr.bf16.mxu0 %v560_v42  ;;  %v434_v0 = vadd.f32 %v426_v56, %v382_v55 }
  0xcb   : > { %1332 = vmatpush3.bf16.msra.mxu0 %v560_v42 }
  0xcc   : > { %v409_v43 = vpop.permute.xlu1 %408 }
  0xcd   : > { %v425_v1 = vmul.f32 %v1669_v59, %v409_v43 }
  0xcf   : > { %v433_v8 = vadd.f32 %v425_v1, %v381_v3  ;;  %v1429_v1 = vld [vmem:[%s2225_s5 + $0x28] sm:$0xff]   ;;  %v1430_v3 = vld [vmem:[%s2225_s5 + $0x30] sm:$0xff]  }
  0xd1   : > { %v461_v50 = vpop.permute.xlu1 %460 }
  0xd2   : > { %v477_v5 = vmul.f32 %v1675_v2, %v461_v50 }
  0xd4   : > { %v485_v14 = vadd.f32 %v477_v5, %v433_v8 }
  0xd5   : > { %v465_v60 = vpop.permute.xlu1 %464 }
  0xd6   : > { %v478_v62 = vmul.f32 %v1675_v2, %v465_v60  ;;  %v1421_v2 = vld [vmem:[%s2223_s3 + $0x8] sm:$0xff]  }
  0xd8   : > { %v486_v6 = vadd.f32 %v478_v62, %v434_v0  ;;  %v1426_v62 = vld [vmem:[%s2225_s5 + $0x8] sm:$0xff]   ;;  %v1428_v0 = vld [vmem:[%s2225_s5 + $0x20] sm:$0xff]  }
  0xda   : > { %v515_v54 = vpop.permute.xlu1 %514  ;;  %v534_v11 = vadd.f32 %v525_v10, %v486_v6  ;;  %v753_v6 = vpop.permute.xlu0 %752 }
  0xdb   : > { %v532_v9 = vadd.f32 %v515_v54, %v484_v7 }
  0xdc   : > { %v558_v59 = vmax.f32 %v534_v11, 0.0 }
  0xdd   : > { %v556_v13 = vmax.f32 %v532_v9, 0.0 }
  0xde   : > { %v520_v15 = vpop.permute.xlu1 %519  ;;  %v763_v54 = vpop.permute.xlu0 %762 }
  0xdf   : > { %v561_v48 = vpack.c.bf16 %v556_v13, %v555_v12  ;;  %v533_v16 = vadd.f32 %v520_v15, %v485_v14 }
  0xe1   : > { %v557_v17 = vmax.f32 %v533_v16, 0.0  ;;  %1333 = vmatprep.subr.bf16.mxu0 %v561_v48 }
  0xe2   : > { %1334 = vmatpush3.bf16.msra.mxu0 %v561_v48  ;;  %v566_v22 = vpop.permute.xlu1 %565  ;;  %v773_v9 = vpop.permute.xlu0 %772 }
  0xe3   : > { %v562_v61 = vpack.c.bf16 %v558_v59, %v557_v17 }
  0xe5   : > { %1335 = vmatprep.subr.bf16.mxu0 %v562_v61 }
  0xe6   : > { %1336 = vmatpush3.bf16.msra.mxu0 %v562_v61  ;;  %v576_v24 = vpop.permute.xlu1 %575  ;;  %v783_v11 = vpop.permute.xlu0 %782 }
  0xe9   : > { %1338 = vmatmul.mubr.msk.bf16.vlgmr.msra.gmra.mrb[0].mxu0 %vm623_vm0, %v1421_v2 }
  0xea   : > { %1341 = vmatprep.mubr.msk.bf16.mxu0 %vm623_vm0, %v1422_v18  ;;  %v586_v29 = vpop.permute.xlu1 %585  ;;  %v793_v13 = vpop.permute.xlu0 %792 }
  0xee   : > { %v596_v41 = vpop.permute.xlu1 %595 }
  0xf1   : > { %1342 = vmatmul.mubr.msk.bf16.gmra.mrb[4].mxu0 %vm623_vm0, %v1423_v19 }
  0xf2   : > { %1353 = vmatprep.mubr.msk.bf16.mxu0 %vm623_vm0, %v1424_v20  ;;  %v748_v5 = vpop.permute.xlu1 %747 }
  0xf6   : > { %v758_v7 = vpop.permute.xlu1 %757 }
  0xfa   : > { %v768_v8 = vpop.permute.xlu1 %767 }
  0xfe   : > { %v778_v10 = vpop.permute.xlu1 %777 }
 0x102   : > { %v788_v12 = vpop.permute.xlu1 %787 }
 0x1bc   : > { %v1339_v26 = vpop.f32.mrb[0].mxu0 }
 0x1bd   : > { %v679_v27 = vadd.f32 %v1339_v26, %v576_v24  ;;  %v670_v28 = vpop.f32.mrb[1].mxu0  ;;  %v798_v24 = vpop.permute.xlu1 %797 }
 0x1be   : > { %v671_v30 = vadd.f32 %v670_v28, %v566_v22  ;;  %v1340_v31 = vpop.f32.mrb[2].mxu0 }
 0x1bf   : > { %v682_v32 = vadd.f32 %v1340_v31, %v581_v25  ;;  %v673_v33 = vpop.f32.mrb[3].mxu0  ;;  %v735_v36 = vmax.f32 %v679_v27, 0.0  ;;  %v803_v27 = vpop.permute.xlu0 %802 }
 0x1c0   : > { %v674_v35 = vadd.f32 %v673_v33, %v571_v23  ;;  %v733_v38 = vmax.f32 %v671_v30, 0.0 }
 0x1c1   : > { %v736_v37 = vmax.f32 %v682_v32, 0.0  ;;  %v808_v31 = vpop.permute.xlu1 %807 }
 0x1c2   : > { %v734_v39 = vmax.f32 %v674_v35, 0.0 }
 0x1c3   : > { %v742_v40 = vpack.c.bf16 %v736_v37, %v735_v36  ;;  %v813_v36 = vpop.permute.xlu0 %812 }
 0x1c4   : > { %v741_v42 = vpack.c.bf16 %v734_v39, %v733_v38  ;;  %v1343_v43 = vpop.f32.mrb[4].mxu0 }
 0x1c5   : > { %v695_v44 = vadd.f32 %v1343_v43, %v596_v41  ;;  %v686_v45 = vpop.f32.mrb[5].mxu0  ;;  %v818_v38 = vpop.permute.xlu1 %817 }
 0x1c6   : > { %v687_v47 = vadd.f32 %v686_v45, %v586_v29  ;;  %v1344_v49 = vpop.f32.mrb[6].mxu0  ;;  %1345 = vmatprep.subr.bf16.mxu0 %v741_v42  ;;  %1369 = vmatprep.subr.bf16.mxu1 %v741_v42 }
 0x1c7   : > { %v698_v50 = vadd.f32 %v1344_v49, %v601_v46  ;;  %v689_v52 = vpop.f32.mrb[7].mxu0  ;;  %1346 = vmatpush3.bf16.msra.mxu0 %v741_v42  ;;  %1373 = vmatpush3.bf16.msra.mxu1 %v741_v42  ;;  %v739_v55 = vmax.f32 %v695_v44, 0.0  ;;  %v823_v42 = vpop.permute.xlu0 %822  ;;  %v1459_v49 = vmov (%p310_p4), 0.0  }
 0x1c8   : > { %v690_v53 = vadd.f32 %v689_v52, %v591_v34  ;;  %1347 = vmatprep.subr.bf16.mxu0 %v742_v40  ;;  %1370 = vmatprep.subr.bf16.mxu1 %v742_v40  ;;  %v737_v57 = vmax.f32 %v687_v47, 0.0  ;;  %989 = vst.msk [vmem:[%s2227_s7] sm:$0xff] (%p310_p4), %vm988_vm1, %v1459_v49  ;;  %990 = vst.msk [vmem:[%s2227_s7 + $0x8] sm:$0xff] (%p310_p4), %vm988_vm1, %v1459_v49 }
 0x1c9   : > { %v740_v56 = vmax.f32 %v698_v50, 0.0  ;;  %991 = vst.msk [vmem:[%s2227_s7 + $0x10] sm:$0xff] (%p310_p4), %vm988_vm1, %v1459_v49  ;;  %992 = vst.msk [vmem:[%s2227_s7 + $0x18] sm:$0xff] (%p310_p4), %vm988_vm1, %v1459_v49 }
 0x1ca   : > { %v738_v58 = vmax.f32 %v690_v53, 0.0  ;;  %993 = vst.msk [vmem:[%s2227_s7 + $0x20] sm:$0xff] (%p310_p4), %vm988_vm1, %v1459_v49  ;;  %994 = vst.msk [vmem:[%s2227_s7 + $0x28] sm:$0xff] (%p310_p4), %vm988_vm1, %v1459_v49 }
 0x1cb   : > { %v744_v60 = vpack.c.bf16 %v740_v56, %v739_v55  ;;  %1348 = vmatpush3.bf16.msra.mxu0 %v742_v40  ;;  %1374 = vmatpush3.bf16.msra.mxu1 %v742_v40  ;;  %995 = vst.msk [vmem:[%s2227_s7 + $0x30] sm:$0xff] (%p310_p4), %vm988_vm1, %v1459_v49  ;;  %996 = vst.msk [vmem:[%s2227_s7 + $0x38] sm:$0xff] (%p310_p4), %vm988_vm1, %v1459_v49 }
 0x1cc   : > { %v743_v51 = vpack.c.bf16 %v738_v58, %v737_v57  ;;  %997 = vst.msk [vmem:[%s2227_s7 + $0x40] sm:$0xff] (%p310_p4), %vm988_vm1, %v1459_v49  ;;  %998 = vst.msk [vmem:[%s2227_s7 + $0x48] sm:$0xff] (%p310_p4), %vm988_vm1, %v1459_v49 }
 0x1cd   : > { %999 = vst.msk [vmem:[%s2227_s7 + $0x50] sm:$0xff] (%p310_p4), %vm988_vm1, %v1459_v49  ;;  %1000 = vst.msk [vmem:[%s2227_s7 + $0x58] sm:$0xff] (%p310_p4), %vm988_vm1, %v1459_v49 }
 0x1ce   : > { %1349 = vmatprep.subr.bf16.mxu0 %v743_v51  ;;  %1371 = vmatprep.subr.bf16.mxu1 %v743_v51  ;;  %1001 = vst.msk [vmem:[%s2227_s7 + $0x60] sm:$0xff] (%p310_p4), %vm988_vm1, %v1459_v49  ;;  %1002 = vst.msk [vmem:[%s2227_s7 + $0x68] sm:$0xff] (%p310_p4), %vm988_vm1, %v1459_v49 }
 0x1cf   : > { %1350 = vmatpush3.bf16.msra.mxu0 %v743_v51  ;;  %1375 = vmatpush3.bf16.msra.mxu1 %v743_v51  ;;  %1003 = vst.msk [vmem:[%s2227_s7 + $0x70] sm:$0xff] (%p310_p4), %vm988_vm1, %v1459_v49  ;;  %1004 = vst.msk [vmem:[%s2227_s7 + $0x78] sm:$0xff] (%p310_p4), %vm988_vm1, %v1459_v49 }
 0x1d0   : > { %1351 = vmatprep.subr.bf16.mxu0 %v744_v60  ;;  %1372 = vmatprep.subr.bf16.mxu1 %v744_v60  ;;  %1005 = vst.msk [vmem:[%s2228_s8] sm:$0xff] (%p310_p4), %vm988_vm1, %v1459_v49  ;;  %1006 = vst.msk [vmem:[%s2228_s8 + $0x8] sm:$0xff] (%p310_p4), %vm988_vm1, %v1459_v49 }
 0x1d1   : > { %1007 = vst.msk [vmem:[%s2228_s8 + $0x10] sm:$0xff] (%p310_p4), %vm988_vm1, %v1459_v49  ;;  %1008 = vst.msk [vmem:[%s2228_s8 + $0x18] sm:$0xff] (%p310_p4), %vm988_vm1, %v1459_v49 }
 0x1d2   : > { %1009 = vst.msk [vmem:[%s2228_s8 + $0x20] sm:$0xff] (%p310_p4), %vm988_vm1, %v1459_v49  ;;  %1010 = vst.msk [vmem:[%s2228_s8 + $0x28] sm:$0xff] (%p310_p4), %vm988_vm1, %v1459_v49 }
 0x1d3   : > { %1352 = vmatpush3.bf16.msra.mxu0 %v744_v60  ;;  %1376 = vmatpush3.bf16.msra.mxu1 %v744_v60  ;;  %1011 = vst.msk [vmem:[%s2228_s8 + $0x30] sm:$0xff] (%p310_p4), %vm988_vm1, %v1459_v49  ;;  %1012 = vst.msk [vmem:[%s2228_s8 + $0x38] sm:$0xff] (%p310_p4), %vm988_vm1, %v1459_v49 }
 0x1d4   : > { %1013 = vst.msk [vmem:[%s2228_s8 + $0x40] sm:$0xff] (%p310_p4), %vm988_vm1, %v1459_v49  ;;  %1014 = vst.msk [vmem:[%s2228_s8 + $0x48] sm:$0xff] (%p310_p4), %vm988_vm1, %v1459_v49 }
 0x1d5   : > { %1015 = vst.msk [vmem:[%s2228_s8 + $0x50] sm:$0xff] (%p310_p4), %vm988_vm1, %v1459_v49  ;;  %1016 = vst.msk [vmem:[%s2228_s8 + $0x58] sm:$0xff] (%p310_p4), %vm988_vm1, %v1459_v49 }
 0x1d6   : > { %1354 = vmatmul.mubr.msk.bf16.vlgmr.msra.gmra.mrb[8].mxu0 %vm623_vm0, %v1426_v62  ;;  %1358 = vmatmul.mubr.msk.bf16.vlgmr.msra.gmra.mrb[0].mxu1 %vm623_vm0, %v1427_v63  ;;  %1017 = vst.msk [vmem:[%s2228_s8 + $0x60] sm:$0xff] (%p310_p4), %vm988_vm1, %v1459_v49  ;;  %1018 = vst.msk [vmem:[%s2228_s8 + $0x68] sm:$0xff] (%p310_p4), %vm988_vm1, %v1459_v49 }
 0x1d7   : > { %1361 = vmatprep.mubr.msk.bf16.mxu1 %vm623_vm0, %v1428_v0  ;;  %1019 = vst.msk [vmem:[%s2228_s8 + $0x70] sm:$0xff] (%p310_p4), %vm988_vm1, %v1459_v49  ;;  %1020 = vst.msk [vmem:[%s2228_s8 + $0x78] sm:$0xff] (%p310_p4), %vm988_vm1, %v1459_v49 }
 0x1de   : > { %1362 = vmatmul.mubr.msk.bf16.gmra.mrb[4].mxu1 %vm623_vm0, %v1429_v1 }
 0x1df   : > { %1365 = vmatprep.mubr.msk.bf16.mxu1 %vm623_vm0, %v1430_v3 }
 0x1e6   : > { %1366 = vmatmul.mubr.msk.bf16.gmra.mrb[8].mxu1 %vm623_vm0, %v1431_v4 }
 0x2a9   : > { %v1355_v14 = vpop.f32.mrb[8].mxu0  ;;  %v1359_v15 = vpop.f32.mrb[0].mxu1 }
 0x2aa   : > { %v1745_v48 = vadd.f32 %v1355_v14, %v758_v7  ;;  %v1747_v16 = vadd.f32 %v1359_v15, %v778_v10  ;;  %v923_v17 = vpop.f32.mrb[9].mxu0  ;;  %v939_v59 = vpop.f32.mrb[1].mxu1 }
 0x2ab   : > { %v1749_v61 = vadd.f32 %v923_v17, %v748_v5  ;;  %v1751_v2 = vadd.f32 %v939_v59, %v768_v8  ;;  %v1356_v18 = vpop.f32.mrb[10].mxu0  ;;  %v1360_v19 = vpop.f32.mrb[2].mxu1 }
 0x2ac   : > { %v1753_v20 = vadd.f32 %v1356_v18, %v763_v54  ;;  %v1755_v21 = vadd.f32 %v1360_v19, %v783_v11  ;;  %v926_v22 = vpop.f32.mrb[11].mxu0  ;;  %v942_v23 = vpop.f32.mrb[3].mxu1 }
 0x2ad   : > { %v1757_v25 = vadd.f32 %v926_v22, %v753_v6  ;;  %v1759_v26 = vadd.f32 %v942_v23, %v773_v9 }
 0x2b1   : > { %v1363_v28 = vpop.f32.mrb[4].mxu1 }
 0x2b2   : > { %v1761_v29 = vadd.f32 %v1363_v28, %v798_v24  ;;  %v955_v30 = vpop.f32.mrb[5].mxu1 }
 0x2b3   : > { %v1763_v32 = vadd.f32 %v955_v30, %v788_v12  ;;  %v1364_v33 = vpop.f32.mrb[6].mxu1 }
 0x2b4   : > { %v1765_v34 = vadd.f32 %v1364_v33, %v803_v27  ;;  %v958_v35 = vpop.f32.mrb[7].mxu1 }
 0x2b5   : > { %v1767_v37 = vadd.f32 %v958_v35, %v793_v13 }
 0x2b7   : > { %987 = sbr.rel (!%p310_p4) target bundleno = 702 (0x2be), region = 52 }
 0x2b9   : > { %v1367_v39 = vpop.f32.mrb[8].mxu1 }
 0x2ba   : > { %v1769_v40 = vadd.f32 %v1367_v39, %v818_v38  ;;  %v971_v41 = vpop.f32.mrb[9].mxu1 }
 0x2bb   : > { %v1771_v43 = vadd.f32 %v971_v41, %v808_v31  ;;  %v1368_v44 = vpop.f32.mrb[10].mxu1 }
 0x2bc   : > { %v1773_v45 = vadd.f32 %v1368_v44, %v823_v42  ;;  %v974_v46 = vpop.f32.mrb[11].mxu1 }
 0x2bd   : > { %v1775_v47 = vadd.f32 %v974_v46, %v813_v36 }
 0x2be PF: > { %vm1037_vm2 = vcmask 130048   ;;  %v1136_v6 = vmul.f32 %v1757_v25, %v1757_v25  ;;  %v1135_v7 = vmul.f32 %v1749_v61, %v1749_v61  ;;  %v1138_v9 = vmul.f32 %v1753_v20, %v1753_v20  ;;  %v1023_v33 = vld [vmem:[%s2227_s7 + $0x10] sm:$0xff]  ;;  %v1024_v39 = vld [vmem:[%s2227_s7 + $0x18] sm:$0xff]  ;;  %v1025_v46 = vld [vmem:[%s2227_s7 + $0x20] sm:$0xff] }
 0x2bf   : > { %v1044_v50 = vsel %vm1037_vm2, %v1745_v48, 0.0  ;;  %v1038_v52 = vsel %vm1037_vm2, %v1749_v61, 0.0  ;;  %v1047_v53 = vsel %vm1037_vm2, %v1753_v20, 0.0  ;;  %v1041_v55 = vsel %vm1037_vm2, %v1757_v25, 0.0 }
 0x2c0   : > { %1045 = vadd.xlane.f32.xlu1 %v1044_v50  ;;  %1039 = vadd.xlane.f32.xlu0 %v1038_v52  ;;  %v1053_v56 = vsel %vm1037_vm2, %v1759_v26, 0.0  ;;  %v1050_v57 = vsel %vm1037_vm2, %v1751_v2, 0.0  ;;  %v1059_v58 = vsel %vm1037_vm2, %v1755_v21, 0.0  ;;  %v1056_v60 = vsel %vm1037_vm2, %v1747_v16, 0.0 }
 0x2c1   : > { %v1065_v51 = vsel %vm1037_vm2, %v1767_v37, 0.0  ;;  %v1062_v62 = vsel %vm1037_vm2, %v1763_v32, 0.0  ;;  %v1071_v63 = vsel %vm1037_vm2, %v1765_v34, 0.0  ;;  %v1068_v0 = vsel %vm1037_vm2, %v1761_v29, 0.0 }
 0x2c2   : > { %v1077_v1 = vsel %vm1037_vm2, %v1775_v47, 0.0  ;;  %v1074_v3 = vsel %vm1037_vm2, %v1771_v43, 0.0  ;;  %v1083_v4 = vsel %vm1037_vm2, %v1773_v45, 0.0  ;;  %v1080_v5 = vsel %vm1037_vm2, %v1769_v40, 0.0 }
 0x2c3   : > { %v1154_v54 = vsel %vm1037_vm2, %v1136_v6, 0.0  ;;  %v1151_v8 = vsel %vm1037_vm2, %v1135_v7, 0.0  ;;  %v1137_v10 = vmul.f32 %v1745_v48, %v1745_v48  ;;  %v1160_v11 = vsel %vm1037_vm2, %v1138_v9, 0.0  ;;  %v1034_v9 = vld [vmem:[%s2227_s7 + $0x68] sm:$0xff] }
 0x2c4   : > { %1048 = vadd.xlane.f32.xlu1 %v1047_v53  ;;  %1042 = vadd.xlane.f32.xlu0 %v1041_v55  ;;  %v1140_v13 = vmul.f32 %v1759_v26, %v1759_v26  ;;  %v1139_v14 = vmul.f32 %v1751_v2, %v1751_v2  ;;  %v1142_v48 = vmul.f32 %v1755_v21, %v1755_v21  ;;  %vm1102_vm3 = vcmask 7168   ;;  %v1028_v53 = vld [vmem:[%s2227_s7 + $0x38] sm:$0xff]  ;;  %v1027_v55 = vld [vmem:[%s2227_s7 + $0x30] sm:$0xff] }
 0x2c5   : > { %v1157_v12 = vsel %vm1037_vm2, %v1137_v10, 0.0  ;;  %v1141_v59 = vmul.f32 %v1747_v16, %v1747_v16  ;;  %v1144_v2 = vmul.f32 %v1767_v37, %v1767_v37  ;;  %v1143_v19 = vmul.f32 %v1763_v32, %v1763_v32  ;;  %v1033_v10 = vld [vmem:[%s2227_s7 + $0x60] sm:$0xff] }
 0x2c6   : > { %v1166_v15 = vsel %vm1037_vm2, %v1140_v13, 0.0  ;;  %v1163_v17 = vsel %vm1037_vm2, %v1139_v14, 0.0  ;;  %v1172_v61 = vsel %vm1037_vm2, %v1142_v48, 0.0  ;;  %v1146_v16 = vmul.f32 %v1765_v34, %v1765_v34  ;;  %v1021_v34 = vld [vmem:[%s2227_s7] sm:$0xff] }
 0x2c7   : > { %v1169_v18 = vsel %vm1037_vm2, %v1141_v59, 0.0  ;;  %v1178_v20 = vsel %vm1037_vm2, %v1144_v2, 0.0  ;;  %v1175_v21 = vsel %vm1037_vm2, %v1143_v19, 0.0  ;;  %v1145_v22 = vmul.f32 %v1761_v29, %v1761_v29  ;;  %v1120_v2 = vld [vmem:[%s2228_s8 + $0x8] sm:$0xff]  ;;  %v1119_v19 = vld [vmem:[%s2228_s8] sm:$0xff] }
 0x2c8   : > { %1054 = vadd.xlane.f32.xlu1 %v1053_v56  ;;  %1051 = vadd.xlane.f32.xlu0 %v1050_v57  ;;  %v1184_v23 = vsel %vm1037_vm2, %v1146_v16, 0.0  ;;  %v1148_v25 = vmul.f32 %v1775_v47, %v1775_v47  ;;  %v1147_v26 = vmul.f32 %v1771_v43, %v1771_v43  ;;  %v1150_v29 = vmul.f32 %v1773_v45, %v1773_v45  ;;  %v1026_v45 = vld [vmem:[%s2227_s7 + $0x28] sm:$0xff] }
 0x2c9   : > { %v1181_v24 = vsel %vm1037_vm2, %v1145_v22, 0.0  ;;  %v1149_v30 = vmul.f32 %v1769_v40, %v1769_v40  ;;  %v1022_v40 = vld [vmem:[%s2227_s7 + $0x8] sm:$0xff] }
 0x2ca   : > { %v1190_v27 = vsel %vm1037_vm2, %v1148_v25, 0.0  ;;  %v1187_v28 = vsel %vm1037_vm2, %v1147_v26, 0.0  ;;  %v1196_v31 = vsel %vm1037_vm2, %v1150_v29, 0.0  ;;  %v1124_v29 = vld [vmem:[%s2228_s8 + $0x28] sm:$0xff] }
 0x2cb   : > { %v1193_v32 = vsel %vm1037_vm2, %v1149_v30, 0.0  ;;  %v1123_v30 = vld [vmem:[%s2228_s8 + $0x20] sm:$0xff] }
 0x2cc   : > { %1060 = vadd.xlane.f32.xlu1 %v1059_v58  ;;  %1057 = vadd.xlane.f32.xlu0 %v1056_v60 }
 0x2d0   : > { %1066 = vadd.xlane.f32.xlu1 %v1065_v51  ;;  %1063 = vadd.xlane.f32.xlu0 %v1062_v62  ;;  %v1030_v51 = vld [vmem:[%s2227_s7 + $0x48] sm:$0xff]  ;;  %v1029_v62 = vld [vmem:[%s2227_s7 + $0x40] sm:$0xff] }
 0x2d4   : > { %1072 = vadd.xlane.f32.xlu1 %v1071_v63  ;;  %1069 = vadd.xlane.f32.xlu0 %v1068_v0 }
 0x2d8   : > { %1078 = vadd.xlane.f32.xlu1 %v1077_v1  ;;  %1075 = vadd.xlane.f32.xlu0 %v1074_v3 }
 0x2dc   : > { %1084 = vadd.xlane.f32.xlu1 %v1083_v4  ;;  %1081 = vadd.xlane.f32.xlu0 %v1080_v5  ;;  %v1032_v4 = vld [vmem:[%s2227_s7 + $0x58] sm:$0xff]  ;;  %v1031_v5 = vld [vmem:[%s2227_s7 + $0x50] sm:$0xff] }
 0x2e0   : > { %1155 = vadd.xlane.f32.xlu1 %v1154_v54  ;;  %1152 = vadd.xlane.f32.xlu0 %v1151_v8 }
 0x2e4   : > { %1161 = vadd.xlane.f32.xlu1 %v1160_v11  ;;  %1158 = vadd.xlane.f32.xlu0 %v1157_v12 }
 0x2e8   : > { %1167 = vadd.xlane.f32.xlu1 %v1166_v15  ;;  %1164 = vadd.xlane.f32.xlu0 %v1163_v17  ;;  %v1036_v15 = vld [vmem:[%s2227_s7 + $0x78] sm:$0xff]  ;;  %v1035_v17 = vld [vmem:[%s2227_s7 + $0x70] sm:$0xff] }
 0x2ec   : > { %1173 = vadd.xlane.f32.xlu1 %v1172_v61  ;;  %1170 = vadd.xlane.f32.xlu0 %v1169_v18 }
 0x2f0   : > { %1179 = vadd.xlane.f32.xlu1 %v1178_v20  ;;  %1176 = vadd.xlane.f32.xlu0 %v1175_v21 }
 0x2f4   : > { %1185 = vadd.xlane.f32.xlu1 %v1184_v23  ;;  %1182 = vadd.xlane.f32.xlu0 %v1181_v24  ;;  %v1122_v23 = vld [vmem:[%s2228_s8 + $0x18] sm:$0xff]  ;;  %v1121_v24 = vld [vmem:[%s2228_s8 + $0x10] sm:$0xff] }
 0x2f8   : > { %1191 = vadd.xlane.f32.xlu1 %v1190_v27  ;;  %1188 = vadd.xlane.f32.xlu0 %v1187_v28 }
 0x2fc   : > { %1197 = vadd.xlane.f32.xlu1 %v1196_v31  ;;  %1194 = vadd.xlane.f32.xlu0 %v1193_v32 }
 0x34d   : > { %v1046_v35 = vpop.xlane.xlu1 %1045  ;;  %v1040_v36 = vpop.xlane.xlu0 %1039 }
 0x34e   : > { %v1088_v37 = vadd.f32 %v1046_v35, %v1023_v33  ;;  %v1086_v38 = vadd.f32 %v1040_v36, %v1021_v34  ;;  %v1126_v35 = vld [vmem:[%s2228_s8 + $0x38] sm:$0xff]  ;;  %v1125_v36 = vld [vmem:[%s2228_s8 + $0x30] sm:$0xff] }
 0x350   : > { %1105 = vst.msk [vmem:[%s2227_s7 + $0x10] sm:$0xff] %vm1102_vm3, %v1088_v37  ;;  %1103 = vst.msk [vmem:[%s2227_s7] sm:$0xff] %vm1102_vm3, %v1086_v38 }
 0x351   : > { %v1049_v41 = vpop.xlane.xlu1 %1048  ;;  %v1043_v42 = vpop.xlane.xlu0 %1042 }
 0x352   : > { %v1089_v43 = vadd.f32 %v1049_v41, %v1024_v39  ;;  %v1087_v44 = vadd.f32 %v1043_v42, %v1022_v40  ;;  %v1128_v41 = vld [vmem:[%s2228_s8 + $0x48] sm:$0xff]  ;;  %v1127_v42 = vld [vmem:[%s2228_s8 + $0x40] sm:$0xff] }
 0x354   : > { %1106 = vst.msk [vmem:[%s2227_s7 + $0x18] sm:$0xff] %vm1102_vm3, %v1089_v43  ;;  %1104 = vst.msk [vmem:[%s2227_s7 + $0x8] sm:$0xff] %vm1102_vm3, %v1087_v44 }
 0x355   : > { %v1055_v47 = vpop.xlane.xlu1 %1054  ;;  %v1052_v49 = vpop.xlane.xlu0 %1051 }
 0x356   : > { %v1091_v50 = vadd.f32 %v1055_v47, %v1026_v45  ;;  %v1090_v52 = vadd.f32 %v1052_v49, %v1025_v46  ;;  %v1130_v47 = vld [vmem:[%s2228_s8 + $0x58] sm:$0xff]  ;;  %v1129_v49 = vld [vmem:[%s2228_s8 + $0x50] sm:$0xff] }
 0x358   : > { %1108 = vst.msk [vmem:[%s2227_s7 + $0x28] sm:$0xff] %vm1102_vm3, %v1091_v50  ;;  %1107 = vst.msk [vmem:[%s2227_s7 + $0x20] sm:$0xff] %vm1102_vm3, %v1090_v52 }
 0x359   : > { %v1061_v56 = vpop.xlane.xlu1 %1060  ;;  %v1058_v57 = vpop.xlane.xlu0 %1057 }
 0x35a   : > { %v1093_v58 = vadd.f32 %v1061_v56, %v1028_v53  ;;  %v1092_v60 = vadd.f32 %v1058_v57, %v1027_v55  ;;  %v1132_v56 = vld [vmem:[%s2228_s8 + $0x68] sm:$0xff]  ;;  %v1131_v57 = vld [vmem:[%s2228_s8 + $0x60] sm:$0xff] }
 0x35c   : > { %1110 = vst.msk [vmem:[%s2227_s7 + $0x38] sm:$0xff] %vm1102_vm3, %v1093_v58  ;;  %1109 = vst.msk [vmem:[%s2227_s7 + $0x30] sm:$0xff] %vm1102_vm3, %v1092_v60 }
 0x35d   : > { %v1067_v63 = vpop.xlane.xlu1 %1066  ;;  %v1064_v0 = vpop.xlane.xlu0 %1063 }
 0x35e   : > { %v1095_v1 = vadd.f32 %v1067_v63, %v1030_v51  ;;  %v1094_v3 = vadd.f32 %v1064_v0, %v1029_v62  ;;  %v1134_v63 = vld [vmem:[%s2228_s8 + $0x78] sm:$0xff]  ;;  %v1133_v0 = vld [vmem:[%s2228_s8 + $0x70] sm:$0xff] }
 0x360   : > { %1112 = vst.msk [vmem:[%s2227_s7 + $0x48] sm:$0xff] %vm1102_vm3, %v1095_v1  ;;  %1111 = vst.msk [vmem:[%s2227_s7 + $0x40] sm:$0xff] %vm1102_vm3, %v1094_v3 }
 0x361   : > { %v1073_v6 = vpop.xlane.xlu1 %1072  ;;  %v1070_v7 = vpop.xlane.xlu0 %1069 }
 0x362   : > { %v1097_v54 = vadd.f32 %v1073_v6, %v1032_v4  ;;  %v1096_v8 = vadd.f32 %v1070_v7, %v1031_v5 }
 0x364   : > { %1114 = vst.msk [vmem:[%s2227_s7 + $0x58] sm:$0xff] %vm1102_vm3, %v1097_v54  ;;  %1113 = vst.msk [vmem:[%s2227_s7 + $0x50] sm:$0xff] %vm1102_vm3, %v1096_v8 }
 0x365   : > { %v1079_v11 = vpop.xlane.xlu1 %1078  ;;  %v1076_v12 = vpop.xlane.xlu0 %1075 }
 0x366   : > { %v1099_v13 = vadd.f32 %v1079_v11, %v1034_v9  ;;  %v1098_v14 = vadd.f32 %v1076_v12, %v1033_v10 }
 0x368   : > { %1116 = vst.msk [vmem:[%s2227_s7 + $0x68] sm:$0xff] %vm1102_vm3, %v1099_v13  ;;  %1115 = vst.msk [vmem:[%s2227_s7 + $0x60] sm:$0xff] %vm1102_vm3, %v1098_v14 }
 0x369   : > { %v1085_v48 = vpop.xlane.xlu1 %1084  ;;  %v1082_v59 = vpop.xlane.xlu0 %1081 }
 0x36a   : > { %v1101_v61 = vadd.f32 %v1085_v48, %v1036_v15  ;;  %v1100_v18 = vadd.f32 %v1082_v59, %v1035_v17 }
 0x36c   : > { %1118 = vst.msk [vmem:[%s2227_s7 + $0x78] sm:$0xff] %vm1102_vm3, %v1101_v61  ;;  %1117 = vst.msk [vmem:[%s2227_s7 + $0x70] sm:$0xff] %vm1102_vm3, %v1100_v18 }
 0x36d   : > { %v1156_v20 = vpop.xlane.xlu1 %1155  ;;  %v1153_v21 = vpop.xlane.xlu0 %1152 }
 0x36e   : > { %v1200_v16 = vadd.f32 %v1156_v20, %v1120_v2  ;;  %v1199_v22 = vadd.f32 %v1153_v21, %v1119_v19 }
 0x370   : > { %1216 = vst.msk [vmem:[%s2228_s8 + $0x8] sm:$0xff] %vm1102_vm3, %v1200_v16  ;;  %1215 = vst.msk [vmem:[%s2228_s8] sm:$0xff] %vm1102_vm3, %v1199_v22 }
 0x371   : > { %v1162_v25 = vpop.xlane.xlu1 %1161  ;;  %v1159_v26 = vpop.xlane.xlu0 %1158 }
 0x372   : > { %v1202_v27 = vadd.f32 %v1162_v25, %v1122_v23  ;;  %v1201_v28 = vadd.f32 %v1159_v26, %v1121_v24 }
 0x374   : > { %1218 = vst.msk [vmem:[%s2228_s8 + $0x18] sm:$0xff] %vm1102_vm3, %v1202_v27  ;;  %1217 = vst.msk [vmem:[%s2228_s8 + $0x10] sm:$0xff] %vm1102_vm3, %v1201_v28 }
 0x375   : > { %v1168_v31 = vpop.xlane.xlu1 %1167  ;;  %v1165_v32 = vpop.xlane.xlu0 %1164 }
 0x376   : > { %v1204_v33 = vadd.f32 %v1168_v31, %v1124_v29  ;;  %v1203_v34 = vadd.f32 %v1165_v32, %v1123_v30 }
 0x378   : > { %1220 = vst.msk [vmem:[%s2228_s8 + $0x28] sm:$0xff] %vm1102_vm3, %v1204_v33  ;;  %1219 = vst.msk [vmem:[%s2228_s8 + $0x20] sm:$0xff] %vm1102_vm3, %v1203_v34 }
 0x379   : > { %v1174_v37 = vpop.xlane.xlu1 %1173  ;;  %v1171_v38 = vpop.xlane.xlu0 %1170 }
 0x37a   : > { %v1206_v39 = vadd.f32 %v1174_v37, %v1126_v35  ;;  %v1205_v40 = vadd.f32 %v1171_v38, %v1125_v36 }
 0x37c   : > { %1222 = vst.msk [vmem:[%s2228_s8 + $0x38] sm:$0xff] %vm1102_vm3, %v1206_v39  ;;  %1221 = vst.msk [vmem:[%s2228_s8 + $0x30] sm:$0xff] %vm1102_vm3, %v1205_v40 }
 0x37d   : > { %v1180_v43 = vpop.xlane.xlu1 %1179  ;;  %v1177_v44 = vpop.xlane.xlu0 %1176 }
 0x37e   : > { %v1208_v45 = vadd.f32 %v1180_v43, %v1128_v41  ;;  %v1207_v46 = vadd.f32 %v1177_v44, %v1127_v42 }
 0x380   : > { %1224 = vst.msk [vmem:[%s2228_s8 + $0x48] sm:$0xff] %vm1102_vm3, %v1208_v45  ;;  %1223 = vst.msk [vmem:[%s2228_s8 + $0x40] sm:$0xff] %vm1102_vm3, %v1207_v46 }
 0x381   : > { %v1186_v50 = vpop.xlane.xlu1 %1185  ;;  %v1183_v52 = vpop.xlane.xlu0 %1182 }
 0x382   : > { %v1210_v53 = vadd.f32 %v1186_v50, %v1130_v47  ;;  %v1209_v55 = vadd.f32 %v1183_v52, %v1129_v49 }
 0x384   : > { %1226 = vst.msk [vmem:[%s2228_s8 + $0x58] sm:$0xff] %vm1102_vm3, %v1210_v53  ;;  %1225 = vst.msk [vmem:[%s2228_s8 + $0x50] sm:$0xff] %vm1102_vm3, %v1209_v55 }
 0x385   : > { %v1192_v58 = vpop.xlane.xlu1 %1191  ;;  %v1189_v60 = vpop.xlane.xlu0 %1188 }
 0x386   : > { %v1212_v51 = vadd.f32 %v1192_v58, %v1132_v56  ;;  %v1211_v62 = vadd.f32 %v1189_v60, %v1131_v57 }
 0x388   : > { %1228 = vst.msk [vmem:[%s2228_s8 + $0x68] sm:$0xff] %vm1102_vm3, %v1212_v51  ;;  %1227 = vst.msk [vmem:[%s2228_s8 + $0x60] sm:$0xff] %vm1102_vm3, %v1211_v62 }
 0x389   : > { %v1198_v1 = vpop.xlane.xlu1 %1197  ;;  %v1195_v3 = vpop.xlane.xlu0 %1194 }
 0x38a   : > { %v1214_v4 = vadd.f32 %v1198_v1, %v1134_v63  ;;  %v1213_v5 = vadd.f32 %v1195_v3, %v1133_v0 }
 0x38c   : > { %1230 = vst.msk [vmem:[%s2228_s8 + $0x78] sm:$0xff] %vm1102_vm3, %v1214_v4  ;;  %1229 = vst.msk [vmem:[%s2228_s8 + $0x70] sm:$0xff] %vm1102_vm3, %v1213_v5 }
 0x38d PF: > { %s19_s29 = sadd.s32 1, %s1454_s29   ;;  %s2229_s27 = smov %s1450_s28 }
 0x38e   : > { %p16_p6 = scmp.ge.s32.totalorder %s19_s29, 4   ;;  %s2230_s28 = smov %s2232_s30 }
 0x390   :  { %18 = sbr.rel (!%p16_p6) target bundleno = 2 (0x2), region = 86 }

// kernel: global_encode.7
= control target key start
LH: loop header
LB: loop body
LE: loop exit
PB: predicated region body
PF: predicated region fallthrough
CT: control target
= control target key end

     0   :  { %s1920_s30 = smov 0   ;;  %s1922_s10 = smov 0   ;;  %s2503_s0 = inlined_call_operand.vmem [shape: f32[2,3,16], index: 0, kind: input, shape index: {}]   ;;  %s2504_s1 = inlined_call_operand.vmem [shape: f32[64,3], index: 1, kind: input, shape index: {}]   ;;  %s2505_s2 = inlined_call_operand.vmem [shape: f32[64,1], index: 2, kind: input, shape index: {}]   ;;  %s2506_s3 = inlined_call_operand.vmem [shape: bf16[64,64], index: 3, kind: input, shape index: {}]   ;;  %s2507_s4 = inlined_call_operand.vmem [shape: f32[64,1], index: 4, kind: input, shape index: {}]   ;;  %s2508_s5 = inlined_call_operand.vmem [shape: bf16[128,64], index: 5, kind: input, shape index: {}]   ;;  %s2509_s6 = inlined_call_operand.vmem [shape: f32[128,1], index: 6, kind: input, shape index: {}]   ;;  %s2510_s7 = inlined_call_operand.vmem [shape: bf16[128,128], index: 7, kind: input, shape index: {}]   ;;  %s2511_s8 = inlined_call_operand.vmem [shape: f32[128,1], index: 8, kind: input, shape index: {}]   ;;  %s2512_s9 = inlined_call_operand.vmem [shape: f32[128,2], index: 9, kind: output, shape index: {}]  }
   0x1   :  { %s1924_s11 = smov 0  }
   0x2 LB: > { %s31_s12 = sadd.s32 1, %s1860_s10  ;;  %p1631_p0 = scmp.ge.s32.totalorder %s1864_s11, 1  ;;  %s1864_s11 = sphi %s1924_s11, %s19_s11   ;;  %s1860_s10 = sphi %s1922_s10, %s2516_s10   ;;  %s1856_s30 = sphi %s1920_s30, %s2515_s30  }
   0x3   : > { %p33_p1 = scmp.ge.s32.totalorder %s31_s12, 2  ;;  %p298_p2 = scmp.lt.s32.totalorder %s1864_s11, 3 }
   0x5   : > { %s2518_s12 = smov (%p33_p1, %s31_s12), 0  ;;  %p299_p3 = pnand %p1631_p0, %p298_p2 }
   0x6   : > { %v343_v0 = vld [vmem:[%s2504_s1] sm:$0xff] (!%p299_p3)  ;;  %v1866_v1 = vmov (!%p299_p3), 2   ;;  %v1867_v2 = vmov (!%p299_p3), 1   ;;  %v345_v3 = vld [vmem:[%s2504_s1 + $0x10] sm:$0xff] (!%p299_p3)  ;;  %v344_v4 = vld [vmem:[%s2504_s1 + $0x8] sm:$0xff] (!%p299_p3)  ;;  %v1868_v7 = vmov (!%p299_p3), 0   ;;  %v400_v59 = vlaneseq (!%p299_p3) }
   0x7   : > { %302 = sbr.rel (%p299_p3) target bundleno = 1271 (0x4f7), region = 56  ;;  %1806 = vset.pattern.permute.xlu0 (!%p299_p3), %v1866_v1  ;;  %1805 = vset.pattern.permute.xlu1 (!%p299_p3), %v1867_v2  ;;  %v348_v5 = vld [vmem:[%s2504_s1 + $0x28] sm:$0xff] (!%p299_p3)  ;;  %v347_v6 = vld [vmem:[%s2504_s1 + $0x20] sm:$0xff] (!%p299_p3)  ;;  %v350_v8 = vld [vmem:[%s2504_s1 + $0x38] sm:$0xff] (!%p299_p3)  ;;  %p339_p4 = scmp.eq.s32.totalorder (!%p299_p3), %s1856_s30, 0  ;;  %vm652_vm0 = vcmask (!%p299_p3), 523264  }
   0x8   : > { %465 = vperm.xlu0 (!%p299_p3), %1806, %v343_v0   ;;  %413 = vperm.xlu1 (!%p299_p3), %1805, %v343_v0   ;;  %v346_v9 = vld [vmem:[%s2504_s1 + $0x18] sm:$0xff] (!%p299_p3)  ;;  %v351_v10 = vld [vmem:[%s2505_s2] sm:$0xff] (!%p299_p3)  ;;  %v352_v11 = vld [vmem:[%s2505_s2 + $0x8] sm:$0xff] (!%p299_p3)  ;;  %p331_p5 = scmp.lt.s32.totalorder (!%p299_p3), %s1856_s30, 1  ;;  %v401_v62 = vshrl.u32 (!%p299_p3), %v400_v59, 7  ;;  %vm1296_vm1 = vcmask (!%p299_p3), 130048  }
   0x9   : > { %v349_v12 = vld [vmem:[%s2504_s1 + $0x30] sm:$0xff] (!%p299_p3)  ;;  %v355_v13 = vld [vmem:[%s2505_s2 + $0x20] sm:$0xff] (!%p299_p3)  ;;  %v358_v14 = vld [vmem:[%s2505_s2 + $0x38] sm:$0xff] (!%p299_p3)  ;;  %vm1348_vm2 = vcmask (!%p299_p3), 7168  }
   0xa   : > { %v573_v15 = vld [vmem:[%s2507_s4 + $0x8] sm:$0xff] (!%p299_p3)  ;;  %v575_v16 = vld [vmem:[%s2507_s4 + $0x18] sm:$0xff] (!%p299_p3)  ;;  %v353_v17 = vld [vmem:[%s2505_s2 + $0x10] sm:$0xff] (!%p299_p3) }
   0xb   : > { %v577_v18 = vld [vmem:[%s2507_s4 + $0x28] sm:$0xff] (!%p299_p3)  ;;  %v354_v19 = vld [vmem:[%s2505_s2 + $0x18] sm:$0xff] (!%p299_p3)  ;;  %v357_v28 = vld [vmem:[%s2505_s2 + $0x30] sm:$0xff] (!%p299_p3) }
   0xc   : > { %473 = vperm.xlu0 (!%p299_p3), %1806, %v345_v3   ;;  %417 = vperm.xlu1 (!%p299_p3), %1805, %v344_v4   ;;  %v579_v20 = vld [vmem:[%s2507_s4 + $0x38] sm:$0xff] (!%p299_p3)  ;;  %v747_v21 = vld [vmem:[%s2509_s6 + $0x8] sm:$0xff] (!%p299_p3)  ;;  %v572_v30 = vld [vmem:[%s2507_s4] sm:$0xff] (!%p299_p3) }
   0xd   : > { %v749_v22 = vld [vmem:[%s2509_s6 + $0x18] sm:$0xff] (!%p299_p3)  ;;  %v751_v23 = vld [vmem:[%s2509_s6 + $0x28] sm:$0xff] (!%p299_p3)  ;;  %v574_v32 = vld [vmem:[%s2507_s4 + $0x10] sm:$0xff] (!%p299_p3) }
   0xe   : > { %v753_v24 = vld [vmem:[%s2509_s6 + $0x38] sm:$0xff]  ;;  %v755_v25 = vld [vmem:[%s2509_s6 + $0x48] sm:$0xff]  ;;  %v1820_v33 = vld [vmem:[%s2506_s3] sm:$0xff]   ;;  %s332_s26 = scalar_select %p331_p5, %s1856_s30, 1 }
   0xf   : > { %v356_v26 = vld [vmem:[%s2505_s2 + $0x28] sm:$0xff]  ;;  %v757_v27 = vld [vmem:[%s2509_s6 + $0x58] sm:$0xff]  ;;  %v576_v35 = vld [vmem:[%s2507_s4 + $0x20] sm:$0xff]  ;;  %1713 = vmatprep.mubr.msk.bf16.mxu1 %vm652_vm0, %v1820_v33  ;;  %vm1420_vm3 = vcmask (%p339_p4), 15360  }
  0x10   : > { %485 = vperm.xlu0 %1806, %v348_v5   ;;  %1807 = vset.pattern.permute.xlu1 %v1866_v1  ;;  %v759_v29 = vld [vmem:[%s2509_s6 + $0x68] sm:$0xff]  ;;  %v761_v31 = vld [vmem:[%s2509_s6 + $0x78] sm:$0xff]  ;;  %v578_v37 = vld [vmem:[%s2507_s4 + $0x30] sm:$0xff]  ;;  %s1632_s29 = sshll.u32 %s332_s26, 2 }
  0x11   : > { %469 = vperm.xlu1 %1807, %v344_v4   ;;  %v1032_v34 = vld [vmem:[%s2511_s8 + $0x8] sm:$0xff]  ;;  %v1034_v36 = vld [vmem:[%s2511_s8 + $0x18] sm:$0xff]  ;;  %v746_v39 = vld [vmem:[%s2509_s6] sm:$0xff]  ;;  %s337_s17 = scalar_lea.vmem %s2503_s0, %s1632_s29 }
  0x12   : > { %v1036_v38 = vld [vmem:[%s2511_s8 + $0x28] sm:$0xff]  ;;  %v1038_v40 = vld [vmem:[%s2511_s8 + $0x38] sm:$0xff]  ;;  %v748_v41 = vld [vmem:[%s2509_s6 + $0x10] sm:$0xff] }
  0x13   : > { %v1040_v42 = vld [vmem:[%s2511_s8 + $0x48] sm:$0xff]  ;;  %v750_v43 = vld [vmem:[%s2509_s6 + $0x20] sm:$0xff]  ;;  %v1042_v44 = vld [vmem:[%s2511_s8 + $0x58] sm:$0xff] }
  0x14   : > { %1814 = vset.pattern.permute.xlu0 %v1867_v2  ;;  %v752_v45 = vld [vmem:[%s2509_s6 + $0x30] sm:$0xff]  ;;  %v1044_v46 = vld [vmem:[%s2511_s8 + $0x68] sm:$0xff]  ;;  %v754_v47 = vld [vmem:[%s2509_s6 + $0x40] sm:$0xff] }
  0x15   : > { %429 = vperm.xlu0 %1814, %v347_v6   ;;  %1808 = vset.pattern.permute.xlu1 %v1868_v7  ;;  %v1046_v48 = vld [vmem:[%s2511_s8 + $0x78] sm:$0xff]  ;;  %v756_v49 = vld [vmem:[%s2509_s6 + $0x50] sm:$0xff]  ;;  %v758_v52 = vld [vmem:[%s2509_s6 + $0x60] sm:$0xff] }
  0x16   : > { %372 = vperm.xlu1 %1808, %v345_v3   ;;  %v760_v55 = vld [vmem:[%s2509_s6 + $0x70] sm:$0xff]  ;;  %v1031_v58 = vld [vmem:[%s2511_s8] sm:$0xff] }
  0x17   : > { %v1033_v61 = vld [vmem:[%s2511_s8 + $0x10] sm:$0xff] }
  0x19   : > { %441 = vperm.xlu0 %1814, %v350_v8  }
  0x1a   : > { %1809 = vset.pattern.permute.xlu1 %v1867_v2 }
  0x1b   : > { %421 = vperm.xlu1 %1809, %v345_v3   ;;  %v402_v3 = vsub.s32 0, %v401_v62 }
  0x1d   : > { %1817 = vset.pattern.permute.xlu0 %v1868_v7 }
  0x1e   : > { %362 = vperm.xlu0 %1817, %v343_v0  }
  0x1f   : > { %425 = vperm.xlu1 %1809, %v346_v9  }
  0x22   : > { %367 = vperm.xlu0 %1817, %v344_v4   ;;  %v359_v4 = vld [vmem:[%s337_s17] sm:$0x7] }
  0x23   : > { %1810 = vset.pattern.permute.xlu1 %v1866_v1 }
  0x24   : > { %477 = vperm.xlu1 %1810, %v346_v9  }
  0x26   : > { %377 = vperm.xlu0 %1817, %v346_v9   ;;  %v498_v9 = vsub.s32 2, %v401_v62 }
  0x28   : > { %1811 = vset.pattern.permute.xlu1 %v1868_v7 }
  0x29   : > { %518 = vperm.xlu1 %1811, %v351_v10   ;;  %v2132_v10 = vrot.slane %v359_v4, %v402_v3 }
  0x2a   : > { %523 = vperm.xlu0 %1817, %v352_v11  }
  0x2d   : > { %382 = vperm.xlu1 %1811, %v347_v6  }
  0x2e   : > { %392 = vperm.xlu0 %1817, %v349_v12  }
  0x31   : > { %387 = vperm.xlu1 %1811, %v348_v5  }
  0x32   : > { %538 = vperm.xlu0 %1817, %v355_v13  }
  0x35   : > { %1812 = vset.pattern.permute.xlu1 %v1867_v2 }
  0x36   : > { %553 = vperm.xlu0 %1817, %v358_v14   ;;  %433 = vperm.xlu1 %1812, %v348_v5   ;;  %v1039_v14 = vld [vmem:[%s2511_s8 + $0x40] sm:$0xff] }
  0x3a   : > { %599 = vperm.xlu0 %1817, %v573_v15   ;;  %1813 = vset.pattern.permute.xlu1 %v1866_v1 }
  0x3b   : > { %481 = vperm.xlu1 %1813, %v347_v6   ;;  %v1037_v6 = vld [vmem:[%s2511_s8 + $0x30] sm:$0xff] }
  0x3e   : > { %609 = vperm.xlu0 %1817, %v575_v16   ;;  %v2139_v16 = vrot.slane %v359_v4, %v498_v9 }
  0x3f   : > { %1815 = vset.pattern.permute.xlu1 %v1868_v7 }
  0x40   : > { %528 = vperm.xlu1 %1815, %v353_v17  }
  0x42   : > { %619 = vperm.xlu0 %1817, %v577_v18  }
  0x44   : > { %533 = vperm.xlu1 %1815, %v354_v19  }
  0x46   : > { %629 = vperm.xlu0 %1817, %v579_v20  }
  0x48   : > { %397 = vperm.xlu1 %1815, %v350_v8  }
  0x4a   : > { %781 = vperm.xlu0 %1817, %v747_v21  }
  0x4c   : > { %1816 = vset.pattern.permute.xlu1 %v1867_v2  ;;  %v446_v2 = vsub.s32 1, %v401_v62 }
  0x4d   : > { %437 = vperm.xlu1 %1816, %v349_v12  }
  0x4e   : > { %791 = vperm.xlu0 %1817, %v749_v22  }
  0x51   : > { %1818 = vset.pattern.permute.xlu1 %v1866_v1  ;;  %v1035_v1 = vld [vmem:[%s2511_s8 + $0x20] sm:$0xff] }
  0x52   : > { %801 = vperm.xlu0 %1817, %v751_v23   ;;  %489 = vperm.xlu1 %1818, %v349_v12  }
  0x56   : > { %811 = vperm.xlu0 %1817, %v753_v24   ;;  %493 = vperm.xlu1 %1818, %v350_v8   ;;  %v2130_v8 = vrot.slane %v359_v4, %v446_v2  ;;  %v1041_v24 = vld [vmem:[%s2511_s8 + $0x50] sm:$0xff] }
  0x5a   : > { %821 = vperm.xlu0 %1817, %v755_v25   ;;  %1819 = vset.pattern.permute.xlu1 %v1868_v7 }
  0x5b   : > { %543 = vperm.xlu1 %1819, %v356_v26  }
  0x5e   : > { %831 = vperm.xlu0 %1817, %v757_v27  }
  0x5f   : > { %548 = vperm.xlu1 %1819, %v357_v28  }
  0x62   : > { %841 = vperm.xlu0 %1817, %v759_v29  }
  0x63   : > { %594 = vperm.xlu1 %1819, %v572_v30   ;;  %v1043_v30 = vld [vmem:[%s2511_s8 + $0x60] sm:$0xff] }
  0x66   : > { %851 = vperm.xlu0 %1817, %v761_v31  }
  0x67   : > { %604 = vperm.xlu1 %1819, %v574_v32  }
  0x6a   : > { %1078 = vperm.xlu0 %1817, %v1032_v34  }
  0x6b   : > { %614 = vperm.xlu1 %1819, %v576_v35  }
  0x6e   : > { %1088 = vperm.xlu0 %1817, %v1034_v36  }
  0x6f   : > { %624 = vperm.xlu1 %1819, %v578_v37   ;;  %v1045_v37 = vld [vmem:[%s2511_s8 + $0x70] sm:$0xff] }
  0x72   : > { %1098 = vperm.xlu0 %1817, %v1036_v38  }
  0x73   : > { %776 = vperm.xlu1 %1819, %v746_v39  }
  0x76   : > { %1108 = vperm.xlu0 %1817, %v1038_v40  }
  0x77   : > { %786 = vperm.xlu1 %1819, %v748_v41  }
  0x7a   : > { %1118 = vperm.xlu0 %1817, %v1040_v42  }
  0x7b   : > { %796 = vperm.xlu1 %1819, %v750_v43  }
  0x7e   : > { %1128 = vperm.xlu0 %1817, %v1042_v44  }
  0x7f   : > { %806 = vperm.xlu1 %1819, %v752_v45  }
  0x82   : > { %1138 = vperm.xlu0 %1817, %v1044_v46  }
  0x83   : > { %816 = vperm.xlu1 %1819, %v754_v47  }
  0x86   : > { %1148 = vperm.xlu0 %1817, %v1046_v48  }
  0x87   : > { %826 = vperm.xlu1 %1819, %v756_v49   ;;  %v414_v50 = vpop.permute.xlu1 %413  ;;  %v466_v51 = vpop.permute.xlu0 %465 }
  0x88   : > { %v448_v15 = vmul.f32 %v2130_v8, %v414_v50  ;;  %v500_v20 = vmul.f32 %v2139_v16, %v466_v51 }
  0x8b   : > { %836 = vperm.xlu1 %1819, %v758_v52   ;;  %v418_v53 = vpop.permute.xlu1 %417  ;;  %v2101_v54 = vpop.permute.xlu0 %473 }
  0x8c   : > { %v449_v18 = vmul.f32 %v2130_v8, %v418_v53  ;;  %v502_v45 = vmul.f32 %v2139_v16, %v2101_v54 }
  0x8f   : > { %846 = vperm.xlu1 %1819, %v760_v55   ;;  %v2107_v56 = vpop.permute.xlu0 %485 }
  0x90   : > { %v470_v57 = vpop.permute.xlu1 %469 }
  0x91   : > { %v501_v26 = vmul.f32 %v2139_v16, %v470_v57 }
  0x93   : > { %1073 = vperm.xlu1 %1819, %v1031_v58  }
  0x94   : > { %v2113_v60 = vpop.permute.xlu0 %429 }
  0x95   : > { %v373_v63 = vpop.permute.xlu1 %372  ;;  %v452_v54 = vmul.f32 %v2130_v8, %v2113_v60 }
  0x96   : > { %v406_v42 = vmul.f32 %v2132_v10, %v373_v63 }
  0x97   : > { %1083 = vperm.xlu1 %1819, %v1033_v61  }
  0x98   : > { %v2122_v0 = vpop.permute.xlu0 %441 }
  0x9a   : > { %v422_v5 = vpop.permute.xlu1 %421 }
  0x9b   : > { %1093 = vperm.xlu1 %1819, %v1035_v1   ;;  %v450_v41 = vmul.f32 %v2130_v8, %v422_v5 }
  0x9d   : > { %v363_v11 = vpop.permute.xlu0 %362  ;;  %v458_v46 = vadd.f32 %v450_v41, %v406_v42 }
  0x9e   : > { %v426_v12 = vpop.permute.xlu1 %425  ;;  %v404_v13 = vmul.f32 %v2132_v10, %v363_v11 }
  0x9f   : > { %1103 = vperm.xlu1 %1819, %v1037_v6   ;;  %v451_v47 = vmul.f32 %v2130_v8, %v426_v12  ;;  %v510_v51 = vadd.f32 %v502_v45, %v458_v46 }
  0xa0   : > { %v456_v21 = vadd.f32 %v448_v15, %v404_v13  ;;  %v455_v13 = vmul.f32 %v2130_v8, %v2122_v0 }
  0xa1   : > { %v368_v17 = vpop.permute.xlu0 %367 }
  0xa2   : > { %v405_v19 = vmul.f32 %v2132_v10, %v368_v17  ;;  %v508_v27 = vadd.f32 %v500_v20, %v456_v21 }
  0xa3   : > { %1113 = vperm.xlu1 %1819, %v1039_v14   ;;  %v478_v22 = vpop.permute.xlu1 %477 }
  0xa4   : > { %v457_v23 = vadd.f32 %v449_v18, %v405_v19  ;;  %v503_v50 = vmul.f32 %v2139_v16, %v478_v22  ;;  %v505_v19 = vmul.f32 %v2139_v16, %v2107_v56 }
  0xa5   : > { %v378_v25 = vpop.permute.xlu0 %377 }
  0xa6   : > { %v509_v29 = vadd.f32 %v501_v26, %v457_v23  ;;  %v407_v43 = vmul.f32 %v2132_v10, %v378_v25 }
  0xa7   : > { %1123 = vperm.xlu1 %1819, %v1041_v24  }
  0xa8   : > { %v519_v28 = vpop.permute.xlu1 %518  ;;  %v459_v48 = vadd.f32 %v451_v47, %v407_v43 }
  0xa9   : > { %v556_v31 = vadd.f32 %v519_v28, %v508_v27  ;;  %v524_v32 = vpop.permute.xlu0 %523 }
  0xaa   : > { %v557_v33 = vadd.f32 %v524_v32, %v509_v29  ;;  %v511_v53 = vadd.f32 %v503_v50, %v459_v48 }
  0xab   : > { %v580_v34 = vmax.f32 %v556_v31, 0.0  ;;  %1133 = vperm.xlu1 %1819, %v1043_v30  }
  0xac   : > { %v581_v35 = vmax.f32 %v557_v33, 0.0  ;;  %v383_v36 = vpop.permute.xlu1 %382 }
  0xad   : > { %v408_v2 = vmul.f32 %v2132_v10, %v383_v36  ;;  %v393_v3 = vpop.permute.xlu0 %392 }
  0xae   : > { %v588_v38 = vpack.c.bf16 %v581_v35, %v580_v34  ;;  %v410_v22 = vmul.f32 %v2132_v10, %v393_v3 }
  0xaf   : > { %1143 = vperm.xlu1 %1819, %v1045_v37   ;;  %v460_v9 = vadd.f32 %v452_v54, %v408_v2  ;;  %v1822_v37 = vld [vmem:[%s2506_s3 + $0x10] sm:$0xff]  }
  0xb0   : > { %v388_v39 = vpop.permute.xlu1 %387  ;;  %1705 = vmatprep.subr.bf16.mxu1 %v588_v38 }
  0xb1   : > { %1706 = vmatpush3.bf16.msra.mxu1 %v588_v38  ;;  %v409_v11 = vmul.f32 %v2132_v10, %v388_v39  ;;  %v539_v60 = vpop.permute.xlu0 %538  ;;  %v1823_v38 = vld [vmem:[%s2506_s3 + $0x18] sm:$0xff]   ;;  %v1824_v39 = vld [vmem:[%s2508_s5] sm:$0xff]  }
  0xb5   : > { %v434_v40 = vpop.permute.xlu1 %433  ;;  %v554_v29 = vpop.permute.xlu0 %553 }
  0xb6   : > { %v453_v4 = vmul.f32 %v2130_v8, %v434_v40 }
  0xb8   : > { %v461_v14 = vadd.f32 %v453_v4, %v409_v11 }
  0xb9   : > { %v600_v41 = vpop.permute.xlu0 %599 }
  0xba   : > { %v482_v44 = vpop.permute.xlu1 %481  ;;  %v513_v26 = vadd.f32 %v505_v19, %v461_v14  ;;  %v1825_v19 = vld [vmem:[%s2508_s5 + $0x8] sm:$0xff]  }
  0xbb   : > { %v504_v5 = vmul.f32 %v2139_v16, %v482_v44 }
  0xbd   : > { %v512_v15 = vadd.f32 %v504_v5, %v460_v9  ;;  %v610_v43 = vpop.permute.xlu0 %609 }
  0xbf   : > { %v529_v49 = vpop.permute.xlu1 %528  ;;  %v560_v23 = vadd.f32 %v539_v60, %v512_v15 }
  0xc0   : > { %v558_v52 = vadd.f32 %v529_v49, %v510_v51 }
  0xc1   : > { %v584_v31 = vmax.f32 %v560_v23, 0.0  ;;  %v1829_v23 = vld [vmem:[%s2508_s5 + $0x28] sm:$0xff]  }
  0xc2   : > { %v582_v58 = vmax.f32 %v558_v52, 0.0  ;;  %v620_v52 = vpop.permute.xlu0 %619 }
  0xc3   : > { %v534_v55 = vpop.permute.xlu1 %533 }
  0xc4   : > { %v559_v57 = vadd.f32 %v534_v55, %v511_v53 }
  0xc6   : > { %v583_v61 = vmax.f32 %v559_v57, 0.0  ;;  %v630_v4 = vpop.permute.xlu0 %629 }
  0xc7   : > { %v398_v62 = vpop.permute.xlu1 %397 }
  0xc8   : > { %v589_v63 = vpack.c.bf16 %v583_v61, %v582_v58  ;;  %v411_v12 = vmul.f32 %v2132_v10, %v398_v62 }
  0xca   : > { %1707 = vmatprep.subr.bf16.mxu1 %v589_v63  ;;  %v463_v20 = vadd.f32 %v455_v13, %v411_v12 }
  0xcb   : > { %1708 = vmatpush3.bf16.msra.mxu1 %v589_v63 }
  0xcc   : > { %v438_v1 = vpop.permute.xlu1 %437 }
  0xcd   : > { %v454_v21 = vmul.f32 %v2130_v8, %v438_v1 }
  0xcf   : > { %v462_v27 = vadd.f32 %v454_v21, %v410_v22  ;;  %v1827_v21 = vld [vmem:[%s2508_s5 + $0x18] sm:$0xff]   ;;  %v1828_v22 = vld [vmem:[%s2508_s5 + $0x20] sm:$0xff]  }
  0xd1   : > { %v490_v6 = vpop.permute.xlu1 %489 }
  0xd2   : > { %v506_v24 = vmul.f32 %v2139_v16, %v490_v6 }
  0xd4   : > { %v514_v33 = vadd.f32 %v506_v24, %v462_v27  ;;  %v1830_v24 = vld [vmem:[%s2508_s5 + $0x30] sm:$0xff]   ;;  %v782_v27 = vpop.permute.xlu0 %781 }
  0xd5   : > { %v494_v17 = vpop.permute.xlu1 %493 }
  0xd6   : > { %v507_v18 = vmul.f32 %v2139_v16, %v494_v17  ;;  %v1821_v16 = vld [vmem:[%s2506_s3 + $0x8] sm:$0xff]  }
  0xd8   : > { %v515_v25 = vadd.f32 %v507_v18, %v463_v20  ;;  %v1826_v20 = vld [vmem:[%s2508_s5 + $0x10] sm:$0xff]  }
  0xda   : > { %v544_v0 = vpop.permute.xlu1 %543  ;;  %v563_v30 = vadd.f32 %v554_v29, %v515_v25  ;;  %v1831_v25 = vld [vmem:[%s2508_s5 + $0x38] sm:$0xff]   ;;  %v792_v29 = vpop.permute.xlu0 %791 }
  0xdb   : > { %v561_v28 = vadd.f32 %v544_v0, %v513_v26  ;;  %v1832_v26 = vld [vmem:[%s2510_s7] sm:$0xff]  }
  0xdc   : > { %v587_v8 = vmax.f32 %v563_v30, 0.0  ;;  %1761 = vmatprep.mubr.bf16.mxu0 %v1832_v26 }
  0xdd   : > { %v585_v32 = vmax.f32 %v561_v28, 0.0 }
  0xde   : > { %v549_v34 = vpop.permute.xlu1 %548 }
  0xdf   : > { %v590_v56 = vpack.c.bf16 %v585_v32, %v584_v31  ;;  %v562_v35 = vadd.f32 %v549_v34, %v514_v33  ;;  %v802_v31 = vpop.permute.xlu0 %801 }
  0xe1   : > { %v586_v36 = vmax.f32 %v562_v35, 0.0  ;;  %1709 = vmatprep.subr.bf16.mxu1 %v590_v56 }
  0xe2   : > { %1710 = vmatpush3.bf16.msra.mxu1 %v590_v56  ;;  %v595_v40 = vpop.permute.xlu1 %594 }
  0xe3   : > { %v591_v10 = vpack.c.bf16 %v587_v8, %v586_v36  ;;  %v812_v35 = vpop.permute.xlu0 %811 }
  0xe5   : > { %1711 = vmatprep.subr.bf16.mxu1 %v591_v10 }
  0xe6   : > { %1712 = vmatpush3.bf16.msra.mxu1 %v591_v10  ;;  %v605_v42 = vpop.permute.xlu1 %604 }
  0xe9   : > { %1714 = vmatmul.mubr.msk.bf16.vlgmr.msra.gmra.mrb[0].mxu1 %vm652_vm0, %v1821_v16 }
  0xea   : > { %1717 = vmatprep.mubr.msk.bf16.mxu1 %vm652_vm0, %v1822_v37  ;;  %v615_v47 = vpop.permute.xlu1 %614 }
  0xee   : > { %v625_v63 = vpop.permute.xlu1 %624 }
  0xf1   : > { %1718 = vmatmul.mubr.msk.bf16.gmra.mrb[4].mxu1 %vm652_vm0, %v1823_v38 }
  0xf2   : > { %1729 = vmatprep.mubr.msk.bf16.mxu1 %vm652_vm0, %v1824_v39  ;;  %v777_v0 = vpop.permute.xlu1 %776 }
  0xf6   : > { %v787_v28 = vpop.permute.xlu1 %786 }
  0xfa   : > { %v797_v30 = vpop.permute.xlu1 %796 }
  0xfe   : > { %v807_v32 = vpop.permute.xlu1 %806 }
 0x1bc   : > { %v1715_v44 = vpop.f32.mrb[0].mxu1 }
 0x1bd   : > { %v708_v45 = vadd.f32 %v1715_v44, %v605_v42  ;;  %v699_v46 = vpop.f32.mrb[1].mxu1  ;;  %v822_v44 = vpop.permute.xlu0 %821 }
 0x1be   : > { %v700_v48 = vadd.f32 %v699_v46, %v595_v40  ;;  %v1716_v49 = vpop.f32.mrb[2].mxu1  ;;  %v817_v40 = vpop.permute.xlu1 %816 }
 0x1bf   : > { %v711_v50 = vadd.f32 %v1716_v49, %v610_v43  ;;  %v702_v51 = vpop.f32.mrb[3].mxu1  ;;  %v764_v55 = vmax.f32 %v708_v45, 0.0 }
 0x1c0   : > { %v703_v53 = vadd.f32 %v702_v51, %v600_v41  ;;  %v762_v58 = vmax.f32 %v700_v48, 0.0 }
 0x1c1   : > { %v765_v57 = vmax.f32 %v711_v50, 0.0 }
 0x1c2   : > { %v763_v61 = vmax.f32 %v703_v53, 0.0  ;;  %v827_v53 = vpop.permute.xlu1 %826 }
 0x1c3   : > { %v771_v62 = vpack.c.bf16 %v765_v57, %v764_v55 }
 0x1c4   : > { %v770_v1 = vpack.c.bf16 %v763_v61, %v762_v58  ;;  %v1719_v54 = vpop.f32.mrb[4].mxu1  ;;  %v832_v61 = vpop.permute.xlu0 %831 }
 0x1c5   : > { %v724_v2 = vadd.f32 %v1719_v54, %v625_v63  ;;  %v715_v3 = vpop.f32.mrb[5].mxu1 }
 0x1c6   : > { %v716_v5 = vadd.f32 %v715_v3, %v615_v47  ;;  %v1720_v6 = vpop.f32.mrb[6].mxu1  ;;  %1721 = vmatprep.subr.bf16.mxu1 %v770_v1 }
 0x1c7   : > { %v727_v9 = vadd.f32 %v1720_v6, %v630_v4  ;;  %v718_v11 = vpop.f32.mrb[7].mxu1  ;;  %1722 = vmatpush3.bf16.msra.mxu1 %v770_v1  ;;  %v768_v13 = vmax.f32 %v724_v2, 0.0 }
 0x1c8   : > { %v719_v12 = vadd.f32 %v718_v11, %v620_v52  ;;  %1723 = vmatprep.subr.bf16.mxu1 %v771_v62  ;;  %v766_v15 = vmax.f32 %v716_v5, 0.0  ;;  %v837_v5 = vpop.permute.xlu1 %836 }
 0x1c9   : > { %v769_v14 = vmax.f32 %v727_v9, 0.0 }
 0x1ca   : > { %v767_v17 = vmax.f32 %v719_v12, 0.0 }
 0x1cb   : > { %v773_v60 = vpack.c.bf16 %v769_v14, %v768_v13  ;;  %1724 = vmatpush3.bf16.msra.mxu1 %v771_v62  ;;  %v842_v13 = vpop.permute.xlu0 %841 }
 0x1cc   : > { %v772_v18 = vpack.c.bf16 %v767_v17, %v766_v15 }
 0x1ce   : > { %1725 = vmatprep.subr.bf16.mxu1 %v772_v18 }
 0x1cf   : > { %1726 = vmatpush3.bf16.msra.mxu1 %v772_v18 }
 0x1d0   : > { %1727 = vmatprep.subr.bf16.mxu1 %v773_v60 }
 0x1d3   : > { %1728 = vmatpush3.bf16.msra.mxu1 %v773_v60 }
 0x1d6   : > { %1730 = vmatmul.mubr.msk.bf16.vlgmr.msra.gmra.mrb[8].mxu1 %vm652_vm0, %v1825_v19 }
 0x1d7   : > { %1733 = vmatprep.mubr.msk.bf16.mxu1 %vm652_vm0, %v1826_v20  ;;  %v847_v20 = vpop.permute.xlu1 %846 }
 0x1de   : > { %1734 = vmatmul.mubr.msk.bf16.gmra.mrb[12].mxu1 %vm652_vm0, %v1827_v21 }
 0x1df   : > { %1737 = vmatprep.mubr.msk.bf16.mxu1 %vm652_vm0, %v1828_v22 }
 0x1e6   : > { %1738 = vmatmul.mubr.msk.bf16.gmra.mrb[16].mxu1 %vm652_vm0, %v1829_v23 }
 0x1e7   : > { %1741 = vmatprep.mubr.msk.bf16.mxu1 %vm652_vm0, %v1830_v24 }
 0x1ee   : > { %1742 = vmatmul.mubr.msk.bf16.gmra.mrb[20].mxu1 %vm652_vm0, %v1831_v25  ;;  %v852_v25 = vpop.permute.xlu0 %851 }
 0x2a9   : > { %v1731_v33 = vpop.f32.mrb[8].mxu1 }
 0x2aa   : > { %v961_v34 = vadd.f32 %v1731_v33, %v787_v28  ;;  %v952_v56 = vpop.f32.mrb[9].mxu1 }
 0x2ab   : > { %v953_v36 = vadd.f32 %v952_v56, %v777_v0  ;;  %v1732_v8 = vpop.f32.mrb[10].mxu1 }
 0x2ac   : > { %v964_v10 = vadd.f32 %v1732_v8, %v792_v29  ;;  %v955_v16 = vpop.f32.mrb[11].mxu1  ;;  %v1049_v38 = vmax.f32 %v961_v34, 0.0  ;;  %v1835_v8 = vld [vmem:[%s2510_s7 + $0x18] sm:$0xff]  }
 0x2ad   : > { %v956_v37 = vadd.f32 %v955_v16, %v782_v27  ;;  %v1047_v41 = vmax.f32 %v953_v36, 0.0  ;;  %v1834_v36 = vld [vmem:[%s2510_s7 + $0x10] sm:$0xff]   ;;  %v1837_v16 = vld [vmem:[%s2510_s7 + $0x28] sm:$0xff]  }
 0x2ae   : > { %v1050_v39 = vmax.f32 %v964_v10, 0.0  ;;  %v1836_v10 = vld [vmem:[%s2510_s7 + $0x20] sm:$0xff]  }
 0x2af   : > { %v1048_v42 = vmax.f32 %v956_v37, 0.0  ;;  %v1838_v37 = vld [vmem:[%s2510_s7 + $0x30] sm:$0xff]  }
 0x2b0   : > { %v1064_v43 = vpack.c.bf16 %v1050_v39, %v1049_v38  ;;  %v1839_v38 = vld [vmem:[%s2510_s7 + $0x38] sm:$0xff]   ;;  %v1074_v39 = vpop.permute.xlu1 %1073 }
 0x2b1   : > { %v1735_v45 = vpop.f32.mrb[12].mxu1  ;;  %v1063_v46 = vpack.c.bf16 %v1048_v42, %v1047_v41 }
 0x2b2   : > { %v977_v47 = vadd.f32 %v1735_v45, %v807_v32  ;;  %v968_v48 = vpop.f32.mrb[13].mxu1 }
 0x2b3   : > { %v969_v49 = vadd.f32 %v968_v48, %v797_v30  ;;  %v1736_v50 = vpop.f32.mrb[14].mxu1  ;;  %1745 = vmatprep.subr.bf16.mxu0 %v1063_v46 }
 0x2b4   : > { %v980_v51 = vadd.f32 %v1736_v50, %v812_v35  ;;  %v971_v52 = vpop.f32.mrb[15].mxu1  ;;  %1746 = vmatpush3.bf16.msra.mxu0 %v1063_v46  ;;  %v1053_v57 = vmax.f32 %v977_v47, 0.0  ;;  %v1833_v35 = vld [vmem:[%s2510_s7 + $0x8] sm:$0xff]   ;;  %v1084_v41 = vpop.permute.xlu1 %1083 }
 0x2b5   : > { %v972_v55 = vadd.f32 %v971_v52, %v802_v31  ;;  %1747 = vmatprep.subr.bf16.mxu0 %v1064_v43  ;;  %v1051_v62 = vmax.f32 %v969_v49, 0.0 }
 0x2b6   : > { %v1054_v58 = vmax.f32 %v980_v51, 0.0 }
 0x2b7   : > { %v1052_v63 = vmax.f32 %v972_v55, 0.0 }
 0x2b8   : > { %v1066_v1 = vpack.c.bf16 %v1054_v58, %v1053_v57  ;;  %1748 = vmatpush3.bf16.msra.mxu0 %v1064_v43  ;;  %v1094_v43 = vpop.permute.xlu1 %1093 }
 0x2b9   : > { %v1065_v54 = vpack.c.bf16 %v1052_v63, %v1051_v62  ;;  %v1739_v2 = vpop.f32.mrb[16].mxu1 }
 0x2ba   : > { %v993_v3 = vadd.f32 %v1739_v2, %v827_v53  ;;  %v984_v4 = vpop.f32.mrb[17].mxu1 }
 0x2bb   : > { %v985_v6 = vadd.f32 %v984_v4, %v817_v40  ;;  %v1740_v9 = vpop.f32.mrb[18].mxu1  ;;  %1749 = vmatprep.subr.bf16.mxu0 %v1065_v54  ;;  %v1079_v40 = vpop.permute.xlu0 %1078 }
 0x2bc   : > { %v996_v11 = vadd.f32 %v1740_v9, %v832_v61  ;;  %v987_v12 = vpop.f32.mrb[19].mxu1  ;;  %1750 = vmatpush3.bf16.msra.mxu0 %v1065_v54  ;;  %v1057_v15 = vmax.f32 %v993_v3, 0.0  ;;  %v1104_v50 = vpop.permute.xlu1 %1103 }
 0x2bd   : > { %v988_v14 = vadd.f32 %v987_v12, %v822_v44  ;;  %1751 = vmatprep.subr.bf16.mxu0 %v1066_v1  ;;  %v1055_v60 = vmax.f32 %v985_v6, 0.0 }
 0x2be   : > { %v1058_v17 = vmax.f32 %v996_v11, 0.0 }
 0x2bf   : > { %v1056_v18 = vmax.f32 %v988_v14, 0.0  ;;  %v1089_v42 = vpop.permute.xlu0 %1088 }
 0x2c0   : > { %v1068_v19 = vpack.c.bf16 %v1058_v17, %v1057_v15  ;;  %1752 = vmatpush3.bf16.msra.mxu0 %v1066_v1  ;;  %v1114_v1 = vpop.permute.xlu1 %1113 }
 0x2c1   : > { %v1067_v21 = vpack.c.bf16 %v1056_v18, %v1055_v60  ;;  %v1743_v22 = vpop.f32.mrb[20].mxu1 }
 0x2c2   : > { %v1009_v23 = vadd.f32 %v1743_v22, %v847_v20  ;;  %v1000_v24 = vpop.f32.mrb[21].mxu1 }
 0x2c3   : > { %v1001_v26 = vadd.f32 %v1000_v24, %v837_v5  ;;  %v1744_v0 = vpop.f32.mrb[22].mxu1  ;;  %1753 = vmatprep.subr.bf16.mxu0 %v1067_v21  ;;  %v1099_v44 = vpop.permute.xlu0 %1098 }
 0x2c4   : > { %v1012_v27 = vadd.f32 %v1744_v0, %v852_v25  ;;  %v1003_v28 = vpop.f32.mrb[23].mxu1  ;;  %1754 = vmatpush3.bf16.msra.mxu0 %v1067_v21  ;;  %v1061_v30 = vmax.f32 %v1009_v23, 0.0  ;;  %v1124_v14 = vpop.permute.xlu1 %1123 }
 0x2c5   : > { %v1004_v29 = vadd.f32 %v1003_v28, %v842_v13  ;;  %1755 = vmatprep.subr.bf16.mxu0 %v1068_v19  ;;  %v1059_v32 = vmax.f32 %v1001_v26, 0.0 }
 0x2c6   : > { %v1062_v31 = vmax.f32 %v1012_v27, 0.0 }
 0x2c7   : > { %v1060_v33 = vmax.f32 %v1004_v29, 0.0  ;;  %v1109_v58 = vpop.permute.xlu0 %1108 }
 0x2c8   : > { %v1070_v34 = vpack.c.bf16 %v1062_v31, %v1061_v30  ;;  %1756 = vmatpush3.bf16.msra.mxu0 %v1068_v19  ;;  %v1134_v26 = vpop.permute.xlu1 %1133 }
 0x2c9   : > { %v1069_v56 = vpack.c.bf16 %v1060_v33, %v1059_v32 }
 0x2cb   : > { %1757 = vmatprep.subr.bf16.mxu0 %v1069_v56  ;;  %v1119_v4 = vpop.permute.xlu0 %1118 }
 0x2cc   : > { %1758 = vmatpush3.bf16.msra.mxu0 %v1069_v56  ;;  %v1144_v56 = vpop.permute.xlu1 %1143 }
 0x2cd   : > { %1759 = vmatprep.subr.bf16.mxu0 %v1070_v34 }
 0x2cf   : > { %v1129_v60 = vpop.permute.xlu0 %1128 }
 0x2d0   : > { %1760 = vmatpush3.bf16.msra.mxu0 %v1070_v34 }
 0x2d3   : > { %1762 = vmatmul.mubr.bf16.vlgmr.msra.gmra.mrb[0].mxu0 %v1833_v35  ;;  %v1139_v28 = vpop.permute.xlu0 %1138 }
 0x2d4   : > { %1765 = vmatprep.mubr.bf16.mxu0 %v1834_v36 }
 0x2db   : > { %1766 = vmatmul.mubr.bf16.gmra.mrb[4].mxu0 %v1835_v8 }
 0x2dc   : > { %1769 = vmatprep.mubr.bf16.mxu0 %v1836_v10 }
 0x2e3   : > { %1770 = vmatmul.mubr.bf16.gmra.mrb[8].mxu0 %v1837_v16  ;;  %v1149_v16 = vpop.permute.xlu0 %1148 }
 0x2e4   : > { %1773 = vmatprep.mubr.bf16.mxu0 %v1838_v37 }
 0x2eb   : > { %1774 = vmatmul.mubr.bf16.gmra.mrb[12].mxu0 %v1839_v38 }
 0x3a6   : > { %v1763_v45 = vpop.f32.mrb[0].mxu0 }
 0x3a7   : > { %v1242_v46 = vadd.f32 %v1763_v45, %v1084_v41  ;;  %v1233_v47 = vpop.f32.mrb[1].mxu0 }
 0x3a8   : > { %v1234_v48 = vadd.f32 %v1233_v47, %v1074_v39  ;;  %v1764_v49 = vpop.f32.mrb[2].mxu0 }
 0x3a9   : > { %v1236_v51 = vpop.f32.mrb[3].mxu0  ;;  %v1303_v52 = vsel %vm1296_vm1, %v1242_v46, -inf  ;;  %v1245_v53 = vadd.f32 %v1764_v49, %v1089_v42 }
 0x3aa   : > { %v1237_v55 = vadd.f32 %v1236_v51, %v1079_v40  ;;  %1304 = vmax.xlane.f32.xlu0 %v1303_v52  ;;  %v1297_v57 = vsel %vm1296_vm1, %v1234_v48, -inf }
 0x3ab   : > { %1298 = vmax.xlane.f32.xlu1 %v1297_v57  ;;  %v1306_v63 = vsel %vm1296_vm1, %v1245_v53, -inf }
 0x3ac   : > { %v1300_v61 = vsel %vm1296_vm1, %v1237_v55, -inf }
 0x3ae   : > { %v1767_v62 = vpop.f32.mrb[4].mxu0  ;;  %1301 = vmax.xlane.f32.xlu0 %v1300_v61  ;;  %v1869_v61 = vmov (%p339_p4), 0.0  }
 0x3af   : > { %v1258_v54 = vadd.f32 %v1767_v62, %v1104_v50  ;;  %v1249_v2 = vpop.f32.mrb[5].mxu0  ;;  %1307 = vmax.xlane.f32.xlu1 %v1306_v63  ;;  %1421 = vst.msk [vmem:[%s2512_s9] sm:$0xff] (%p339_p4), %vm1420_vm3, %v1869_v61  ;;  %1422 = vst.msk [vmem:[%s2512_s9 + $0x8] sm:$0xff] (%p339_p4), %vm1420_vm3, %v1869_v61 }
 0x3b0   : > { %v1768_v3 = vpop.f32.mrb[6].mxu0  ;;  %v1250_v5 = vadd.f32 %v1249_v2, %v1094_v43  ;;  %1423 = vst.msk [vmem:[%s2512_s9 + $0x10] sm:$0xff] (%p339_p4), %vm1420_vm3, %v1869_v61  ;;  %1424 = vst.msk [vmem:[%s2512_s9 + $0x18] sm:$0xff] (%p339_p4), %vm1420_vm3, %v1869_v61 }
 0x3b1   : > { %v1261_v6 = vadd.f32 %v1768_v3, %v1109_v58  ;;  %v1252_v9 = vpop.f32.mrb[7].mxu0  ;;  %v1315_v11 = vsel %vm1296_vm1, %v1258_v54, -inf  ;;  %1425 = vst.msk [vmem:[%s2512_s9 + $0x20] sm:$0xff] (%p339_p4), %vm1420_vm3, %v1869_v61  ;;  %1426 = vst.msk [vmem:[%s2512_s9 + $0x28] sm:$0xff] (%p339_p4), %vm1420_vm3, %v1869_v61 }
 0x3b2   : > { %1316 = vmax.xlane.f32.xlu0 %v1315_v11  ;;  %v1253_v12 = vadd.f32 %v1252_v9, %v1099_v44  ;;  %v1309_v15 = vsel %vm1296_vm1, %v1250_v5, -inf  ;;  %1427 = vst.msk [vmem:[%s2512_s9 + $0x30] sm:$0xff] (%p339_p4), %vm1420_vm3, %v1869_v61  ;;  %1428 = vst.msk [vmem:[%s2512_s9 + $0x38] sm:$0xff] (%p339_p4), %vm1420_vm3, %v1869_v61 }
 0x3b3   : > { %v1318_v13 = vsel %vm1296_vm1, %v1261_v6, -inf  ;;  %1429 = vst.msk [vmem:[%s2512_s9 + $0x40] sm:$0xff] (%p339_p4), %vm1420_vm3, %v1869_v61  ;;  %1430 = vst.msk [vmem:[%s2512_s9 + $0x48] sm:$0xff] (%p339_p4), %vm1420_vm3, %v1869_v61 }
 0x3b4   : > { %1319 = vmax.xlane.f32.xlu1 %v1318_v13  ;;  %v1312_v20 = vsel %vm1296_vm1, %v1253_v12, -inf  ;;  %1431 = vst.msk [vmem:[%s2512_s9 + $0x50] sm:$0xff] (%p339_p4), %vm1420_vm3, %v1869_v61  ;;  %1432 = vst.msk [vmem:[%s2512_s9 + $0x58] sm:$0xff] (%p339_p4), %vm1420_vm3, %v1869_v61 }
 0x3b5   : > { %1433 = vst.msk [vmem:[%s2512_s9 + $0x60] sm:$0xff] (%p339_p4), %vm1420_vm3, %v1869_v61  ;;  %1434 = vst.msk [vmem:[%s2512_s9 + $0x68] sm:$0xff] (%p339_p4), %vm1420_vm3, %v1869_v61 }
 0x3b6   : > { %v1771_v17 = vpop.f32.mrb[8].mxu0  ;;  %1310 = vmax.xlane.f32.xlu0 %v1309_v15  ;;  %1435 = vst.msk [vmem:[%s2512_s9 + $0x70] sm:$0xff] (%p339_p4), %vm1420_vm3, %v1869_v61  ;;  %1436 = vst.msk [vmem:[%s2512_s9 + $0x78] sm:$0xff] (%p339_p4), %vm1420_vm3, %v1869_v61 }
 0x3b7   : > { %v1274_v18 = vadd.f32 %v1771_v17, %v1124_v14  ;;  %v1265_v19 = vpop.f32.mrb[9].mxu0 }
 0x3b8   : > { %v1772_v21 = vpop.f32.mrb[10].mxu0  ;;  %1313 = vmax.xlane.f32.xlu1 %v1312_v20  ;;  %v1266_v22 = vadd.f32 %v1265_v19, %v1114_v1 }
 0x3b9   : > { %v1277_v23 = vadd.f32 %v1772_v21, %v1129_v60  ;;  %v1268_v24 = vpop.f32.mrb[11].mxu0  ;;  %v1327_v25 = vsel %vm1296_vm1, %v1274_v18, -inf }
 0x3ba   : > { %1328 = vmax.xlane.f32.xlu0 %v1327_v25  ;;  %v1269_v0 = vadd.f32 %v1268_v24, %v1119_v4  ;;  %v1321_v29 = vsel %vm1296_vm1, %v1266_v22, -inf }
 0x3bb   : > { %v1330_v27 = vsel %vm1296_vm1, %v1277_v23, -inf }
 0x3bc   : > { %1331 = vmax.xlane.f32.xlu1 %v1330_v27  ;;  %v1324_v32 = vsel %vm1296_vm1, %v1269_v0, -inf }
 0x3be   : > { %v1775_v30 = vpop.f32.mrb[12].mxu0  ;;  %1322 = vmax.xlane.f32.xlu0 %v1321_v29 }
 0x3bf   : > { %v1281_v31 = vpop.f32.mrb[13].mxu0  ;;  %v1290_v36 = vadd.f32 %v1775_v30, %v1144_v56 }
 0x3c0   : > { %v1282_v33 = vadd.f32 %v1281_v31, %v1134_v26  ;;  %v1776_v34 = vpop.f32.mrb[14].mxu0  ;;  %1325 = vmax.xlane.f32.xlu1 %v1324_v32 }
 0x3c1   : > { %v1284_v35 = vpop.f32.mrb[15].mxu0  ;;  %v1293_v37 = vadd.f32 %v1776_v34, %v1149_v16  ;;  %v1339_v39 = vsel %vm1296_vm1, %v1290_v36, -inf }
 0x3c2   : > { %v1285_v8 = vadd.f32 %v1284_v35, %v1139_v28  ;;  %v1333_v10 = vsel %vm1296_vm1, %v1282_v33, -inf }
 0x3c3   : > { %1334 = vmax.xlane.f32.xlu0 %v1333_v10  ;;  %v1342_v40 = vsel %vm1296_vm1, %v1293_v37, -inf }
 0x3c4   : > { %v1336_v38 = vsel %vm1296_vm1, %v1285_v8, -inf }
 0x3c5   : > { %1337 = vmax.xlane.f32.xlu1 %v1336_v38 }
 0x3c7   : > { %1340 = vmax.xlane.f32.xlu0 %v1339_v39 }
 0x3c9   : > { %1343 = vmax.xlane.f32.xlu1 %v1342_v40 }
 0x437   : > { %v1305_v41 = vpop.xlane.xlu0 %1304 }
 0x438   : > { %1351 = vst.msk [vmem:[#allocation2 + $0x10] sm:$0xff] %vm1348_vm2, %v1305_v41  ;;  %v1299_v42 = vpop.xlane.xlu1 %1298 }
 0x439   : > { %1349 = vst.msk [vmem:[#allocation2] sm:$0xff] %vm1348_vm2, %v1299_v42 }
 0x43b   : > { %v1302_v43 = vpop.xlane.xlu0 %1301 }
 0x43c   : > { %1350 = vst.msk [vmem:[#allocation2 + $0x8] sm:$0xff] %vm1348_vm2, %v1302_v43  ;;  %v1308_v44 = vpop.xlane.xlu1 %1307 }
 0x43d   : > { %1352 = vst.msk [vmem:[#allocation2 + $0x18] sm:$0xff] %vm1348_vm2, %v1308_v44 }
 0x43f   : > { %v1317_v45 = vpop.xlane.xlu0 %1316 }
 0x440   : > { %1355 = vst.msk [vmem:[#allocation2 + $0x30] sm:$0xff] %vm1348_vm2, %v1317_v45 }
 0x441   : > { %v1320_v46 = vpop.xlane.xlu1 %1319 }
 0x442   : > { %1356 = vst.msk [vmem:[#allocation2 + $0x38] sm:$0xff] %vm1348_vm2, %v1320_v46 }
 0x443   : > { %v1311_v47 = vpop.xlane.xlu0 %1310 }
 0x444   : > { %1353 = vst.msk [vmem:[#allocation2 + $0x20] sm:$0xff] %vm1348_vm2, %v1311_v47 }
 0x445   : > { %v1314_v48 = vpop.xlane.xlu1 %1313 }
 0x446   : > { %1354 = vst.msk [vmem:[#allocation2 + $0x28] sm:$0xff] %vm1348_vm2, %v1314_v48 }
 0x447   : > { %v1329_v49 = vpop.xlane.xlu0 %1328 }
 0x448   : > { %1359 = vst.msk [vmem:[#allocation2 + $0x50] sm:$0xff] %vm1348_vm2, %v1329_v49 }
 0x449   : > { %v1332_v50 = vpop.xlane.xlu1 %1331 }
 0x44a   : > { %1360 = vst.msk [vmem:[#allocation2 + $0x58] sm:$0xff] %vm1348_vm2, %v1332_v50 }
 0x44b   : > { %v1323_v51 = vpop.xlane.xlu0 %1322 }
 0x44c   : > { %1357 = vst.msk [vmem:[#allocation2 + $0x40] sm:$0xff] %vm1348_vm2, %v1323_v51 }
 0x44d   : > { %v1326_v52 = vpop.xlane.xlu1 %1325 }
 0x44e   : > { %1358 = vst.msk [vmem:[#allocation2 + $0x48] sm:$0xff] %vm1348_vm2, %v1326_v52 }
 0x450   : > { %v1335_v53 = vpop.xlane.xlu0 %1334 }
 0x451   : > { %1361 = vst.msk [vmem:[#allocation2 + $0x60] sm:$0xff] %vm1348_vm2, %v1335_v53  ;;  %1419 = sbr.rel (!%p339_p4) target bundleno = 1112 (0x458), region = 68 }
 0x452   : > { %v1338_v55 = vpop.xlane.xlu1 %1337 }
 0x453   : > { %1362 = vst.msk [vmem:[#allocation2 + $0x68] sm:$0xff] %vm1348_vm2, %v1338_v55 }
 0x454   : > { %v1341_v57 = vpop.xlane.xlu0 %1340 }
 0x455   : > { %1363 = vst.msk [vmem:[#allocation2 + $0x70] sm:$0xff] %vm1348_vm2, %v1341_v57 }
 0x456   : > { %v1344_v58 = vpop.xlane.xlu1 %1343 }
 0x457   : > { %1364 = vst.msk [vmem:[#allocation2 + $0x78] sm:$0xff] %vm1348_vm2, %v1344_v58 }
 0x458 PF: > { %1841 = vset.pattern.permute.xlu1 %v1868_v7  ;;  %1840 = vset.pattern.permute.xlu0 %v1868_v7  ;;  %v1446_v62 = vld [vmem:[#allocation2 + $0x10] sm:$0xff]  ;;  %v1444_v63 = vld [vmem:[#allocation2] sm:$0xff]  ;;  %v1447_v1 = vld [vmem:[#allocation2 + $0x18] sm:$0xff]  ;;  %v1441_v17 = vand.u32 127, %v400_v59  ;;  %v1442_v60 = vstv %s1856_s30  ;;  %vm1572_vm5 = vcmask 15360  }
 0x459   : > { %1488 = vperm.xlu1 %1841, %v1446_v62   ;;  %1478 = vperm.xlu0 %1840, %v1444_v63   ;;  %v1445_v54 = vld [vmem:[#allocation2 + $0x8] sm:$0xff]  ;;  %v1448_v3 = vld [vmem:[#allocation2 + $0x20] sm:$0xff]  ;;  %v1451_v4 = vld [vmem:[#allocation2 + $0x38] sm:$0xff] }
 0x45a   : > { %v1449_v2 = vld [vmem:[#allocation2 + $0x28] sm:$0xff]  ;;  %v1450_v5 = vld [vmem:[#allocation2 + $0x30] sm:$0xff]  ;;  %v1452_v9 = vld [vmem:[#allocation2 + $0x40] sm:$0xff]  ;;  %vm2349_vm4 = vcmp.eq.s32.totalorder %v1441_v17, %v1442_v60 }
 0x45b   : > { %v1453_v6 = vld [vmem:[#allocation2 + $0x48] sm:$0xff]  ;;  %v1455_v7 = vld [vmem:[#allocation2 + $0x58] sm:$0xff]  ;;  %v1454_v11 = vld [vmem:[#allocation2 + $0x50] sm:$0xff] }
 0x45c   : > { %v1457_v12 = vld [vmem:[#allocation2 + $0x68] sm:$0xff]  ;;  %v1456_v13 = vld [vmem:[#allocation2 + $0x60] sm:$0xff]  ;;  %v1458_v15 = vld [vmem:[#allocation2 + $0x70] sm:$0xff] }
 0x45d   : > { %1493 = vperm.xlu1 %1841, %v1447_v1   ;;  %1483 = vperm.xlu0 %1840, %v1445_v54   ;;  %v1462_v18 = vld [vmem:[%s2512_s9 + $0x10] sm:$0xff]  ;;  %v1460_v20 = vld [vmem:[%s2512_s9] sm:$0xff]  ;;  %v1463_v24 = vld [vmem:[%s2512_s9 + $0x18] sm:$0xff] }
 0x45e   : > { %v1459_v14 = vld [vmem:[#allocation2 + $0x78] sm:$0xff]  ;;  %v1461_v25 = vld [vmem:[%s2512_s9 + $0x8] sm:$0xff]  ;;  %v1464_v30 = vld [vmem:[%s2512_s9 + $0x20] sm:$0xff] }
 0x45f   : > { %v1465_v29 = vld [vmem:[%s2512_s9 + $0x28] sm:$0xff]  ;;  %v1467_v56 = vld [vmem:[%s2512_s9 + $0x38] sm:$0xff]  ;;  %v1466_v35 = vld [vmem:[%s2512_s9 + $0x30] sm:$0xff] }
 0x460   : > { %v1469_v37 = vld [vmem:[%s2512_s9 + $0x48] sm:$0xff]  ;;  %v1468_v38 = vld [vmem:[%s2512_s9 + $0x40] sm:$0xff]  ;;  %v1471_v43 = vld [vmem:[%s2512_s9 + $0x58] sm:$0xff] }
 0x461   : > { %1503 = vperm.xlu1 %1841, %v1449_v2   ;;  %1498 = vperm.xlu0 %1840, %v1448_v3   ;;  %v1470_v44 = vld [vmem:[%s2512_s9 + $0x50] sm:$0xff]  ;;  %v1473_v49 = vld [vmem:[%s2512_s9 + $0x68] sm:$0xff]  ;;  %v1472_v50 = vld [vmem:[%s2512_s9 + $0x60] sm:$0xff] }
 0x462   : > { %v1475_v57 = vld [vmem:[%s2512_s9 + $0x78] sm:$0xff]  ;;  %v1474_v58 = vld [vmem:[%s2512_s9 + $0x70] sm:$0xff] }
 0x465   : > { %1513 = vperm.xlu1 %1841, %v1451_v4   ;;  %1508 = vperm.xlu0 %1840, %v1450_v5  }
 0x469   : > { %1523 = vperm.xlu1 %1841, %v1453_v6   ;;  %1518 = vperm.xlu0 %1840, %v1452_v9  }
 0x46d   : > { %1533 = vperm.xlu1 %1841, %v1455_v7   ;;  %1528 = vperm.xlu0 %1840, %v1454_v11  }
 0x471   : > { %1543 = vperm.xlu1 %1841, %v1457_v12   ;;  %1538 = vperm.xlu0 %1840, %v1456_v13  }
 0x475   : > { %1553 = vperm.xlu1 %1841, %v1459_v14   ;;  %1548 = vperm.xlu0 %1840, %v1458_v15  }
 0x4d8   : > { %v1489_v21 = vpop.permute.xlu1 %1488  ;;  %v1479_v22 = vpop.permute.xlu0 %1478 }
 0x4d9   : > { %v1558_v23 = vsel %vm2349_vm4, %v1489_v21, %v1462_v18  ;;  %v1556_v59 = vsel %vm2349_vm4, %v1479_v22, %v1460_v20 }
 0x4da   : > { %1575 = vst.msk [vmem:[%s2512_s9 + $0x10] sm:$0xff] %vm1572_vm5, %v1558_v23  ;;  %1573 = vst.msk [vmem:[%s2512_s9] sm:$0xff] %vm1572_vm5, %v1556_v59 }
 0x4dc   : > { %v1494_v26 = vpop.permute.xlu1 %1493  ;;  %v1484_v0 = vpop.permute.xlu0 %1483 }
 0x4dd   : > { %v1559_v27 = vsel %vm2349_vm4, %v1494_v26, %v1463_v24  ;;  %v1557_v28 = vsel %vm2349_vm4, %v1484_v0, %v1461_v25 }
 0x4de   : > { %1576 = vst.msk [vmem:[%s2512_s9 + $0x18] sm:$0xff] %vm1572_vm5, %v1559_v27  ;;  %1574 = vst.msk [vmem:[%s2512_s9 + $0x8] sm:$0xff] %vm1572_vm5, %v1557_v28 }
 0x4e0   : > { %v1504_v31 = vpop.permute.xlu1 %1503  ;;  %v1499_v32 = vpop.permute.xlu0 %1498 }
 0x4e1   : > { %v1561_v33 = vsel %vm2349_vm4, %v1504_v31, %v1465_v29  ;;  %v1560_v34 = vsel %vm2349_vm4, %v1499_v32, %v1464_v30 }
 0x4e2   : > { %1578 = vst.msk [vmem:[%s2512_s9 + $0x28] sm:$0xff] %vm1572_vm5, %v1561_v33  ;;  %1577 = vst.msk [vmem:[%s2512_s9 + $0x20] sm:$0xff] %vm1572_vm5, %v1560_v34 }
 0x4e4   : > { %v1514_v36 = vpop.permute.xlu1 %1513  ;;  %v1509_v8 = vpop.permute.xlu0 %1508 }
 0x4e5   : > { %v1563_v10 = vsel %vm2349_vm4, %v1514_v36, %v1467_v56  ;;  %v1562_v16 = vsel %vm2349_vm4, %v1509_v8, %v1466_v35 }
 0x4e6   : > { %1580 = vst.msk [vmem:[%s2512_s9 + $0x38] sm:$0xff] %vm1572_vm5, %v1563_v10  ;;  %1579 = vst.msk [vmem:[%s2512_s9 + $0x30] sm:$0xff] %vm1572_vm5, %v1562_v16 }
 0x4e8   : > { %v1524_v39 = vpop.permute.xlu1 %1523  ;;  %v1519_v40 = vpop.permute.xlu0 %1518 }
 0x4e9   : > { %v1565_v41 = vsel %vm2349_vm4, %v1524_v39, %v1469_v37  ;;  %v1564_v42 = vsel %vm2349_vm4, %v1519_v40, %v1468_v38 }
 0x4ea   : > { %1582 = vst.msk [vmem:[%s2512_s9 + $0x48] sm:$0xff] %vm1572_vm5, %v1565_v41  ;;  %1581 = vst.msk [vmem:[%s2512_s9 + $0x40] sm:$0xff] %vm1572_vm5, %v1564_v42 }
 0x4ec   : > { %v1534_v45 = vpop.permute.xlu1 %1533  ;;  %v1529_v46 = vpop.permute.xlu0 %1528 }
 0x4ed   : > { %v1567_v47 = vsel %vm2349_vm4, %v1534_v45, %v1471_v43  ;;  %v1566_v48 = vsel %vm2349_vm4, %v1529_v46, %v1470_v44 }
 0x4ee   : > { %1584 = vst.msk [vmem:[%s2512_s9 + $0x58] sm:$0xff] %vm1572_vm5, %v1567_v47  ;;  %1583 = vst.msk [vmem:[%s2512_s9 + $0x50] sm:$0xff] %vm1572_vm5, %v1566_v48 }
 0x4f0   : > { %v1544_v51 = vpop.permute.xlu1 %1543  ;;  %v1539_v52 = vpop.permute.xlu0 %1538 }
 0x4f1   : > { %v1569_v53 = vsel %vm2349_vm4, %v1544_v51, %v1473_v49  ;;  %v1568_v55 = vsel %vm2349_vm4, %v1539_v52, %v1472_v50 }
 0x4f2   : > { %1586 = vst.msk [vmem:[%s2512_s9 + $0x68] sm:$0xff] %vm1572_vm5, %v1569_v53  ;;  %1585 = vst.msk [vmem:[%s2512_s9 + $0x60] sm:$0xff] %vm1572_vm5, %v1568_v55 }
 0x4f4   : > { %v1554_v61 = vpop.permute.xlu1 %1553  ;;  %v1549_v62 = vpop.permute.xlu0 %1548 }
 0x4f5   : > { %v1571_v63 = vsel %vm2349_vm4, %v1554_v61, %v1475_v57  ;;  %v1570_v1 = vsel %vm2349_vm4, %v1549_v62, %v1474_v58 }
 0x4f6   : > { %1588 = vst.msk [vmem:[%s2512_s9 + $0x78] sm:$0xff] %vm1572_vm5, %v1571_v63  ;;  %1587 = vst.msk [vmem:[%s2512_s9 + $0x70] sm:$0xff] %vm1572_vm5, %v1570_v1 }
 0x4f7 PF: > { %s19_s11 = sadd.s32 1, %s1864_s11   ;;  %s2515_s30 = smov %s1860_s10 }
 0x4f8   : > { %p16_p6 = scmp.ge.s32.totalorder %s19_s11, 4   ;;  %s2516_s10 = smov %s2518_s12 }
 0x4fa   :  { %18 = sbr.rel (!%p16_p6) target bundleno = 2 (0x2), region = 98 }

</bundles_post_ra>
